<compile_context>
chip_gen: v5e
topology: v5e:2x2
jax: 0.10.0
libtpu: 0.0.40
codegen_flags: <defaults>
</compile_context>

<pallas_src>
import jax
import jax.numpy as jnp
from jax.experimental import pallas as pl
from jax.experimental.pallas import tpu as pltpu

TILE_B = 16            # batch elements per grid step
ROWS = 48 * TILE_B     # conv-stage rows per grid step (l2-major within tile)


# ----------------------------------------------------------------------------
# Fused Pallas kernel: conv1 -> relu -> conv2 -> relu -> fc1 -> relu -> fc2 ->
# softmax, all intermediates VMEM/vreg resident.
# ----------------------------------------------------------------------------
def _healpix_fused_kernel(x_ref, w1_ref, b1_ref, w2_ref, b2_ref,
                          wfc1_ref, bfc1_ref, wfc2_ref, bfc2_ref, o_ref):
    # conv1 + ReLU as a block-diagonal im2col matmul: (ROWS,16) @ (16,128).
    x = x_ref[...].astype(jnp.bfloat16)
    h1 = jnp.dot(x, w1_ref[...], preferred_element_type=jnp.float32)
    h1 = jnp.maximum(h1 + b1_ref[...], 0.0)                        # (ROWS,128)

    # conv2 + ReLU: (ROWS,128) @ (128,64).
    h2 = jnp.dot(h1.astype(jnp.bfloat16), w2_ref[...],
                 preferred_element_type=jnp.float32)
    h2 = jnp.maximum(h2 + b2_ref[...], 0.0).astype(jnp.bfloat16)   # (ROWS,64)

    # fc1 + ReLU: contraction over (position l2, channel co) done as 48
    # sublane-aligned (TILE_B,64)@(64,128) matmuls (rows are l2-major), so no
    # cross-lane relayout is needed inside the kernel.
    acc = jnp.zeros((TILE_B, 128), jnp.float32)
    for l2 in range(48):
        acc = acc + jnp.dot(h2[l2 * TILE_B:(l2 + 1) * TILE_B, :],
                            wfc1_ref[l2],
                            preferred_element_type=jnp.float32)
    h3 = jnp.maximum(acc + bfc1_ref[...], 0.0)                     # (TILE_B,128)

    # TODO(synk): F.dropout(x, training=self.training) — inference-mode
    # identity only; train-mode stochastic dropout not implemented.

    # fc2 (columns padded 10 -> 128 for lane-dense stores) + softmax(dim=1).
    logits = jnp.dot(h3.astype(jnp.bfloat16), wfc2_ref[...],
                     preferred_element_type=jnp.float32) + bfc2_ref[...]
    m = jnp.max(logits, axis=1, keepdims=True)
    e = jnp.exp(logits - m)                # padded cols: exp(-1e30 - m) == 0
    s = jnp.sum(e, axis=1, keepdims=True)
    o_ref[...] = e * pl.reciprocal(s, approx=True)


# ----------------------------------------------------------------------------
# Deterministic parameter init (PyTorch shapes; Kaiming-uniform-style bounds)
# ----------------------------------------------------------------------------
def init_params(key):
    ks = jax.random.split(key, 8)

    def u(k, shape, fan_in):
        bound = 1.0 / jnp.sqrt(jnp.float32(fan_in))
        return jax.random.uniform(k, shape, jnp.float32, -bound, bound)

    return dict(
        conv1_w=u(ks[0], (32, 1, 4), 4),        # nn.Conv1d(1, 32, 4, stride=4)
        conv1_b=u(ks[1], (32,), 4),
        conv2_w=u(ks[2], (64, 32, 4), 32 * 4),  # nn.Conv1d(32, 64, 4, stride=4)
        conv2_b=u(ks[3], (64,), 32 * 4),
        fc1_w=u(ks[4], (128, 48 * 64), 48 * 64),
        fc1_b=u(ks[5], (128,), 48 * 64),
        fc2_w=u(ks[6], (10, 128), 128),
        fc2_b=u(ks[7], (10,), 128),
    )


# ----------------------------------------------------------------------------
# One-time parameter re-layout (hoisted out of the forward pass)
# ----------------------------------------------------------------------------
def prepare_params(params):
    f32, bf16 = jnp.float32, jnp.bfloat16
    # conv1 (32,1,4) -> block-diagonal (16,128): W1[4k+kk, 32k+ci] = w[ci,0,kk]
    w1s = jnp.transpose(params["conv1_w"].reshape(32, 4))          # (4, 32)
    w1 = jnp.kron(jnp.eye(4, dtype=f32), w1s)                      # (16, 128)
    b1 = jnp.tile(params["conv1_b"], 4).reshape(1, 128)
    # conv2 (64,32,4) -> (128,64) with row index k*32+ci
    w2 = jnp.transpose(params["conv2_w"], (2, 1, 0)).reshape(128, 64)
    b2 = params["conv2_b"].reshape(1, 64)
    # fc1 (128,3072), PyTorch column j = co*48 + l2 -> (48, 64, 128) = [l2,co,m]
    wfc1 = jnp.transpose(params["fc1_w"]).reshape(64, 48, 128)
    wfc1 = jnp.transpose(wfc1, (1, 0, 2))
    bfc1 = params["fc1_b"].reshape(1, 128)
    # fc2 (10,128) -> lane-dense (128,128); padded bias -1e30 => softmax 0
    wfc2 = jnp.zeros((128, 128), f32).at[:, :10].set(
        jnp.transpose(params["fc2_w"]))
    bfc2 = jnp.full((1, 128), -1e30, f32).at[0, :10].set(params["fc2_b"])
    return dict(w1=w1.astype(bf16), b1=b1.astype(f32),
                w2=w2.astype(bf16), b2=b2.astype(f32),
                wfc1=wfc1.astype(bf16), bfc1=bfc1.astype(f32),
                wfc2=wfc2.astype(bf16), bfc2=bfc2.astype(f32))


# ----------------------------------------------------------------------------
# Forward pass (single fused pallas_call, batch-tiled "parallel" grid)
# ----------------------------------------------------------------------------
@jax.jit
def healpix_net_forward(prepped, x):
    n = x.shape[0]
    assert x.shape[1] == 1 and x.shape[2] == 768
    n_tiles = pl.cdiv(n, TILE_B)
    n_pad = n_tiles * TILE_B

    xr = x.reshape(n, 48, 16)
    if n_pad != n:
        xr = jnp.concatenate(
            [xr, jnp.zeros((n_pad - n, 48, 16), xr.dtype)], axis=0)
    # l2-major row layout per batch tile: (n_tiles, ROWS = 48*TILE_B, 16)
    xt = (xr.reshape(n_tiles, TILE_B, 48, 16)
            .transpose(0, 2, 1, 3)
            .reshape(n_tiles, ROWS, 16))

    flops = int(n_pad) * (48 * (2 * 16 * 128) + 48 * (2 * 128 * 64)
                          + 2 * 3072 * 128 + 2 * 128 * 128)
    bytes_accessed = (int(n_pad) * (48 * 16 * 4 + 128 * 4)
                      + 2 * (16 * 128 + 128 * 64 + 48 * 64 * 128 + 128 * 128)
                      + 4 * (128 + 64 + 128 + 128))

    out = pl.pallas_call(
        _healpix_fused_kernel,
        grid=(n_tiles,),
        in_specs=[
            pl.BlockSpec((None, ROWS, 16), lambda i: (i, 0, 0)),     # x tile
            pl.BlockSpec((16, 128), lambda i: (0, 0)),               # W1 (bd)
            pl.BlockSpec((1, 128), lambda i: (0, 0)),                # b1
            pl.BlockSpec((128, 64), lambda i: (0, 0)),               # W2
            pl.BlockSpec((1, 64), lambda i: (0, 0)),                 # b2
            pl.BlockSpec((48, 64, 128), lambda i: (0, 0, 0)),        # Wfc1
            pl.BlockSpec((1, 128), lambda i: (0, 0)),                # bfc1
            pl.BlockSpec((128, 128), lambda i: (0, 0)),              # Wfc2
            pl.BlockSpec((1, 128), lambda i: (0, 0)),                # bfc2
        ],
        out_specs=pl.BlockSpec((TILE_B, 128), lambda i: (i, 0)),
        out_shape=jax.ShapeDtypeStruct((n_pad, 128), jnp.float32),
        compiler_params=pltpu.CompilerParams(
            dimension_semantics=("parallel",)),
        cost_estimate=pl.CostEstimate(
            flops=flops, transcendentals=int(n_pad) * 129,
            bytes_accessed=int(bytes_accessed)),
    )(xt, prepped["w1"], prepped["b1"], prepped["w2"], prepped["b2"],
      prepped["wfc1"], prepped["bfc1"], prepped["wfc2"], prepped["bfc2"])

    return out[:n, :10]


# ----------------------------------------------------------------------------
# Plain-JAX f32 reference (PyTorch semantics) for correctness checking
# ----------------------------------------------------------------------------
def reference_forward(params, x):
    n = x.shape[0]
    xr = x.reshape(n, 192, 4)
    y1 = jnp.einsum("nlk,ck->nlc", xr, params["conv1_w"].reshape(32, 4))
    y1 = jax.nn.relu(y1 + params["conv1_b"])                 # (n,192,32)
    y1 = y1.reshape(n, 48, 4, 32)                            # (n,l2,k,ci)
    y2 = jnp.einsum("nlkc,dck->nld", y1, params["conv2_w"])
    y2 = jax.nn.relu(y2 + params["conv2_b"])                 # (n,48,64)
    flat = jnp.transpose(y2, (0, 2, 1)).reshape(n, 64 * 48)  # j = co*48+l2
    h = jax.nn.relu(flat @ params["fc1_w"].T + params["fc1_b"])
    logits = h @ params["fc2_w"].T + params["fc2_b"]
    return jax.nn.softmax(logits, axis=1)


if __name__ == "__main__":
    key = jax.random.PRNGKey(0)
    pkey, xkey = jax.random.split(key)
    params = init_params(pkey)
    prepped = prepare_params(params)      # one-time parameter re-layout

    N = 2
    x = jax.random.normal(xkey, (N, 1, 768), dtype=jnp.float32)

    out = healpix_net_forward(prepped, x)
    out = jax.block_until_ready(out)

    assert out.shape == (N, 10)
    assert out.dtype == jnp.float32
    # softmax rows sum to ~1 (bf16 MXU operands + approx reciprocal).
    assert bool(jnp.all(jnp.abs(jnp.sum(out, axis=1) - 1.0) < 5e-3))
    # matches the plain-JAX f32 reference within bf16 tolerance.
    ref = reference_forward(params, x)
    assert bool(jnp.max(jnp.abs(out - ref)) < 2e-2)
    print("KERNEL_OK")
</pallas_src>

<mosaic_0001>
module attributes {stable_mosaic.version = 11 : i64} {
  func.func @_healpix_fused_kernel(%arg0: i32, %arg1: memref<1x768x16xf32, #tpu.memory_space<vmem>>, %arg2: memref<16x128xbf16, #tpu.memory_space<vmem>>, %arg3: memref<1x128xf32, #tpu.memory_space<vmem>>, %arg4: memref<128x64xbf16, #tpu.memory_space<vmem>>, %arg5: memref<1x64xf32, #tpu.memory_space<vmem>>, %arg6: memref<48x64x128xbf16, #tpu.memory_space<vmem>>, %arg7: memref<1x128xf32, #tpu.memory_space<vmem>>, %arg8: memref<128x128xbf16, #tpu.memory_space<vmem>>, %arg9: memref<1x128xf32, #tpu.memory_space<vmem>>, %arg10: memref<16x128xf32, #tpu.memory_space<vmem>>) attributes {dimension_semantics = [#tpu.dimension_semantics<parallel>], iteration_bounds = array<i64: 1>, scalar_prefetch = 0 : i64, scratch_operands = 0 : i64, tpu.core_type = #tpu.core_type<tc>, window_params = [{transform_indices = @transform_0, window_bounds = array<i64: 1, 768, 16>}, {pipeline_mode = #tpu.pipeline_mode<synchronous>, transform_indices = @transform_1, window_bounds = array<i64: 16, 128>}, {pipeline_mode = #tpu.pipeline_mode<synchronous>, transform_indices = @transform_2, window_bounds = array<i64: 1, 128>}, {pipeline_mode = #tpu.pipeline_mode<synchronous>, transform_indices = @transform_3, window_bounds = array<i64: 128, 64>}, {pipeline_mode = #tpu.pipeline_mode<synchronous>, transform_indices = @transform_4, window_bounds = array<i64: 1, 64>}, {pipeline_mode = #tpu.pipeline_mode<synchronous>, transform_indices = @transform_5, window_bounds = array<i64: 48, 64, 128>}, {pipeline_mode = #tpu.pipeline_mode<synchronous>, transform_indices = @transform_6, window_bounds = array<i64: 1, 128>}, {pipeline_mode = #tpu.pipeline_mode<synchronous>, transform_indices = @transform_7, window_bounds = array<i64: 128, 128>}, {pipeline_mode = #tpu.pipeline_mode<synchronous>, transform_indices = @transform_8, window_bounds = array<i64: 1, 128>}, {transform_indices = @transform_9, window_bounds = array<i64: 16, 128>}]} {
    %c0 = arith.constant 0 : index
    %c0_0 = arith.constant 0 : index
    %c0_1 = arith.constant 0 : index
    %0 = vector.load %arg1[%c0, %c0_0, %c0_1] : memref<1x768x16xf32, #tpu.memory_space<vmem>>, vector<1x768x16xf32>
    %1 = vector.shape_cast %0 : vector<1x768x16xf32> to vector<768x16xf32>
    %2 = arith.truncf %1 : vector<768x16xf32> to vector<768x16xbf16>
    %c0_2 = arith.constant 0 : index
    %c0_3 = arith.constant 0 : index
    %3 = vector.load %arg2[%c0_2, %c0_3] : memref<16x128xbf16, #tpu.memory_space<vmem>>, vector<16x128xbf16>
    %cst = arith.constant dense<0.000000e+00> : vector<768x128xf32>
    %4 = tpu.matmul %2, %3, %cst {dimension_numbers = #tpu.dot_dimension_numbers<[1], [0], [0], [1], [0, 0, 1, 1], [], []>} : vector<768x16xbf16>, vector<16x128xbf16>, vector<768x128xf32> -> vector<768x128xf32>
    %c0_4 = arith.constant 0 : index
    %c0_5 = arith.constant 0 : index
    %5 = vector.load %arg3[%c0_4, %c0_5] : memref<1x128xf32, #tpu.memory_space<vmem>>, vector<1x128xf32>
    %6 = vector.broadcast %5 : vector<1x128xf32> to vector<768x128xf32>
    %7 = arith.addf %4, %6 : vector<768x128xf32>
    %cst_6 = arith.constant 0.000000e+00 : f32
    %8 = vector.broadcast %cst_6 : f32 to vector<768x128xf32>
    %9 = arith.maximumf %7, %8 : vector<768x128xf32>
    %10 = arith.truncf %9 : vector<768x128xf32> to vector<768x128xbf16>
    %c0_7 = arith.constant 0 : index
    %c0_8 = arith.constant 0 : index
    %11 = vector.load %arg4[%c0_7, %c0_8] : memref<128x64xbf16, #tpu.memory_space<vmem>>, vector<128x64xbf16>
    %cst_9 = arith.constant dense<0.000000e+00> : vector<768x64xf32>
    %12 = tpu.matmul %10, %11, %cst_9 {dimension_numbers = #tpu.dot_dimension_numbers<[1], [0], [0], [1], [0, 0, 1, 1], [], []>} : vector<768x128xbf16>, vector<128x64xbf16>, vector<768x64xf32> -> vector<768x64xf32>
    %c0_10 = arith.constant 0 : index
    %c0_11 = arith.constant 0 : index
    %13 = vector.load %arg5[%c0_10, %c0_11] : memref<1x64xf32, #tpu.memory_space<vmem>>, vector<1x64xf32>
    %14 = vector.broadcast %13 : vector<1x64xf32> to vector<768x64xf32>
    %15 = arith.addf %12, %14 : vector<768x64xf32>
    %cst_12 = arith.constant 0.000000e+00 : f32
    %16 = vector.broadcast %cst_12 : f32 to vector<768x64xf32>
    %17 = arith.maximumf %15, %16 : vector<768x64xf32>
    %18 = arith.truncf %17 : vector<768x64xf32> to vector<768x64xbf16>
    %cst_13 = arith.constant 0.000000e+00 : f32
    %19 = vector.broadcast %cst_13 : f32 to vector<16x128xf32>
    %20 = vector.extract_strided_slice %18 {offsets = [0, 0], sizes = [16, 64], strides = [1, 1]} : vector<768x64xbf16> to vector<16x64xbf16>
    %c0_14 = arith.constant 0 : index
    %c0_15 = arith.constant 0 : index
    %c0_16 = arith.constant 0 : index
    %21 = vector.load %arg6[%c0_14, %c0_15, %c0_16] : memref<48x64x128xbf16, #tpu.memory_space<vmem>>, vector<1x64x128xbf16>
    %22 = vector.shape_cast %21 : vector<1x64x128xbf16> to vector<64x128xbf16>
    %cst_17 = arith.constant dense<0.000000e+00> : vector<16x128xf32>
    %23 = tpu.matmul %20, %22, %cst_17 {dimension_numbers = #tpu.dot_dimension_numbers<[1], [0], [0], [1], [0, 0, 1, 1], [], []>} : vector<16x64xbf16>, vector<64x128xbf16>, vector<16x128xf32> -> vector<16x128xf32>
    %24 = arith.addf %19, %23 : vector<16x128xf32>
    %25 = vector.extract_strided_slice %18 {offsets = [16, 0], sizes = [16, 64], strides = [1, 1]} : vector<768x64xbf16> to vector<16x64xbf16>
    %c1 = arith.constant 1 : index
    %c0_18 = arith.constant 0 : index
    %c0_19 = arith.constant 0 : index
    %26 = vector.load %arg6[%c1, %c0_18, %c0_19] : memref<48x64x128xbf16, #tpu.memory_space<vmem>>, vector<1x64x128xbf16>
    %27 = vector.shape_cast %26 : vector<1x64x128xbf16> to vector<64x128xbf16>
    %cst_20 = arith.constant dense<0.000000e+00> : vector<16x128xf32>
    %28 = tpu.matmul %25, %27, %cst_20 {dimension_numbers = #tpu.dot_dimension_numbers<[1], [0], [0], [1], [0, 0, 1, 1], [], []>} : vector<16x64xbf16>, vector<64x128xbf16>, vector<16x128xf32> -> vector<16x128xf32>
    %29 = arith.addf %24, %28 : vector<16x128xf32>
    %30 = vector.extract_strided_slice %18 {offsets = [32, 0], sizes = [16, 64], strides = [1, 1]} : vector<768x64xbf16> to vector<16x64xbf16>
    %c2 = arith.constant 2 : index
    %c0_21 = arith.constant 0 : index
    %c0_22 = arith.constant 0 : index
    %31 = vector.load %arg6[%c2, %c0_21, %c0_22] : memref<48x64x128xbf16, #tpu.memory_space<vmem>>, vector<1x64x128xbf16>
    %32 = vector.shape_cast %31 : vector<1x64x128xbf16> to vector<64x128xbf16>
    %cst_23 = arith.constant dense<0.000000e+00> : vector<16x128xf32>
    %33 = tpu.matmul %30, %32, %cst_23 {dimension_numbers = #tpu.dot_dimension_numbers<[1], [0], [0], [1], [0, 0, 1, 1], [], []>} : vector<16x64xbf16>, vector<64x128xbf16>, vector<16x128xf32> -> vector<16x128xf32>
    %34 = arith.addf %29, %33 : vector<16x128xf32>
    %35 = vector.extract_strided_slice %18 {offsets = [48, 0], sizes = [16, 64], strides = [1, 1]} : vector<768x64xbf16> to vector<16x64xbf16>
    %c3 = arith.constant 3 : index
    %c0_24 = arith.constant 0 : index
    %c0_25 = arith.constant 0 : index
    %36 = vector.load %arg6[%c3, %c0_24, %c0_25] : memref<48x64x128xbf16, #tpu.memory_space<vmem>>, vector<1x64x128xbf16>
    %37 = vector.shape_cast %36 : vector<1x64x128xbf16> to vector<64x128xbf16>
    %cst_26 = arith.constant dense<0.000000e+00> : vector<16x128xf32>
    %38 = tpu.matmul %35, %37, %cst_26 {dimension_numbers = #tpu.dot_dimension_numbers<[1], [0], [0], [1], [0, 0, 1, 1], [], []>} : vector<16x64xbf16>, vector<64x128xbf16>, vector<16x128xf32> -> vector<16x128xf32>
    %39 = arith.addf %34, %38 : vector<16x128xf32>
    %40 = vector.extract_strided_slice %18 {offsets = [64, 0], sizes = [16, 64], strides = [1, 1]} : vector<768x64xbf16> to vector<16x64xbf16>
    %c4 = arith.constant 4 : index
    %c0_27 = arith.constant 0 : index
    %c0_28 = arith.constant 0 : index
    %41 = vector.load %arg6[%c4, %c0_27, %c0_28] : memref<48x64x128xbf16, #tpu.memory_space<vmem>>, vector<1x64x128xbf16>
    %42 = vector.shape_cast %41 : vector<1x64x128xbf16> to vector<64x128xbf16>
    %cst_29 = arith.constant dense<0.000000e+00> : vector<16x128xf32>
    %43 = tpu.matmul %40, %42, %cst_29 {dimension_numbers = #tpu.dot_dimension_numbers<[1], [0], [0], [1], [0, 0, 1, 1], [], []>} : vector<16x64xbf16>, vector<64x128xbf16>, vector<16x128xf32> -> vector<16x128xf32>
    %44 = arith.addf %39, %43 : vector<16x128xf32>
    %45 = vector.extract_strided_slice %18 {offsets = [80, 0], sizes = [16, 64], strides = [1, 1]} : vector<768x64xbf16> to vector<16x64xbf16>
    %c5 = arith.constant 5 : index
    %c0_30 = arith.constant 0 : index
    %c0_31 = arith.constant 0 : index
    %46 = vector.load %arg6[%c5, %c0_30, %c0_31] : memref<48x64x128xbf16, #tpu.memory_space<vmem>>, vector<1x64x128xbf16>
    %47 = vector.shape_cast %46 : vector<1x64x128xbf16> to vector<64x128xbf16>
    %cst_32 = arith.constant dense<0.000000e+00> : vector<16x128xf32>
    %48 = tpu.matmul %45, %47, %cst_32 {dimension_numbers = #tpu.dot_dimension_numbers<[1], [0], [0], [1], [0, 0, 1, 1], [], []>} : vector<16x64xbf16>, vector<64x128xbf16>, vector<16x128xf32> -> vector<16x128xf32>
    %49 = arith.addf %44, %48 : vector<16x128xf32>
    %50 = vector.extract_strided_slice %18 {offsets = [96, 0], sizes = [16, 64], strides = [1, 1]} : vector<768x64xbf16> to vector<16x64xbf16>
    %c6 = arith.constant 6 : index
    %c0_33 = arith.constant 0 : index
    %c0_34 = arith.constant 0 : index
    %51 = vector.load %arg6[%c6, %c0_33, %c0_34] : memref<48x64x128xbf16, #tpu.memory_space<vmem>>, vector<1x64x128xbf16>
    %52 = vector.shape_cast %51 : vector<1x64x128xbf16> to vector<64x128xbf16>
    %cst_35 = arith.constant dense<0.000000e+00> : vector<16x128xf32>
    %53 = tpu.matmul %50, %52, %cst_35 {dimension_numbers = #tpu.dot_dimension_numbers<[1], [0], [0], [1], [0, 0, 1, 1], [], []>} : vector<16x64xbf16>, vector<64x128xbf16>, vector<16x128xf32> -> vector<16x128xf32>
    %54 = arith.addf %49, %53 : vector<16x128xf32>
    %55 = vector.extract_strided_slice %18 {offsets = [112, 0], sizes = [16, 64], strides = [1, 1]} : vector<768x64xbf16> to vector<16x64xbf16>
    %c7 = arith.constant 7 : index
    %c0_36 = arith.constant 0 : index
    %c0_37 = arith.constant 0 : index
    %56 = vector.load %arg6[%c7, %c0_36, %c0_37] : memref<48x64x128xbf16, #tpu.memory_space<vmem>>, vector<1x64x128xbf16>
    %57 = vector.shape_cast %56 : vector<1x64x128xbf16> to vector<64x128xbf16>
    %cst_38 = arith.constant dense<0.000000e+00> : vector<16x128xf32>
    %58 = tpu.matmul %55, %57, %cst_38 {dimension_numbers = #tpu.dot_dimension_numbers<[1], [0], [0], [1], [0, 0, 1, 1], [], []>} : vector<16x64xbf16>, vector<64x128xbf16>, vector<16x128xf32> -> vector<16x128xf32>
    %59 = arith.addf %54, %58 : vector<16x128xf32>
    %60 = vector.extract_strided_slice %18 {offsets = [128, 0], sizes = [16, 64], strides = [1, 1]} : vector<768x64xbf16> to vector<16x64xbf16>
    %c8 = arith.constant 8 : index
    %c0_39 = arith.constant 0 : index
    %c0_40 = arith.constant 0 : index
    %61 = vector.load %arg6[%c8, %c0_39, %c0_40] : memref<48x64x128xbf16, #tpu.memory_space<vmem>>, vector<1x64x128xbf16>
    %62 = vector.shape_cast %61 : vector<1x64x128xbf16> to vector<64x128xbf16>
    %cst_41 = arith.constant dense<0.000000e+00> : vector<16x128xf32>
    %63 = tpu.matmul %60, %62, %cst_41 {dimension_numbers = #tpu.dot_dimension_numbers<[1], [0], [0], [1], [0, 0, 1, 1], [], []>} : vector<16x64xbf16>, vector<64x128xbf16>, vector<16x128xf32> -> vector<16x128xf32>
    %64 = arith.addf %59, %63 : vector<16x128xf32>
    %65 = vector.extract_strided_slice %18 {offsets = [144, 0], sizes = [16, 64], strides = [1, 1]} : vector<768x64xbf16> to vector<16x64xbf16>
    %c9 = arith.constant 9 : index
    %c0_42 = arith.constant 0 : index
    %c0_43 = arith.constant 0 : index
    %66 = vector.load %arg6[%c9, %c0_42, %c0_43] : memref<48x64x128xbf16, #tpu.memory_space<vmem>>, vector<1x64x128xbf16>
    %67 = vector.shape_cast %66 : vector<1x64x128xbf16> to vector<64x128xbf16>
    %cst_44 = arith.constant dense<0.000000e+00> : vector<16x128xf32>
    %68 = tpu.matmul %65, %67, %cst_44 {dimension_numbers = #tpu.dot_dimension_numbers<[1], [0], [0], [1], [0, 0, 1, 1], [], []>} : vector<16x64xbf16>, vector<64x128xbf16>, vector<16x128xf32> -> vector<16x128xf32>
    %69 = arith.addf %64, %68 : vector<16x128xf32>
    %70 = vector.extract_strided_slice %18 {offsets = [160, 0], sizes = [16, 64], strides = [1, 1]} : vector<768x64xbf16> to vector<16x64xbf16>
    %c10 = arith.constant 10 : index
    %c0_45 = arith.constant 0 : index
    %c0_46 = arith.constant 0 : index
    %71 = vector.load %arg6[%c10, %c0_45, %c0_46] : memref<48x64x128xbf16, #tpu.memory_space<vmem>>, vector<1x64x128xbf16>
    %72 = vector.shape_cast %71 : vector<1x64x128xbf16> to vector<64x128xbf16>
    %cst_47 = arith.constant dense<0.000000e+00> : vector<16x128xf32>
    %73 = tpu.matmul %70, %72, %cst_47 {dimension_numbers = #tpu.dot_dimension_numbers<[1], [0], [0], [1], [0, 0, 1, 1], [], []>} : vector<16x64xbf16>, vector<64x128xbf16>, vector<16x128xf32> -> vector<16x128xf32>
    %74 = arith.addf %69, %73 : vector<16x128xf32>
    %75 = vector.extract_strided_slice %18 {offsets = [176, 0], sizes = [16, 64], strides = [1, 1]} : vector<768x64xbf16> to vector<16x64xbf16>
    %c11 = arith.constant 11 : index
    %c0_48 = arith.constant 0 : index
    %c0_49 = arith.constant 0 : index
    %76 = vector.load %arg6[%c11, %c0_48, %c0_49] : memref<48x64x128xbf16, #tpu.memory_space<vmem>>, vector<1x64x128xbf16>
    %77 = vector.shape_cast %76 : vector<1x64x128xbf16> to vector<64x128xbf16>
    %cst_50 = arith.constant dense<0.000000e+00> : vector<16x128xf32>
    %78 = tpu.matmul %75, %77, %cst_50 {dimension_numbers = #tpu.dot_dimension_numbers<[1], [0], [0], [1], [0, 0, 1, 1], [], []>} : vector<16x64xbf16>, vector<64x128xbf16>, vector<16x128xf32> -> vector<16x128xf32>
    %79 = arith.addf %74, %78 : vector<16x128xf32>
    %80 = vector.extract_strided_slice %18 {offsets = [192, 0], sizes = [16, 64], strides = [1, 1]} : vector<768x64xbf16> to vector<16x64xbf16>
    %c12 = arith.constant 12 : index
    %c0_51 = arith.constant 0 : index
    %c0_52 = arith.constant 0 : index
    %81 = vector.load %arg6[%c12, %c0_51, %c0_52] : memref<48x64x128xbf16, #tpu.memory_space<vmem>>, vector<1x64x128xbf16>
    %82 = vector.shape_cast %81 : vector<1x64x128xbf16> to vector<64x128xbf16>
    %cst_53 = arith.constant dense<0.000000e+00> : vector<16x128xf32>
    %83 = tpu.matmul %80, %82, %cst_53 {dimension_numbers = #tpu.dot_dimension_numbers<[1], [0], [0], [1], [0, 0, 1, 1], [], []>} : vector<16x64xbf16>, vector<64x128xbf16>, vector<16x128xf32> -> vector<16x128xf32>
    %84 = arith.addf %79, %83 : vector<16x128xf32>
    %85 = vector.extract_strided_slice %18 {offsets = [208, 0], sizes = [16, 64], strides = [1, 1]} : vector<768x64xbf16> to vector<16x64xbf16>
    %c13 = arith.constant 13 : index
    %c0_54 = arith.constant 0 : index
    %c0_55 = arith.constant 0 : index
    %86 = vector.load %arg6[%c13, %c0_54, %c0_55] : memref<48x64x128xbf16, #tpu.memory_space<vmem>>, vector<1x64x128xbf16>
    %87 = vector.shape_cast %86 : vector<1x64x128xbf16> to vector<64x128xbf16>
    %cst_56 = arith.constant dense<0.000000e+00> : vector<16x128xf32>
    %88 = tpu.matmul %85, %87, %cst_56 {dimension_numbers = #tpu.dot_dimension_numbers<[1], [0], [0], [1], [0, 0, 1, 1], [], []>} : vector<16x64xbf16>, vector<64x128xbf16>, vector<16x128xf32> -> vector<16x128xf32>
    %89 = arith.addf %84, %88 : vector<16x128xf32>
    %90 = vector.extract_strided_slice %18 {offsets = [224, 0], sizes = [16, 64], strides = [1, 1]} : vector<768x64xbf16> to vector<16x64xbf16>
    %c14 = arith.constant 14 : index
    %c0_57 = arith.constant 0 : index
    %c0_58 = arith.constant 0 : index
    %91 = vector.load %arg6[%c14, %c0_57, %c0_58] : memref<48x64x128xbf16, #tpu.memory_space<vmem>>, vector<1x64x128xbf16>
    %92 = vector.shape_cast %91 : vector<1x64x128xbf16> to vector<64x128xbf16>
    %cst_59 = arith.constant dense<0.000000e+00> : vector<16x128xf32>
    %93 = tpu.matmul %90, %92, %cst_59 {dimension_numbers = #tpu.dot_dimension_numbers<[1], [0], [0], [1], [0, 0, 1, 1], [], []>} : vector<16x64xbf16>, vector<64x128xbf16>, vector<16x128xf32> -> vector<16x128xf32>
    %94 = arith.addf %89, %93 : vector<16x128xf32>
    %95 = vector.extract_strided_slice %18 {offsets = [240, 0], sizes = [16, 64], strides = [1, 1]} : vector<768x64xbf16> to vector<16x64xbf16>
    %c15 = arith.constant 15 : index
    %c0_60 = arith.constant 0 : index
    %c0_61 = arith.constant 0 : index
    %96 = vector.load %arg6[%c15, %c0_60, %c0_61] : memref<48x64x128xbf16, #tpu.memory_space<vmem>>, vector<1x64x128xbf16>
    %97 = vector.shape_cast %96 : vector<1x64x128xbf16> to vector<64x128xbf16>
    %cst_62 = arith.constant dense<0.000000e+00> : vector<16x128xf32>
    %98 = tpu.matmul %95, %97, %cst_62 {dimension_numbers = #tpu.dot_dimension_numbers<[1], [0], [0], [1], [0, 0, 1, 1], [], []>} : vector<16x64xbf16>, vector<64x128xbf16>, vector<16x128xf32> -> vector<16x128xf32>
    %99 = arith.addf %94, %98 : vector<16x128xf32>
    %100 = vector.extract_strided_slice %18 {offsets = [256, 0], sizes = [16, 64], strides = [1, 1]} : vector<768x64xbf16> to vector<16x64xbf16>
    %c16 = arith.constant 16 : index
    %c0_63 = arith.constant 0 : index
    %c0_64 = arith.constant 0 : index
    %101 = vector.load %arg6[%c16, %c0_63, %c0_64] : memref<48x64x128xbf16, #tpu.memory_space<vmem>>, vector<1x64x128xbf16>
    %102 = vector.shape_cast %101 : vector<1x64x128xbf16> to vector<64x128xbf16>
    %cst_65 = arith.constant dense<0.000000e+00> : vector<16x128xf32>
    %103 = tpu.matmul %100, %102, %cst_65 {dimension_numbers = #tpu.dot_dimension_numbers<[1], [0], [0], [1], [0, 0, 1, 1], [], []>} : vector<16x64xbf16>, vector<64x128xbf16>, vector<16x128xf32> -> vector<16x128xf32>
    %104 = arith.addf %99, %103 : vector<16x128xf32>
    %105 = vector.extract_strided_slice %18 {offsets = [272, 0], sizes = [16, 64], strides = [1, 1]} : vector<768x64xbf16> to vector<16x64xbf16>
    %c17 = arith.constant 17 : index
    %c0_66 = arith.constant 0 : index
    %c0_67 = arith.constant 0 : index
    %106 = vector.load %arg6[%c17, %c0_66, %c0_67] : memref<48x64x128xbf16, #tpu.memory_space<vmem>>, vector<1x64x128xbf16>
    %107 = vector.shape_cast %106 : vector<1x64x128xbf16> to vector<64x128xbf16>
    %cst_68 = arith.constant dense<0.000000e+00> : vector<16x128xf32>
    %108 = tpu.matmul %105, %107, %cst_68 {dimension_numbers = #tpu.dot_dimension_numbers<[1], [0], [0], [1], [0, 0, 1, 1], [], []>} : vector<16x64xbf16>, vector<64x128xbf16>, vector<16x128xf32> -> vector<16x128xf32>
    %109 = arith.addf %104, %108 : vector<16x128xf32>
    %110 = vector.extract_strided_slice %18 {offsets = [288, 0], sizes = [16, 64], strides = [1, 1]} : vector<768x64xbf16> to vector<16x64xbf16>
    %c18 = arith.constant 18 : index
    %c0_69 = arith.constant 0 : index
    %c0_70 = arith.constant 0 : index
    %111 = vector.load %arg6[%c18, %c0_69, %c0_70] : memref<48x64x128xbf16, #tpu.memory_space<vmem>>, vector<1x64x128xbf16>
    %112 = vector.shape_cast %111 : vector<1x64x128xbf16> to vector<64x128xbf16>
    %cst_71 = arith.constant dense<0.000000e+00> : vector<16x128xf32>
    %113 = tpu.matmul %110, %112, %cst_71 {dimension_numbers = #tpu.dot_dimension_numbers<[1], [0], [0], [1], [0, 0, 1, 1], [], []>} : vector<16x64xbf16>, vector<64x128xbf16>, vector<16x128xf32> -> vector<16x128xf32>
    %114 = arith.addf %109, %113 : vector<16x128xf32>
    %115 = vector.extract_strided_slice %18 {offsets = [304, 0], sizes = [16, 64], strides = [1, 1]} : vector<768x64xbf16> to vector<16x64xbf16>
    %c19 = arith.constant 19 : index
    %c0_72 = arith.constant 0 : index
    %c0_73 = arith.constant 0 : index
    %116 = vector.load %arg6[%c19, %c0_72, %c0_73] : memref<48x64x128xbf16, #tpu.memory_space<vmem>>, vector<1x64x128xbf16>
    %117 = vector.shape_cast %116 : vector<1x64x128xbf16> to vector<64x128xbf16>
    %cst_74 = arith.constant dense<0.000000e+00> : vector<16x128xf32>
    %118 = tpu.matmul %115, %117, %cst_74 {dimension_numbers = #tpu.dot_dimension_numbers<[1], [0], [0], [1], [0, 0, 1, 1], [], []>} : vector<16x64xbf16>, vector<64x128xbf16>, vector<16x128xf32> -> vector<16x128xf32>
    %119 = arith.addf %114, %118 : vector<16x128xf32>
    %120 = vector.extract_strided_slice %18 {offsets = [320, 0], sizes = [16, 64], strides = [1, 1]} : vector<768x64xbf16> to vector<16x64xbf16>
    %c20 = arith.constant 20 : index
    %c0_75 = arith.constant 0 : index
    %c0_76 = arith.constant 0 : index
    %121 = vector.load %arg6[%c20, %c0_75, %c0_76] : memref<48x64x128xbf16, #tpu.memory_space<vmem>>, vector<1x64x128xbf16>
    %122 = vector.shape_cast %121 : vector<1x64x128xbf16> to vector<64x128xbf16>
    %cst_77 = arith.constant dense<0.000000e+00> : vector<16x128xf32>
    %123 = tpu.matmul %120, %122, %cst_77 {dimension_numbers = #tpu.dot_dimension_numbers<[1], [0], [0], [1], [0, 0, 1, 1], [], []>} : vector<16x64xbf16>, vector<64x128xbf16>, vector<16x128xf32> -> vector<16x128xf32>
    %124 = arith.addf %119, %123 : vector<16x128xf32>
    %125 = vector.extract_strided_slice %18 {offsets = [336, 0], sizes = [16, 64], strides = [1, 1]} : vector<768x64xbf16> to vector<16x64xbf16>
    %c21 = arith.constant 21 : index
    %c0_78 = arith.constant 0 : index
    %c0_79 = arith.constant 0 : index
    %126 = vector.load %arg6[%c21, %c0_78, %c0_79] : memref<48x64x128xbf16, #tpu.memory_space<vmem>>, vector<1x64x128xbf16>
    %127 = vector.shape_cast %126 : vector<1x64x128xbf16> to vector<64x128xbf16>
    %cst_80 = arith.constant dense<0.000000e+00> : vector<16x128xf32>
    %128 = tpu.matmul %125, %127, %cst_80 {dimension_numbers = #tpu.dot_dimension_numbers<[1], [0], [0], [1], [0, 0, 1, 1], [], []>} : vector<16x64xbf16>, vector<64x128xbf16>, vector<16x128xf32> -> vector<16x128xf32>
    %129 = arith.addf %124, %128 : vector<16x128xf32>
    %130 = vector.extract_strided_slice %18 {offsets = [352, 0], sizes = [16, 64], strides = [1, 1]} : vector<768x64xbf16> to vector<16x64xbf16>
    %c22 = arith.constant 22 : index
    %c0_81 = arith.constant 0 : index
    %c0_82 = arith.constant 0 : index
    %131 = vector.load %arg6[%c22, %c0_81, %c0_82] : memref<48x64x128xbf16, #tpu.memory_space<vmem>>, vector<1x64x128xbf16>
    %132 = vector.shape_cast %131 : vector<1x64x128xbf16> to vector<64x128xbf16>
    %cst_83 = arith.constant dense<0.000000e+00> : vector<16x128xf32>
    %133 = tpu.matmul %130, %132, %cst_83 {dimension_numbers = #tpu.dot_dimension_numbers<[1], [0], [0], [1], [0, 0, 1, 1], [], []>} : vector<16x64xbf16>, vector<64x128xbf16>, vector<16x128xf32> -> vector<16x128xf32>
    %134 = arith.addf %129, %133 : vector<16x128xf32>
    %135 = vector.extract_strided_slice %18 {offsets = [368, 0], sizes = [16, 64], strides = [1, 1]} : vector<768x64xbf16> to vector<16x64xbf16>
    %c23 = arith.constant 23 : index
    %c0_84 = arith.constant 0 : index
    %c0_85 = arith.constant 0 : index
    %136 = vector.load %arg6[%c23, %c0_84, %c0_85] : memref<48x64x128xbf16, #tpu.memory_space<vmem>>, vector<1x64x128xbf16>
    %137 = vector.shape_cast %136 : vector<1x64x128xbf16> to vector<64x128xbf16>
    %cst_86 = arith.constant dense<0.000000e+00> : vector<16x128xf32>
    %138 = tpu.matmul %135, %137, %cst_86 {dimension_numbers = #tpu.dot_dimension_numbers<[1], [0], [0], [1], [0, 0, 1, 1], [], []>} : vector<16x64xbf16>, vector<64x128xbf16>, vector<16x128xf32> -> vector<16x128xf32>
    %139 = arith.addf %134, %138 : vector<16x128xf32>
    %140 = vector.extract_strided_slice %18 {offsets = [384, 0], sizes = [16, 64], strides = [1, 1]} : vector<768x64xbf16> to vector<16x64xbf16>
    %c24 = arith.constant 24 : index
    %c0_87 = arith.constant 0 : index
    %c0_88 = arith.constant 0 : index
    %141 = vector.load %arg6[%c24, %c0_87, %c0_88] : memref<48x64x128xbf16, #tpu.memory_space<vmem>>, vector<1x64x128xbf16>
    %142 = vector.shape_cast %141 : vector<1x64x128xbf16> to vector<64x128xbf16>
    %cst_89 = arith.constant dense<0.000000e+00> : vector<16x128xf32>
    %143 = tpu.matmul %140, %142, %cst_89 {dimension_numbers = #tpu.dot_dimension_numbers<[1], [0], [0], [1], [0, 0, 1, 1], [], []>} : vector<16x64xbf16>, vector<64x128xbf16>, vector<16x128xf32> -> vector<16x128xf32>
    %144 = arith.addf %139, %143 : vector<16x128xf32>
    %145 = vector.extract_strided_slice %18 {offsets = [400, 0], sizes = [16, 64], strides = [1, 1]} : vector<768x64xbf16> to vector<16x64xbf16>
    %c25 = arith.constant 25 : index
    %c0_90 = arith.constant 0 : index
    %c0_91 = arith.constant 0 : index
    %146 = vector.load %arg6[%c25, %c0_90, %c0_91] : memref<48x64x128xbf16, #tpu.memory_space<vmem>>, vector<1x64x128xbf16>
    %147 = vector.shape_cast %146 : vector<1x64x128xbf16> to vector<64x128xbf16>
    %cst_92 = arith.constant dense<0.000000e+00> : vector<16x128xf32>
    %148 = tpu.matmul %145, %147, %cst_92 {dimension_numbers = #tpu.dot_dimension_numbers<[1], [0], [0], [1], [0, 0, 1, 1], [], []>} : vector<16x64xbf16>, vector<64x128xbf16>, vector<16x128xf32> -> vector<16x128xf32>
    %149 = arith.addf %144, %148 : vector<16x128xf32>
    %150 = vector.extract_strided_slice %18 {offsets = [416, 0], sizes = [16, 64], strides = [1, 1]} : vector<768x64xbf16> to vector<16x64xbf16>
    %c26 = arith.constant 26 : index
    %c0_93 = arith.constant 0 : index
    %c0_94 = arith.constant 0 : index
    %151 = vector.load %arg6[%c26, %c0_93, %c0_94] : memref<48x64x128xbf16, #tpu.memory_space<vmem>>, vector<1x64x128xbf16>
    %152 = vector.shape_cast %151 : vector<1x64x128xbf16> to vector<64x128xbf16>
    %cst_95 = arith.constant dense<0.000000e+00> : vector<16x128xf32>
    %153 = tpu.matmul %150, %152, %cst_95 {dimension_numbers = #tpu.dot_dimension_numbers<[1], [0], [0], [1], [0, 0, 1, 1], [], []>} : vector<16x64xbf16>, vector<64x128xbf16>, vector<16x128xf32> -> vector<16x128xf32>
    %154 = arith.addf %149, %153 : vector<16x128xf32>
    %155 = vector.extract_strided_slice %18 {offsets = [432, 0], sizes = [16, 64], strides = [1, 1]} : vector<768x64xbf16> to vector<16x64xbf16>
    %c27 = arith.constant 27 : index
    %c0_96 = arith.constant 0 : index
    %c0_97 = arith.constant 0 : index
    %156 = vector.load %arg6[%c27, %c0_96, %c0_97] : memref<48x64x128xbf16, #tpu.memory_space<vmem>>, vector<1x64x128xbf16>
    %157 = vector.shape_cast %156 : vector<1x64x128xbf16> to vector<64x128xbf16>
    %cst_98 = arith.constant dense<0.000000e+00> : vector<16x128xf32>
    %158 = tpu.matmul %155, %157, %cst_98 {dimension_numbers = #tpu.dot_dimension_numbers<[1], [0], [0], [1], [0, 0, 1, 1], [], []>} : vector<16x64xbf16>, vector<64x128xbf16>, vector<16x128xf32> -> vector<16x128xf32>
    %159 = arith.addf %154, %158 : vector<16x128xf32>
    %160 = vector.extract_strided_slice %18 {offsets = [448, 0], sizes = [16, 64], strides = [1, 1]} : vector<768x64xbf16> to vector<16x64xbf16>
    %c28 = arith.constant 28 : index
    %c0_99 = arith.constant 0 : index
    %c0_100 = arith.constant 0 : index
    %161 = vector.load %arg6[%c28, %c0_99, %c0_100] : memref<48x64x128xbf16, #tpu.memory_space<vmem>>, vector<1x64x128xbf16>
    %162 = vector.shape_cast %161 : vector<1x64x128xbf16> to vector<64x128xbf16>
    %cst_101 = arith.constant dense<0.000000e+00> : vector<16x128xf32>
    %163 = tpu.matmul %160, %162, %cst_101 {dimension_numbers = #tpu.dot_dimension_numbers<[1], [0], [0], [1], [0, 0, 1, 1], [], []>} : vector<16x64xbf16>, vector<64x128xbf16>, vector<16x128xf32> -> vector<16x128xf32>
    %164 = arith.addf %159, %163 : vector<16x128xf32>
    %165 = vector.extract_strided_slice %18 {offsets = [464, 0], sizes = [16, 64], strides = [1, 1]} : vector<768x64xbf16> to vector<16x64xbf16>
    %c29 = arith.constant 29 : index
    %c0_102 = arith.constant 0 : index
    %c0_103 = arith.constant 0 : index
    %166 = vector.load %arg6[%c29, %c0_102, %c0_103] : memref<48x64x128xbf16, #tpu.memory_space<vmem>>, vector<1x64x128xbf16>
    %167 = vector.shape_cast %166 : vector<1x64x128xbf16> to vector<64x128xbf16>
    %cst_104 = arith.constant dense<0.000000e+00> : vector<16x128xf32>
    %168 = tpu.matmul %165, %167, %cst_104 {dimension_numbers = #tpu.dot_dimension_numbers<[1], [0], [0], [1], [0, 0, 1, 1], [], []>} : vector<16x64xbf16>, vector<64x128xbf16>, vector<16x128xf32> -> vector<16x128xf32>
    %169 = arith.addf %164, %168 : vector<16x128xf32>
    %170 = vector.extract_strided_slice %18 {offsets = [480, 0], sizes = [16, 64], strides = [1, 1]} : vector<768x64xbf16> to vector<16x64xbf16>
    %c30 = arith.constant 30 : index
    %c0_105 = arith.constant 0 : index
    %c0_106 = arith.constant 0 : index
    %171 = vector.load %arg6[%c30, %c0_105, %c0_106] : memref<48x64x128xbf16, #tpu.memory_space<vmem>>, vector<1x64x128xbf16>
    %172 = vector.shape_cast %171 : vector<1x64x128xbf16> to vector<64x128xbf16>
    %cst_107 = arith.constant dense<0.000000e+00> : vector<16x128xf32>
    %173 = tpu.matmul %170, %172, %cst_107 {dimension_numbers = #tpu.dot_dimension_numbers<[1], [0], [0], [1], [0, 0, 1, 1], [], []>} : vector<16x64xbf16>, vector<64x128xbf16>, vector<16x128xf32> -> vector<16x128xf32>
    %174 = arith.addf %169, %173 : vector<16x128xf32>
    %175 = vector.extract_strided_slice %18 {offsets = [496, 0], sizes = [16, 64], strides = [1, 1]} : vector<768x64xbf16> to vector<16x64xbf16>
    %c31 = arith.constant 31 : index
    %c0_108 = arith.constant 0 : index
    %c0_109 = arith.constant 0 : index
    %176 = vector.load %arg6[%c31, %c0_108, %c0_109] : memref<48x64x128xbf16, #tpu.memory_space<vmem>>, vector<1x64x128xbf16>
    %177 = vector.shape_cast %176 : vector<1x64x128xbf16> to vector<64x128xbf16>
    %cst_110 = arith.constant dense<0.000000e+00> : vector<16x128xf32>
    %178 = tpu.matmul %175, %177, %cst_110 {dimension_numbers = #tpu.dot_dimension_numbers<[1], [0], [0], [1], [0, 0, 1, 1], [], []>} : vector<16x64xbf16>, vector<64x128xbf16>, vector<16x128xf32> -> vector<16x128xf32>
    %179 = arith.addf %174, %178 : vector<16x128xf32>
    %180 = vector.extract_strided_slice %18 {offsets = [512, 0], sizes = [16, 64], strides = [1, 1]} : vector<768x64xbf16> to vector<16x64xbf16>
    %c32 = arith.constant 32 : index
    %c0_111 = arith.constant 0 : index
    %c0_112 = arith.constant 0 : index
    %181 = vector.load %arg6[%c32, %c0_111, %c0_112] : memref<48x64x128xbf16, #tpu.memory_space<vmem>>, vector<1x64x128xbf16>
    %182 = vector.shape_cast %181 : vector<1x64x128xbf16> to vector<64x128xbf16>
    %cst_113 = arith.constant dense<0.000000e+00> : vector<16x128xf32>
    %183 = tpu.matmul %180, %182, %cst_113 {dimension_numbers = #tpu.dot_dimension_numbers<[1], [0], [0], [1], [0, 0, 1, 1], [], []>} : vector<16x64xbf16>, vector<64x128xbf16>, vector<16x128xf32> -> vector<16x128xf32>
    %184 = arith.addf %179, %183 : vector<16x128xf32>
    %185 = vector.extract_strided_slice %18 {offsets = [528, 0], sizes = [16, 64], strides = [1, 1]} : vector<768x64xbf16> to vector<16x64xbf16>
    %c33 = arith.constant 33 : index
    %c0_114 = arith.constant 0 : index
    %c0_115 = arith.constant 0 : index
    %186 = vector.load %arg6[%c33, %c0_114, %c0_115] : memref<48x64x128xbf16, #tpu.memory_space<vmem>>, vector<1x64x128xbf16>
    %187 = vector.shape_cast %186 : vector<1x64x128xbf16> to vector<64x128xbf16>
    %cst_116 = arith.constant dense<0.000000e+00> : vector<16x128xf32>
    %188 = tpu.matmul %185, %187, %cst_116 {dimension_numbers = #tpu.dot_dimension_numbers<[1], [0], [0], [1], [0, 0, 1, 1], [], []>} : vector<16x64xbf16>, vector<64x128xbf16>, vector<16x128xf32> -> vector<16x128xf32>
    %189 = arith.addf %184, %188 : vector<16x128xf32>
    %190 = vector.extract_strided_slice %18 {offsets = [544, 0], sizes = [16, 64], strides = [1, 1]} : vector<768x64xbf16> to vector<16x64xbf16>
    %c34 = arith.constant 34 : index
    %c0_117 = arith.constant 0 : index
    %c0_118 = arith.constant 0 : index
    %191 = vector.load %arg6[%c34, %c0_117, %c0_118] : memref<48x64x128xbf16, #tpu.memory_space<vmem>>, vector<1x64x128xbf16>
    %192 = vector.shape_cast %191 : vector<1x64x128xbf16> to vector<64x128xbf16>
    %cst_119 = arith.constant dense<0.000000e+00> : vector<16x128xf32>
    %193 = tpu.matmul %190, %192, %cst_119 {dimension_numbers = #tpu.dot_dimension_numbers<[1], [0], [0], [1], [0, 0, 1, 1], [], []>} : vector<16x64xbf16>, vector<64x128xbf16>, vector<16x128xf32> -> vector<16x128xf32>
    %194 = arith.addf %189, %193 : vector<16x128xf32>
    %195 = vector.extract_strided_slice %18 {offsets = [560, 0], sizes = [16, 64], strides = [1, 1]} : vector<768x64xbf16> to vector<16x64xbf16>
    %c35 = arith.constant 35 : index
    %c0_120 = arith.constant 0 : index
    %c0_121 = arith.constant 0 : index
    %196 = vector.load %arg6[%c35, %c0_120, %c0_121] : memref<48x64x128xbf16, #tpu.memory_space<vmem>>, vector<1x64x128xbf16>
    %197 = vector.shape_cast %196 : vector<1x64x128xbf16> to vector<64x128xbf16>
    %cst_122 = arith.constant dense<0.000000e+00> : vector<16x128xf32>
    %198 = tpu.matmul %195, %197, %cst_122 {dimension_numbers = #tpu.dot_dimension_numbers<[1], [0], [0], [1], [0, 0, 1, 1], [], []>} : vector<16x64xbf16>, vector<64x128xbf16>, vector<16x128xf32> -> vector<16x128xf32>
    %199 = arith.addf %194, %198 : vector<16x128xf32>
    %200 = vector.extract_strided_slice %18 {offsets = [576, 0], sizes = [16, 64], strides = [1, 1]} : vector<768x64xbf16> to vector<16x64xbf16>
    %c36 = arith.constant 36 : index
    %c0_123 = arith.constant 0 : index
    %c0_124 = arith.constant 0 : index
    %201 = vector.load %arg6[%c36, %c0_123, %c0_124] : memref<48x64x128xbf16, #tpu.memory_space<vmem>>, vector<1x64x128xbf16>
    %202 = vector.shape_cast %201 : vector<1x64x128xbf16> to vector<64x128xbf16>
    %cst_125 = arith.constant dense<0.000000e+00> : vector<16x128xf32>
    %203 = tpu.matmul %200, %202, %cst_125 {dimension_numbers = #tpu.dot_dimension_numbers<[1], [0], [0], [1], [0, 0, 1, 1], [], []>} : vector<16x64xbf16>, vector<64x128xbf16>, vector<16x128xf32> -> vector<16x128xf32>
    %204 = arith.addf %199, %203 : vector<16x128xf32>
    %205 = vector.extract_strided_slice %18 {offsets = [592, 0], sizes = [16, 64], strides = [1, 1]} : vector<768x64xbf16> to vector<16x64xbf16>
    %c37 = arith.constant 37 : index
    %c0_126 = arith.constant 0 : index
    %c0_127 = arith.constant 0 : index
    %206 = vector.load %arg6[%c37, %c0_126, %c0_127] : memref<48x64x128xbf16, #tpu.memory_space<vmem>>, vector<1x64x128xbf16>
    %207 = vector.shape_cast %206 : vector<1x64x128xbf16> to vector<64x128xbf16>
    %cst_128 = arith.constant dense<0.000000e+00> : vector<16x128xf32>
    %208 = tpu.matmul %205, %207, %cst_128 {dimension_numbers = #tpu.dot_dimension_numbers<[1], [0], [0], [1], [0, 0, 1, 1], [], []>} : vector<16x64xbf16>, vector<64x128xbf16>, vector<16x128xf32> -> vector<16x128xf32>
    %209 = arith.addf %204, %208 : vector<16x128xf32>
    %210 = vector.extract_strided_slice %18 {offsets = [608, 0], sizes = [16, 64], strides = [1, 1]} : vector<768x64xbf16> to vector<16x64xbf16>
    %c38 = arith.constant 38 : index
    %c0_129 = arith.constant 0 : index
    %c0_130 = arith.constant 0 : index
    %211 = vector.load %arg6[%c38, %c0_129, %c0_130] : memref<48x64x128xbf16, #tpu.memory_space<vmem>>, vector<1x64x128xbf16>
    %212 = vector.shape_cast %211 : vector<1x64x128xbf16> to vector<64x128xbf16>
    %cst_131 = arith.constant dense<0.000000e+00> : vector<16x128xf32>
    %213 = tpu.matmul %210, %212, %cst_131 {dimension_numbers = #tpu.dot_dimension_numbers<[1], [0], [0], [1], [0, 0, 1, 1], [], []>} : vector<16x64xbf16>, vector<64x128xbf16>, vector<16x128xf32> -> vector<16x128xf32>
    %214 = arith.addf %209, %213 : vector<16x128xf32>
    %215 = vector.extract_strided_slice %18 {offsets = [624, 0], sizes = [16, 64], strides = [1, 1]} : vector<768x64xbf16> to vector<16x64xbf16>
    %c39 = arith.constant 39 : index
    %c0_132 = arith.constant 0 : index
    %c0_133 = arith.constant 0 : index
    %216 = vector.load %arg6[%c39, %c0_132, %c0_133] : memref<48x64x128xbf16, #tpu.memory_space<vmem>>, vector<1x64x128xbf16>
    %217 = vector.shape_cast %216 : vector<1x64x128xbf16> to vector<64x128xbf16>
    %cst_134 = arith.constant dense<0.000000e+00> : vector<16x128xf32>
    %218 = tpu.matmul %215, %217, %cst_134 {dimension_numbers = #tpu.dot_dimension_numbers<[1], [0], [0], [1], [0, 0, 1, 1], [], []>} : vector<16x64xbf16>, vector<64x128xbf16>, vector<16x128xf32> -> vector<16x128xf32>
    %219 = arith.addf %214, %218 : vector<16x128xf32>
    %220 = vector.extract_strided_slice %18 {offsets = [640, 0], sizes = [16, 64], strides = [1, 1]} : vector<768x64xbf16> to vector<16x64xbf16>
    %c40 = arith.constant 40 : index
    %c0_135 = arith.constant 0 : index
    %c0_136 = arith.constant 0 : index
    %221 = vector.load %arg6[%c40, %c0_135, %c0_136] : memref<48x64x128xbf16, #tpu.memory_space<vmem>>, vector<1x64x128xbf16>
    %222 = vector.shape_cast %221 : vector<1x64x128xbf16> to vector<64x128xbf16>
    %cst_137 = arith.constant dense<0.000000e+00> : vector<16x128xf32>
    %223 = tpu.matmul %220, %222, %cst_137 {dimension_numbers = #tpu.dot_dimension_numbers<[1], [0], [0], [1], [0, 0, 1, 1], [], []>} : vector<16x64xbf16>, vector<64x128xbf16>, vector<16x128xf32> -> vector<16x128xf32>
    %224 = arith.addf %219, %223 : vector<16x128xf32>
    %225 = vector.extract_strided_slice %18 {offsets = [656, 0], sizes = [16, 64], strides = [1, 1]} : vector<768x64xbf16> to vector<16x64xbf16>
    %c41 = arith.constant 41 : index
    %c0_138 = arith.constant 0 : index
    %c0_139 = arith.constant 0 : index
    %226 = vector.load %arg6[%c41, %c0_138, %c0_139] : memref<48x64x128xbf16, #tpu.memory_space<vmem>>, vector<1x64x128xbf16>
    %227 = vector.shape_cast %226 : vector<1x64x128xbf16> to vector<64x128xbf16>
    %cst_140 = arith.constant dense<0.000000e+00> : vector<16x128xf32>
    %228 = tpu.matmul %225, %227, %cst_140 {dimension_numbers = #tpu.dot_dimension_numbers<[1], [0], [0], [1], [0, 0, 1, 1], [], []>} : vector<16x64xbf16>, vector<64x128xbf16>, vector<16x128xf32> -> vector<16x128xf32>
    %229 = arith.addf %224, %228 : vector<16x128xf32>
    %230 = vector.extract_strided_slice %18 {offsets = [672, 0], sizes = [16, 64], strides = [1, 1]} : vector<768x64xbf16> to vector<16x64xbf16>
    %c42 = arith.constant 42 : index
    %c0_141 = arith.constant 0 : index
    %c0_142 = arith.constant 0 : index
    %231 = vector.load %arg6[%c42, %c0_141, %c0_142] : memref<48x64x128xbf16, #tpu.memory_space<vmem>>, vector<1x64x128xbf16>
    %232 = vector.shape_cast %231 : vector<1x64x128xbf16> to vector<64x128xbf16>
    %cst_143 = arith.constant dense<0.000000e+00> : vector<16x128xf32>
    %233 = tpu.matmul %230, %232, %cst_143 {dimension_numbers = #tpu.dot_dimension_numbers<[1], [0], [0], [1], [0, 0, 1, 1], [], []>} : vector<16x64xbf16>, vector<64x128xbf16>, vector<16x128xf32> -> vector<16x128xf32>
    %234 = arith.addf %229, %233 : vector<16x128xf32>
    %235 = vector.extract_strided_slice %18 {offsets = [688, 0], sizes = [16, 64], strides = [1, 1]} : vector<768x64xbf16> to vector<16x64xbf16>
    %c43 = arith.constant 43 : index
    %c0_144 = arith.constant 0 : index
    %c0_145 = arith.constant 0 : index
    %236 = vector.load %arg6[%c43, %c0_144, %c0_145] : memref<48x64x128xbf16, #tpu.memory_space<vmem>>, vector<1x64x128xbf16>
    %237 = vector.shape_cast %236 : vector<1x64x128xbf16> to vector<64x128xbf16>
    %cst_146 = arith.constant dense<0.000000e+00> : vector<16x128xf32>
    %238 = tpu.matmul %235, %237, %cst_146 {dimension_numbers = #tpu.dot_dimension_numbers<[1], [0], [0], [1], [0, 0, 1, 1], [], []>} : vector<16x64xbf16>, vector<64x128xbf16>, vector<16x128xf32> -> vector<16x128xf32>
    %239 = arith.addf %234, %238 : vector<16x128xf32>
    %240 = vector.extract_strided_slice %18 {offsets = [704, 0], sizes = [16, 64], strides = [1, 1]} : vector<768x64xbf16> to vector<16x64xbf16>
    %c44 = arith.constant 44 : index
    %c0_147 = arith.constant 0 : index
    %c0_148 = arith.constant 0 : index
    %241 = vector.load %arg6[%c44, %c0_147, %c0_148] : memref<48x64x128xbf16, #tpu.memory_space<vmem>>, vector<1x64x128xbf16>
    %242 = vector.shape_cast %241 : vector<1x64x128xbf16> to vector<64x128xbf16>
    %cst_149 = arith.constant dense<0.000000e+00> : vector<16x128xf32>
    %243 = tpu.matmul %240, %242, %cst_149 {dimension_numbers = #tpu.dot_dimension_numbers<[1], [0], [0], [1], [0, 0, 1, 1], [], []>} : vector<16x64xbf16>, vector<64x128xbf16>, vector<16x128xf32> -> vector<16x128xf32>
    %244 = arith.addf %239, %243 : vector<16x128xf32>
    %245 = vector.extract_strided_slice %18 {offsets = [720, 0], sizes = [16, 64], strides = [1, 1]} : vector<768x64xbf16> to vector<16x64xbf16>
    %c45 = arith.constant 45 : index
    %c0_150 = arith.constant 0 : index
    %c0_151 = arith.constant 0 : index
    %246 = vector.load %arg6[%c45, %c0_150, %c0_151] : memref<48x64x128xbf16, #tpu.memory_space<vmem>>, vector<1x64x128xbf16>
    %247 = vector.shape_cast %246 : vector<1x64x128xbf16> to vector<64x128xbf16>
    %cst_152 = arith.constant dense<0.000000e+00> : vector<16x128xf32>
    %248 = tpu.matmul %245, %247, %cst_152 {dimension_numbers = #tpu.dot_dimension_numbers<[1], [0], [0], [1], [0, 0, 1, 1], [], []>} : vector<16x64xbf16>, vector<64x128xbf16>, vector<16x128xf32> -> vector<16x128xf32>
    %249 = arith.addf %244, %248 : vector<16x128xf32>
    %250 = vector.extract_strided_slice %18 {offsets = [736, 0], sizes = [16, 64], strides = [1, 1]} : vector<768x64xbf16> to vector<16x64xbf16>
    %c46 = arith.constant 46 : index
    %c0_153 = arith.constant 0 : index
    %c0_154 = arith.constant 0 : index
    %251 = vector.load %arg6[%c46, %c0_153, %c0_154] : memref<48x64x128xbf16, #tpu.memory_space<vmem>>, vector<1x64x128xbf16>
    %252 = vector.shape_cast %251 : vector<1x64x128xbf16> to vector<64x128xbf16>
    %cst_155 = arith.constant dense<0.000000e+00> : vector<16x128xf32>
    %253 = tpu.matmul %250, %252, %cst_155 {dimension_numbers = #tpu.dot_dimension_numbers<[1], [0], [0], [1], [0, 0, 1, 1], [], []>} : vector<16x64xbf16>, vector<64x128xbf16>, vector<16x128xf32> -> vector<16x128xf32>
    %254 = arith.addf %249, %253 : vector<16x128xf32>
    %255 = vector.extract_strided_slice %18 {offsets = [752, 0], sizes = [16, 64], strides = [1, 1]} : vector<768x64xbf16> to vector<16x64xbf16>
    %c47 = arith.constant 47 : index
    %c0_156 = arith.constant 0 : index
    %c0_157 = arith.constant 0 : index
    %256 = vector.load %arg6[%c47, %c0_156, %c0_157] : memref<48x64x128xbf16, #tpu.memory_space<vmem>>, vector<1x64x128xbf16>
    %257 = vector.shape_cast %256 : vector<1x64x128xbf16> to vector<64x128xbf16>
    %cst_158 = arith.constant dense<0.000000e+00> : vector<16x128xf32>
    %258 = tpu.matmul %255, %257, %cst_158 {dimension_numbers = #tpu.dot_dimension_numbers<[1], [0], [0], [1], [0, 0, 1, 1], [], []>} : vector<16x64xbf16>, vector<64x128xbf16>, vector<16x128xf32> -> vector<16x128xf32>
    %259 = arith.addf %254, %258 : vector<16x128xf32>
    %c0_159 = arith.constant 0 : index
    %c0_160 = arith.constant 0 : index
    %260 = vector.load %arg7[%c0_159, %c0_160] : memref<1x128xf32, #tpu.memory_space<vmem>>, vector<1x128xf32>
    %261 = vector.broadcast %260 : vector<1x128xf32> to vector<16x128xf32>
    %262 = arith.addf %259, %261 : vector<16x128xf32>
    %cst_161 = arith.constant 0.000000e+00 : f32
    %263 = vector.broadcast %cst_161 : f32 to vector<16x128xf32>
    %264 = arith.maximumf %262, %263 : vector<16x128xf32>
    %265 = arith.truncf %264 : vector<16x128xf32> to vector<16x128xbf16>
    %c0_162 = arith.constant 0 : index
    %c0_163 = arith.constant 0 : index
    %266 = vector.load %arg8[%c0_162, %c0_163] : memref<128x128xbf16, #tpu.memory_space<vmem>>, vector<128x128xbf16>
    %cst_164 = arith.constant dense<0.000000e+00> : vector<16x128xf32>
    %267 = tpu.matmul %265, %266, %cst_164 {dimension_numbers = #tpu.dot_dimension_numbers<[1], [0], [0], [1], [0, 0, 1, 1], [], []>} : vector<16x128xbf16>, vector<128x128xbf16>, vector<16x128xf32> -> vector<16x128xf32>
    %c0_165 = arith.constant 0 : index
    %c0_166 = arith.constant 0 : index
    %268 = vector.load %arg9[%c0_165, %c0_166] : memref<1x128xf32, #tpu.memory_space<vmem>>, vector<1x128xf32>
    %269 = vector.broadcast %268 : vector<1x128xf32> to vector<16x128xf32>
    %270 = arith.addf %267, %269 : vector<16x128xf32>
    %cst_167 = arith.constant dense<0xFF800000> : vector<16xf32>
    %271 = vector.multi_reduction <maximumf>, %270, %cst_167 [1] : vector<16x128xf32> to vector<16xf32>
    %272 = vector.shape_cast %271 : vector<16xf32> to vector<16x1xf32>
    %273 = vector.broadcast %272 : vector<16x1xf32> to vector<16x128xf32>
    %274 = arith.subf %270, %273 : vector<16x128xf32>
    %275 = math.exp %274 : vector<16x128xf32>
    %cst_168 = arith.constant dense<0.000000e+00> : vector<16xf32>
    %276 = vector.multi_reduction <add>, %275, %cst_168 [1] : vector<16x128xf32> to vector<16xf32>
    %277 = vector.shape_cast %276 : vector<16xf32> to vector<16x1xf32>
    %278 = tpu.reciprocal %277 {approx = true} : vector<16x1xf32> -> vector<16x1xf32>
    %279 = vector.broadcast %278 : vector<16x1xf32> to vector<16x128xf32>
    %280 = arith.mulf %275, %279 : vector<16x128xf32>
    %c0_169 = arith.constant 0 : index
    %c0_170 = arith.constant 0 : index
    %281 = vector.load %arg10[%c0_169, %c0_170] : memref<16x128xf32, #tpu.memory_space<vmem>>, vector<16x128xf32>
    tpu.vector_store %arg10[%c0_169, %c0_170], %280 {strides = array<i32>} : memref<16x128xf32, #tpu.memory_space<vmem>>, vector<16x128xf32>,
    return
  }
  func.func @transform_0(%arg0: i32) -> (i32, i32, i32) {
    %c0_i32 = arith.constant 0 : i32
    %c0_i32_0 = arith.constant 0 : i32
    %c0_i32_1 = arith.constant 0 : i32
    return %arg0, %c0_i32, %c0_i32_0 : i32, i32, i32
  }
  func.func @transform_1(%arg0: i32) -> (i32, i32) {
    %c0_i32 = arith.constant 0 : i32
    %c0_i32_0 = arith.constant 0 : i32
    %c0_i32_1 = arith.constant 0 : i32
    return %c0_i32, %c0_i32_0 : i32, i32
  }
  func.func @transform_2(%arg0: i32) -> (i32, i32) {
    %c0_i32 = arith.constant 0 : i32
    %c0_i32_0 = arith.constant 0 : i32
    %c0_i32_1 = arith.constant 0 : i32
    return %c0_i32, %c0_i32_0 : i32, i32
  }
  func.func @transform_3(%arg0: i32) -> (i32, i32) {
    %c0_i32 = arith.constant 0 : i32
    %c0_i32_0 = arith.constant 0 : i32
    %c0_i32_1 = arith.constant 0 : i32
    return %c0_i32, %c0_i32_0 : i32, i32
  }
  func.func @transform_4(%arg0: i32) -> (i32, i32) {
    %c0_i32 = arith.constant 0 : i32
    %c0_i32_0 = arith.constant 0 : i32
    %c0_i32_1 = arith.constant 0 : i32
    return %c0_i32, %c0_i32_0 : i32, i32
  }
  func.func @transform_5(%arg0: i32) -> (i32, i32, i32) {
    %c0_i32 = arith.constant 0 : i32
    %c0_i32_0 = arith.constant 0 : i32
    %c0_i32_1 = arith.constant 0 : i32
    %c0_i32_2 = arith.constant 0 : i32
    return %c0_i32, %c0_i32_0, %c0_i32_1 : i32, i32, i32
  }
  func.func @transform_6(%arg0: i32) -> (i32, i32) {
    %c0_i32 = arith.constant 0 : i32
    %c0_i32_0 = arith.constant 0 : i32
    %c0_i32_1 = arith.constant 0 : i32
    return %c0_i32, %c0_i32_0 : i32, i32
  }
  func.func @transform_7(%arg0: i32) -> (i32, i32) {
    %c0_i32 = arith.constant 0 : i32
    %c0_i32_0 = arith.constant 0 : i32
    %c0_i32_1 = arith.constant 0 : i32
    return %c0_i32, %c0_i32_0 : i32, i32
  }
  func.func @transform_8(%arg0: i32) -> (i32, i32) {
    %c0_i32 = arith.constant 0 : i32
    %c0_i32_0 = arith.constant 0 : i32
    %c0_i32_1 = arith.constant 0 : i32
    return %c0_i32, %c0_i32_0 : i32, i32
  }
  func.func @transform_9(%arg0: i32) -> (i32, i32) {
    %c0_i32 = arith.constant 0 : i32
    %c0_i32_0 = arith.constant 0 : i32
    return %arg0, %c0_i32 : i32, i32
  }
}

</mosaic_0001>

<bundles_post_ra>
// kernel: healpix_net_forward.1
= control target key start
LH: loop header
LB: loop body
LE: loop exit
PB: predicated region body
PF: predicated region fallthrough
CT: control target
= control target key end

     0   :  { %vm189_vm0 = vcmask 130048   ;;  %vm1282_vm1 = vcmask 523264   ;;  %s7121_s1 = inlined_call_operand.vmem [shape: bf16[16,128], index: 1, kind: input, shape index: {}]   ;;  %s7122_s0 = inlined_call_operand.vmem [shape: f32[1,768,16], index: 0, kind: input, shape index: {}]   ;;  %s7123_s2 = inlined_call_operand.vmem [shape: f32[1,128], index: 2, kind: input, shape index: {}]   ;;  %s7124_s3 = inlined_call_operand.vmem [shape: bf16[128,64], index: 3, kind: input, shape index: {}]   ;;  %s7125_s4 = inlined_call_operand.vmem [shape: f32[1,64], index: 4, kind: input, shape index: {}]   ;;  %s7126_s5 = inlined_call_operand.vmem [shape: bf16[48,64,128], index: 5, kind: input, shape index: {}]   ;;  %s7127_s6 = inlined_call_operand.vmem [shape: f32[1,128], index: 6, kind: input, shape index: {}]   ;;  %s7128_s8 = inlined_call_operand.vmem [shape: f32[1,128], index: 8, kind: input, shape index: {}]   ;;  %s7129_s7 = inlined_call_operand.vmem [shape: bf16[128,128], index: 7, kind: input, shape index: {}]   ;;  %s7130_s9 = inlined_call_operand.vmem [shape: f32[16,128], index: 9, kind: output, shape index: {}]  }
   0x1   :  { %v5391_v0 = vld [vmem:[%s7121_s1] sm:$0xff]  ;;  %v34_v2 = vld [vmem:[%s7122_s0 + $0x8] sm:$0xff]  ;;  %v35_v4 = vld [vmem:[%s7122_s0 + $0x10] sm:$0xff] }
   0x2   :  { %v33_v1 = vld [vmem:[%s7122_s0] sm:$0xff]  ;;  %341 = vmatpush.bf16.msra.mxu0 %v5391_v0  ;;  %5600 = vmatpush.bf16.msra.mxu2 %v5391_v0  ;;  %v36_v5 = vld [vmem:[%s7122_s0 + $0x18] sm:$0xff]  ;;  %v38_v8 = vld [vmem:[%s7122_s0 + $0x28] sm:$0xff] }
   0x3   :  { %v129_v3 = vpack.c.bf16 %v34_v2, %v33_v1  ;;  %v130_v6 = vpack.c.bf16 %v36_v5, %v35_v4  ;;  %v37_v7 = vld [vmem:[%s7122_s0 + $0x20] sm:$0xff]  ;;  %v39_v10 = vld [vmem:[%s7122_s0 + $0x30] sm:$0xff]  ;;  %v40_v11 = vld [vmem:[%s7122_s0 + $0x38] sm:$0xff] }
   0x4   :  { %v131_v9 = vpack.c.bf16 %v38_v8, %v37_v7  ;;  %v132_v12 = vpack.c.bf16 %v40_v11, %v39_v10  ;;  %v41_v13 = vld [vmem:[%s7122_s0 + $0x40] sm:$0xff]  ;;  %v42_v14 = vld [vmem:[%s7122_s0 + $0x48] sm:$0xff]  ;;  %v5399_v16 = vld [vmem:[%s7124_s3 + $0x38] sm:$0xff] }
   0x5   :  { %4087 = vmatmul.msk.bf16.vlgmr.msra.gmra.mxu0 %vm189_vm0, %v129_v3  ;;  %v133_v15 = vpack.c.bf16 %v42_v14, %v41_v13  ;;  %795 = vmatpush.bf16.msra.mxu1 %v5399_v16  ;;  %v43_v17 = vld [vmem:[%s7122_s0 + $0x50] sm:$0xff]  ;;  %v44_v18 = vld [vmem:[%s7122_s0 + $0x58] sm:$0xff]  ;;  %v5397_v21 = vld [vmem:[%s7124_s3 + $0x28] sm:$0xff] }
   0x6   :  { %5601 = vmatpush.bf16.msra.mxu3 %v5399_v16  ;;  %v134_v19 = vpack.c.bf16 %v44_v18, %v43_v17  ;;  %v5398_v20 = vld [vmem:[%s7124_s3 + $0x30] sm:$0xff]  ;;  %v5396_v22 = vld [vmem:[%s7124_s3 + $0x20] sm:$0xff]  ;;  %v46_v24 = vld [vmem:[%s7122_s0 + $0x68] sm:$0xff] }
   0x7   :  { %v45_v23 = vld [vmem:[%s7122_s0 + $0x60] sm:$0xff]  ;;  %v5395_v25 = vld [vmem:[%s7124_s3 + $0x18] sm:$0xff]  ;;  %v5394_v27 = vld [vmem:[%s7124_s3 + $0x10] sm:$0xff] }
   0x8   :  { %v135_v26 = vpack.c.bf16 %v46_v24, %v45_v23  ;;  %v5393_v28 = vld [vmem:[%s7124_s3 + $0x8] sm:$0xff]  ;;  %v5392_v29 = vld [vmem:[%s7124_s3] sm:$0xff]  ;;  %v47_v32 = vld [vmem:[%s7122_s0 + $0x70] sm:$0xff] }
   0x9   :  { %796 = vmatpush.bf16.msra.mxu1 %v5398_v20  ;;  %v109_v30 = vld [vmem:[%s7122_s0 + $0x260] sm:$0xff]  ;;  %v110_v31 = vld [vmem:[%s7122_s0 + $0x268] sm:$0xff]  ;;  %v48_v33 = vld [vmem:[%s7122_s0 + $0x78] sm:$0xff] }
   0xa   :  { %5602 = vmatpush.bf16.msra.mxu3 %v5398_v20  ;;  %v167_v34 = vpack.c.bf16 %v110_v31, %v109_v30  ;;  %v136_v35 = vpack.c.bf16 %v48_v33, %v47_v32  ;;  %v111_v36 = vld [vmem:[%s7122_s0 + $0x270] sm:$0xff]  ;;  %v112_v37 = vld [vmem:[%s7122_s0 + $0x278] sm:$0xff]  ;;  %v49_v38 = vld [vmem:[%s7122_s0 + $0x80] sm:$0xff] }
   0xb   :  { %v50_v39 = vld [vmem:[%s7122_s0 + $0x88] sm:$0xff]  ;;  %v168_v40 = vpack.c.bf16 %v112_v37, %v111_v36  ;;  %v5781_v43 = vld [vmem:[%s7123_s2] ss:$0 sm:$0xff]  ;;  %v51_v51 = vld [vmem:[%s7122_s0 + $0x90] sm:$0xff] }
   0xc   :  { %4125 = vmatmul.msk.bf16.vlgmr.msra.gmra.mxu2 %vm189_vm0, %v167_v34  ;;  %v137_v41 = vpack.c.bf16 %v50_v39, %v49_v38  ;;  %v113_v49 = vld [vmem:[%s7122_s0 + $0x280] sm:$0xff]  ;;  %v114_v50 = vld [vmem:[%s7122_s0 + $0x288] sm:$0xff]  ;;  %v52_v52 = vld [vmem:[%s7122_s0 + $0x98] sm:$0xff] }
   0xd   :  { %797 = vmatpush.bf16.msra.mxu1 %v5397_v21  ;;  %v169_v53 = vpack.c.bf16 %v114_v50, %v113_v49  ;;  %v138_v55 = vpack.c.bf16 %v52_v52, %v51_v51  ;;  %v115_v62 = vld [vmem:[%s7122_s0 + $0x290] sm:$0xff]  ;;  %v116_v63 = vld [vmem:[%s7122_s0 + $0x298] sm:$0xff]  ;;  %v53_v0 = vld [vmem:[%s7122_s0 + $0xa0] sm:$0xff] }
   0xe   :  { %5603 = vmatpush.bf16.msra.mxu3 %v5397_v21  ;;  %v54_v1 = vld [vmem:[%s7122_s0 + $0xa8] sm:$0xff]  ;;  %v170_v2 = vpack.c.bf16 %v116_v63, %v115_v62  ;;  %v117_v11 = vld [vmem:[%s7122_s0 + $0x2a0] sm:$0xff]  ;;  %v55_v13 = vld [vmem:[%s7122_s0 + $0xb0] sm:$0xff] }
   0xf   :  { %v139_v4 = vpack.c.bf16 %v54_v1, %v53_v0  ;;  %v56_v14 = vld [vmem:[%s7122_s0 + $0xb8] sm:$0xff]  ;;  %v119_v24 = vld [vmem:[%s7122_s0 + $0x2b0] sm:$0xff]  ;;  %v121_v37 = vld [vmem:[%s7122_s0 + $0x2c0] sm:$0xff] }
  0x10   :  { %v140_v17 = vpack.c.bf16 %v56_v14, %v55_v13  ;;  %v122_v38 = vld [vmem:[%s7122_s0 + $0x2c8] sm:$0xff]  ;;  %v59_v39 = vld [vmem:[%s7122_s0 + $0xd0] sm:$0xff]  ;;  %v124_v52 = vld [vmem:[%s7122_s0 + $0x2d8] sm:$0xff] }
  0x11   :  { %798 = vmatpush.bf16.msra.mxu1 %v5396_v22  ;;  %v123_v51 = vld [vmem:[%s7122_s0 + $0x2d0] sm:$0xff]  ;;  %v64_v1 = vld [vmem:[%s7122_s0 + $0xf8] sm:$0xff]  ;;  %v65_v13 = vld [vmem:[%s7122_s0 + $0x100] sm:$0xff] }
  0x12   :  { %5604 = vmatpush.bf16.msra.mxu3 %v5396_v22  ;;  %v63_v0 = vld [vmem:[%s7122_s0 + $0xf0] sm:$0xff]  ;;  %v66_v14 = vld [vmem:[%s7122_s0 + $0x108] sm:$0xff] }
  0x15   :  { %4088 = vmatmul.msk.bf16.gmra.mxu0 %vm189_vm0, %v130_v6  ;;  %799 = vmatpush.bf16.msra.mxu1 %v5395_v25 }
  0x16   :  { %5605 = vmatpush.bf16.msra.mxu3 %v5395_v25  ;;  %v120_v25 = vld [vmem:[%s7122_s0 + $0x2b8] sm:$0xff] }
  0x19   :  { %800 = vmatpush.bf16.msra.mxu1 %v5394_v27 }
  0x1a   :  { %5606 = vmatpush.bf16.msra.mxu3 %v5394_v27  ;;  %v58_v27 = vld [vmem:[%s7122_s0 + $0xc8] sm:$0xff] }
  0x1c   :  { %4126 = vmatmul.msk.bf16.gmra.mxu2 %vm189_vm0, %v168_v40  ;;  %v60_v40 = vld [vmem:[%s7122_s0 + $0xd8] sm:$0xff] }
  0x1d   :  { %801 = vmatpush.bf16.msra.mxu1 %v5393_v28 }
  0x1e   :  { %5607 = vmatpush.bf16.msra.mxu3 %v5393_v28  ;;  %v172_v28 = vpack.c.bf16 %v120_v25, %v119_v24 }
  0x21   :  { %802 = vmatpush.bf16.msra.mxu1 %v5392_v29 }
  0x22   :  { %5608 = vmatpush.bf16.msra.mxu3 %v5392_v29 }
  0x25   :  { %4089 = vmatmul.msk.bf16.gmra.mxu0 %vm189_vm0, %v131_v9 }
  0x2c   :  { %4127 = vmatmul.msk.bf16.gmra.mxu2 %vm189_vm0, %v169_v53  ;;  %v61_v53 = vld [vmem:[%s7122_s0 + $0xe0] sm:$0xff] }
  0x35   :  { %4090 = vmatmul.msk.bf16.gmra.mxu0 %vm189_vm0, %v132_v12  ;;  %v118_v12 = vld [vmem:[%s7122_s0 + $0x2a8] sm:$0xff] }
  0x3c   :  { %4128 = vmatmul.msk.bf16.gmra.mxu2 %vm189_vm0, %v170_v2  ;;  %v125_v2 = vld [vmem:[%s7122_s0 + $0x2e0] sm:$0xff] }
  0x45   :  { %4091 = vmatmul.msk.bf16.gmra.mxu0 %vm189_vm0, %v133_v15  ;;  %v171_v15 = vpack.c.bf16 %v118_v12, %v117_v11 }
  0x4c   :  { %4129 = vmatmul.msk.bf16.gmra.mxu2 %vm189_vm0, %v171_v15  ;;  %v127_v15 = vld [vmem:[%s7122_s0 + $0x2f0] sm:$0xff] }
  0x55   :  { %4092 = vmatmul.msk.bf16.gmra.mxu0 %vm189_vm0, %v134_v19 }
  0x5c   :  { %4130 = vmatmul.msk.bf16.gmra.mxu2 %vm189_vm0, %v172_v28 }
  0x65   :  { %4093 = vmatmul.msk.bf16.gmra.mxu0 %vm189_vm0, %v135_v26  ;;  %v57_v26 = vld [vmem:[%s7122_s0 + $0xc0] sm:$0xff] }
  0x66   :  { %v141_v30 = vpack.c.bf16 %v58_v27, %v57_v26  ;;  %v5404_v27 = vld [vmem:[%s7126_s5 + $0x20] sm:$0xff] }
  0x75   :  { %4094 = vmatmul.msk.bf16.gmra.mxu0 %vm189_vm0, %v136_v35 }
  0x82   :  { %v343_v42 = vpop.f32.mrf.mxu0 }
  0x83   :  { %v344_v44 = vadd.f32 %v5781_v43, %v343_v42 }
  0x85   :  { %4095 = vmatmul.msk.bf16.gmra.mxu0 %vm189_vm0, %v137_v41  ;;  %v583_v47 = vmax.f32 %v344_v44, 0.0  ;;  %v173_v41 = vpack.c.bf16 %v122_v38, %v121_v37  ;;  %v142_v44 = vpack.c.bf16 %v60_v40, %v59_v39  ;;  %v5410_v39 = vld [vmem:[%s7126_s5 + $0x50] sm:$0xff] }
  0x87   :  { %4131 = vmatmul.msk.bf16.gmra.mxu2 %vm189_vm0, %v173_v41 }
  0x8a   :  { %v345_v45 = vpop.f32.mrf.mxu0 }
  0x8b   :  { %v346_v46 = vadd.f32 %v5781_v43, %v345_v45 }
  0x8d   :  { %v584_v48 = vmax.f32 %v346_v46, 0.0 }
  0x8f   :  { %v679_v54 = vpack.c.bf16 %v584_v48, %v583_v47 }
  0x91   :  { %803 = vmatmul.bf16.vlgmr.msra.gmra.mxu1 %v679_v54  ;;  %v62_v54 = vld [vmem:[%s7122_s0 + $0xe8] sm:$0xff] }
  0x92   :  { %v348_v56 = vpop.f32.mrf.mxu0 }
  0x93   :  { %v349_v57 = vadd.f32 %v5781_v43, %v348_v56 }
  0x95   :  { %4096 = vmatmul.msk.bf16.gmra.mxu0 %vm189_vm0, %v138_v55  ;;  %v585_v60 = vmax.f32 %v349_v57, 0.0  ;;  %v174_v55 = vpack.c.bf16 %v124_v52, %v123_v51  ;;  %v143_v57 = vpack.c.bf16 %v62_v54, %v61_v53  ;;  %v5408_v51 = vld [vmem:[%s7126_s5 + $0x40] sm:$0xff] }
  0x97   :  { %4132 = vmatmul.msk.bf16.gmra.mxu2 %vm189_vm0, %v174_v55 }
  0x9a   :  { %v350_v58 = vpop.f32.mrf.mxu0 }
  0x9b   :  { %v351_v59 = vadd.f32 %v5781_v43, %v350_v58 }
  0x9d   :  { %v586_v61 = vmax.f32 %v351_v59, 0.0 }
  0x9f   :  { %v680_v3 = vpack.c.bf16 %v586_v61, %v585_v60 }
  0xa1   :  { %808 = vmatmul.bf16.gmra.mxu1 %v680_v3  ;;  %v126_v3 = vld [vmem:[%s7122_s0 + $0x2e8] sm:$0xff] }
  0xa2   :  { %v353_v5 = vpop.f32.mrf.mxu0 }
  0xa3   :  { %v354_v6 = vadd.f32 %v5781_v43, %v353_v5  ;;  %v175_v5 = vpack.c.bf16 %v126_v3, %v125_v2 }
  0xa5   :  { %4097 = vmatmul.msk.bf16.gmra.mxu0 %vm189_vm0, %v139_v4  ;;  %v587_v9 = vmax.f32 %v354_v6, 0.0  ;;  %v144_v6 = vpack.c.bf16 %v64_v1, %v63_v0 }
  0xa7   :  { %4133 = vmatmul.msk.bf16.gmra.mxu2 %vm189_vm0, %v175_v5 }
  0xaa   :  { %v355_v7 = vpop.f32.mrf.mxu0 }
  0xab   :  { %v356_v8 = vadd.f32 %v5781_v43, %v355_v7 }
  0xad   :  { %v588_v10 = vmax.f32 %v356_v8, 0.0 }
  0xaf   :  { %v681_v16 = vpack.c.bf16 %v588_v10, %v587_v9 }
  0xb1   :  { %813 = vmatmul.bf16.gmra.mxu1 %v681_v16  ;;  %v128_v16 = vld [vmem:[%s7122_s0 + $0x2f8] sm:$0xff] }
  0xb2   :  { %v358_v18 = vpop.f32.mrf.mxu0 }
  0xb3   :  { %v359_v19 = vadd.f32 %v5781_v43, %v358_v18  ;;  %v176_v18 = vpack.c.bf16 %v128_v16, %v127_v15  ;;  %v72_v15 = vld [vmem:[%s7122_s0 + $0x138] sm:$0xff] }
  0xb5   :  { %4098 = vmatmul.msk.bf16.gmra.mxu0 %vm189_vm0, %v140_v17  ;;  %v589_v22 = vmax.f32 %v359_v19, 0.0  ;;  %v5407_v19 = vld [vmem:[%s7126_s5 + $0x38] sm:$0xff] }
  0xb6   :  { %1290 = vmatpush.bf16.msrb.mxu2 %v5407_v19 }
  0xb7   :  { %4134 = vmatmul.msk.bf16.gmra.mxu2 %vm189_vm0, %v176_v18  ;;  %v5419_v18 = vld [vmem:[%s7126_s5 + $0x98] sm:$0xff] }
  0xba   :  { %v360_v20 = vpop.f32.mrf.mxu0 }
  0xbb   :  { %v361_v21 = vadd.f32 %v5781_v43, %v360_v20  ;;  %v145_v20 = vpack.c.bf16 %v66_v14, %v65_v13  ;;  %v71_v14 = vld [vmem:[%s7122_s0 + $0x130] sm:$0xff] }
  0xbd   :  { %v590_v23 = vmax.f32 %v361_v21, 0.0 }
  0xbf   :  { %v682_v29 = vpack.c.bf16 %v590_v23, %v589_v22  ;;  %v5406_v22 = vld [vmem:[%s7126_s5 + $0x30] sm:$0xff]  ;;  %v5405_v23 = vld [vmem:[%s7126_s5 + $0x28] sm:$0xff] }
  0xc0   :  { %1291 = vmatpush.bf16.msrb.mxu2 %v5406_v22  ;;  %v5418_v22 = vld [vmem:[%s7126_s5 + $0x90] sm:$0xff] }
  0xc1   :  { %818 = vmatmul.bf16.gmra.mxu1 %v682_v29 }
  0xc2   :  { %v363_v31 = vpop.f32.mrf.mxu0 }
  0xc3   :  { %v364_v32 = vadd.f32 %v5781_v43, %v363_v31 }
  0xc4   :  { %1292 = vmatpush.bf16.msrb.mxu2 %v5405_v23 }
  0xc5   :  { %4099 = vmatmul.msk.bf16.gmra.mxu0 %vm189_vm0, %v141_v30  ;;  %v591_v35 = vmax.f32 %v364_v32, 0.0  ;;  %v5929_v30 = vld [vmem:[%s7125_s4] ss:$0 sm:$0xff]  ;;  %v67_v32 = vld [vmem:[%s7122_s0 + $0x110] sm:$0xff] }
  0xc8   :  { %1293 = vmatpush.bf16.msrb.mxu2 %v5404_v27 }
  0xca   :  { %v365_v33 = vpop.f32.mrf.mxu0 }
  0xcb   :  { %v366_v34 = vadd.f32 %v5781_v43, %v365_v33  ;;  %v68_v33 = vld [vmem:[%s7122_s0 + $0x118] sm:$0xff] }
  0xcc   :  { %v146_v37 = vpack.c.bf16 %v68_v33, %v67_v32 }
  0xcd   :  { %v592_v36 = vmax.f32 %v366_v34, 0.0 }
  0xcf   :  { %v683_v42 = vpack.c.bf16 %v592_v36, %v591_v35  ;;  %v5411_v35 = vld [vmem:[%s7126_s5 + $0x58] sm:$0xff] }
  0xd0   :  { %1391 = vmatpush.bf16.msra.mxu2 %v5411_v35 }
  0xd1   :  { %823 = vmatmul.bf16.gmra.mxu1 %v683_v42 }
  0xd2   :  { %v368_v45 = vpop.f32.mrf.mxu0 }
  0xd3   :  { %v369_v46 = vadd.f32 %v5781_v43, %v368_v45 }
  0xd4   :  { %1392 = vmatpush.bf16.msra.mxu2 %v5410_v39 }
  0xd5   :  { %4100 = vmatmul.msk.bf16.gmra.mxu0 %vm189_vm0, %v142_v44  ;;  %v593_v49 = vmax.f32 %v369_v46, 0.0  ;;  %v5409_v44 = vld [vmem:[%s7126_s5 + $0x48] sm:$0xff] }
  0xd8   :  { %1393 = vmatpush.bf16.msra.mxu2 %v5409_v44 }
  0xda   :  { %v370_v47 = vpop.f32.mrf.mxu0 }
  0xdb   :  { %v371_v48 = vadd.f32 %v5781_v43, %v370_v47 }
  0xdc   :  { %1394 = vmatpush.bf16.msra.mxu2 %v5408_v51 }
  0xdd   :  { %v594_v50 = vmax.f32 %v371_v48, 0.0 }
  0xdf   :  { %v684_v56 = vpack.c.bf16 %v594_v50, %v593_v49 }
  0xe1   :  { %828 = vmatmul.bf16.gmra.mxu1 %v684_v56 }
  0xe2   :  { %v373_v58 = vpop.f32.mrf.mxu0 }
  0xe3   :  { %v374_v59 = vadd.f32 %v5781_v43, %v373_v58  ;;  %v70_v58 = vld [vmem:[%s7122_s0 + $0x128] sm:$0xff] }
  0xe5   :  { %4101 = vmatmul.msk.bf16.gmra.mxu0 %vm189_vm0, %v143_v57  ;;  %v595_v62 = vmax.f32 %v374_v59, 0.0  ;;  %v69_v57 = vld [vmem:[%s7122_s0 + $0x120] sm:$0xff] }
  0xea   :  { %v375_v60 = vpop.f32.mrf.mxu0 }
  0xeb   :  { %v376_v61 = vadd.f32 %v5781_v43, %v375_v60 }
  0xed   :  { %v596_v63 = vmax.f32 %v376_v61, 0.0 }
  0xef   :  { %v685_v4 = vpack.c.bf16 %v596_v63, %v595_v62  ;;  %v147_v62 = vpack.c.bf16 %v70_v58, %v69_v57 }
  0xf1   :  { %833 = vmatmul.bf16.gmra.mxu1 %v685_v4 }
  0xf2   :  { %v378_v7 = vpop.f32.mrf.mxu0 }
  0xf3   :  { %v379_v8 = vadd.f32 %v5781_v43, %v378_v7 }
  0xf5   :  { %4102 = vmatmul.msk.bf16.gmra.mxu0 %vm189_vm0, %v144_v6  ;;  %v597_v11 = vmax.f32 %v379_v8, 0.0 }
  0xfa   :  { %v380_v9 = vpop.f32.mrf.mxu0 }
  0xfb   :  { %v381_v10 = vadd.f32 %v5781_v43, %v380_v9 }
  0xfd   :  { %v598_v12 = vmax.f32 %v381_v10, 0.0 }
  0xff   :  { %v686_v17 = vpack.c.bf16 %v598_v12, %v597_v11 }
 0x101   :  { %838 = vmatmul.bf16.gmra.mxu1 %v686_v17 }
 0x102   :  { %v383_v21 = vpop.f32.mrf.mxu0 }
 0x103   :  { %v384_v24 = vadd.f32 %v5781_v43, %v383_v21 }
 0x105   :  { %4103 = vmatmul.msk.bf16.gmra.mxu0 %vm189_vm0, %v145_v20  ;;  %v599_v28 = vmax.f32 %v384_v24, 0.0  ;;  %v148_v20 = vpack.c.bf16 %v72_v15, %v71_v14 }
 0x10a   :  { %v385_v25 = vpop.f32.mrf.mxu0 }
 0x10b   :  { %v386_v26 = vadd.f32 %v5781_v43, %v385_v25 }
 0x10d   :  { %v600_v29 = vmax.f32 %v386_v26, 0.0  ;;  %v5417_v26 = vld [vmem:[%s7126_s5 + $0x88] sm:$0xff] }
 0x10e   :  { %v804_v31 = vpop.f32.mrf.mxu1 }
 0x10f   :  { %v687_v34 = vpack.c.bf16 %v600_v29, %v599_v28  ;;  %v805_v36 = vadd.f32 %v5929_v30, %v804_v31 }
 0x111   :  { %843 = vmatmul.bf16.gmra.mxu1 %v687_v34  ;;  %v1044_v40 = vmax.f32 %v805_v36, 0.0  ;;  %v5416_v34 = vld [vmem:[%s7126_s5 + $0x80] sm:$0xff] }
 0x112   :  { %v388_v38 = vpop.f32.mrf.mxu0 }
 0x113   :  { %v1140_v45 = vpack.c.bf16 %v1044_v40, %v1044_v40  ;;  %v389_v46 = vadd.f32 %v5781_v43, %v388_v38  ;;  %v73_v40 = vld [vmem:[%s7122_s0 + $0x140] sm:$0xff] }
 0x115   :  { %4104 = vmatmul.msk.bf16.gmra.mxu0 %vm189_vm0, %v146_v37  ;;  %v1302_v52 = vunpack.c.l.b16 %v1140_v45  ;;  %v601_v53 = vmax.f32 %v389_v46, 0.0 }
 0x116   :  { %v806_v41 = vpop.f32.mrf.mxu1 }
 0x117   :  { %v807_v42 = vadd.f32 %v5929_v30, %v806_v41  ;;  %v74_v41 = vld [vmem:[%s7122_s0 + $0x148] sm:$0xff] }
 0x118   :  { %v149_v46 = vpack.c.bf16 %v74_v41, %v73_v40 }
 0x119   :  { %v1045_v47 = vmax.f32 %v807_v42, 0.0 }
 0x11a   :  { %v390_v48 = vpop.f32.mrf.mxu0 }
 0x11b   :  { %v1141_v49 = vpack.c.bf16 %v1045_v47, %v1045_v47  ;;  %v391_v50 = vadd.f32 %v5781_v43, %v390_v48 }
 0x11d   :  { %v1303_v54 = vunpack.c.l.b16 %v1141_v49  ;;  %v602_v55 = vmax.f32 %v391_v50, 0.0 }
 0x11e   :  { %v809_v56 = vpop.f32.mrf.mxu1 }
 0x11f   :  { %v5960_v59 = vpack.c.b16 %v1303_v54, %v1302_v52  ;;  %v688_v60 = vpack.c.bf16 %v602_v55, %v601_v53  ;;  %v810_v61 = vadd.f32 %v5929_v30, %v809_v56 }
 0x121   :  { %848 = vmatmul.bf16.gmra.mxu1 %v688_v60  ;;  %v1046_v0 = vmax.f32 %v810_v61, 0.0 }
 0x122   :  { %v393_v63 = vpop.f32.mrf.mxu0 }
 0x123   :  { %v1142_v3 = vpack.c.bf16 %v1046_v0, %v1046_v0  ;;  %v394_v4 = vadd.f32 %v5781_v43, %v393_v63  ;;  %v75_v63 = vld [vmem:[%s7122_s0 + $0x150] sm:$0xff]  ;;  %v76_v0 = vld [vmem:[%s7122_s0 + $0x158] sm:$0xff] }
 0x125   :  { %4105 = vmatmul.msk.bf16.gmra.mxu0 %vm189_vm0, %v147_v62  ;;  %v1255_v9 = vunpack.c.l.b16 %v1142_v3  ;;  %v603_v10 = vmax.f32 %v394_v4, 0.0  ;;  %v5427_v3 = vld [vmem:[%s7126_s5 + $0xd8] sm:$0xff] }
 0x126   :  { %v811_v1 = vpop.f32.mrf.mxu1 }
 0x127   :  { %v812_v2 = vadd.f32 %v5929_v30, %v811_v1 }
 0x129   :  { %v1047_v5 = vmax.f32 %v812_v2, 0.0 }
 0x12a   :  { %v395_v6 = vpop.f32.mrf.mxu0 }
 0x12b   :  { %v1143_v7 = vpack.c.bf16 %v1047_v5, %v1047_v5  ;;  %v396_v8 = vadd.f32 %v5781_v43, %v395_v6  ;;  %v150_v5 = vpack.c.bf16 %v76_v0, %v75_v63  ;;  %v5433_v63 = vld [vmem:[%s7126_s5 + $0x108] sm:$0xff] }
 0x12d   :  { %v1256_v11 = vunpack.c.l.b16 %v1143_v7  ;;  %v604_v12 = vmax.f32 %v396_v8, 0.0  ;;  %v5426_v7 = vld [vmem:[%s7126_s5 + $0xd0] sm:$0xff] }
 0x12e   :  { %v814_v13 = vpop.f32.mrf.mxu1 }
 0x12f   :  { %v1257_v16 = vpack.c.b16 %v1256_v11, %v1255_v9  ;;  %v689_v17 = vpack.c.bf16 %v604_v12, %v603_v10  ;;  %v815_v19 = vadd.f32 %v5929_v30, %v814_v13  ;;  %v6019_v10 = vpop.f32.mrf.mxu2  ;;  %v5425_v12 = vld [vmem:[%s7126_s5 + $0xc8] sm:$0xff] }
 0x131   :  { %853 = vmatmul.bf16.gmra.mxu1 %v689_v17  ;;  %4191 = vmatmul.msk.bf16.vlgmr.msrb.gmra.mxu2 %vm1282_vm1, %v1257_v16  ;;  %v1048_v23 = vmax.f32 %v815_v19, 0.0  ;;  %v5424_v19 = vld [vmem:[%s7126_s5 + $0xc0] sm:$0xff] }
 0x132   :  { %v398_v21 = vpop.f32.mrf.mxu0  ;;  %1505 = vmatpush.bf16.msrb.mxu2 %v5419_v18 }
 0x133   :  { %v1144_v27 = vpack.c.bf16 %v1048_v23, %v1048_v23  ;;  %v399_v28 = vadd.f32 %v5781_v43, %v398_v21 }
 0x135   :  { %4106 = vmatmul.msk.bf16.gmra.mxu0 %vm189_vm0, %v148_v20  ;;  %v1357_v35 = vunpack.c.l.b16 %v1144_v27  ;;  %v605_v36 = vmax.f32 %v399_v28, 0.0 }
 0x136   :  { %v816_v24 = vpop.f32.mrf.mxu1  ;;  %1506 = vmatpush.bf16.msrb.mxu2 %v5418_v22 }
 0x137   :  { %v817_v25 = vadd.f32 %v5929_v30, %v816_v24 }
 0x139   :  { %v1049_v29 = vmax.f32 %v817_v25, 0.0  ;;  %v77_v25 = vld [vmem:[%s7122_s0 + $0x160] sm:$0xff] }
 0x13a   :  { %v400_v31 = vpop.f32.mrf.mxu0  ;;  %1507 = vmatpush.bf16.msrb.mxu2 %v5417_v26  ;;  %v78_v26 = vld [vmem:[%s7122_s0 + $0x168] sm:$0xff] }
 0x13b   :  { %v1145_v32 = vpack.c.bf16 %v1049_v29, %v1049_v29  ;;  %v401_v33 = vadd.f32 %v5781_v43, %v400_v31  ;;  %v6036_v29 = vpop.f32.mrf.mxu2 }
 0x13d   :  { %v1358_v37 = vunpack.c.l.b16 %v1145_v32  ;;  %v606_v38 = vmax.f32 %v401_v33, 0.0  ;;  %v151_v32 = vpack.c.bf16 %v78_v26, %v77_v25 }
 0x13e   :  { %v819_v39 = vpop.f32.mrf.mxu1  ;;  %1508 = vmatpush.bf16.msrb.mxu2 %v5416_v34 }
 0x13f   :  { %v1359_v42 = vpack.c.b16 %v1358_v37, %v1357_v35  ;;  %v690_v44 = vpack.c.bf16 %v606_v38, %v605_v36  ;;  %v820_v45 = vadd.f32 %v5929_v30, %v819_v39 }
 0x141   :  { %858 = vmatmul.bf16.gmra.mxu1 %v690_v44  ;;  %4233 = vmatmul.msk.bf16.vlgmr.msra.gmra.mxu2 %vm1282_vm1, %v1359_v42  ;;  %v1050_v48 = vmax.f32 %v820_v45, 0.0 }
 0x142   :  { %v403_v47 = vpop.f32.mrf.mxu0  ;;  %1619 = vmatpush.bf16.msra.mxu2 %v5427_v3 }
 0x143   :  { %v1146_v51 = vpack.c.bf16 %v1050_v48, %v1050_v48  ;;  %v404_v52 = vadd.f32 %v5781_v43, %v403_v47 }
 0x145   :  { %4107 = vmatmul.msk.bf16.gmra.mxu0 %vm189_vm0, %v149_v46  ;;  %v1414_v57 = vunpack.c.l.b16 %v1146_v51  ;;  %v607_v58 = vmax.f32 %v404_v52, 0.0 }
 0x146   :  { %v821_v49 = vpop.f32.mrf.mxu1  ;;  %1620 = vmatpush.bf16.msra.mxu2 %v5426_v7  ;;  %v5432_v7 = vld [vmem:[%s7126_s5 + $0x100] sm:$0xff] }
 0x147   :  { %v822_v50 = vadd.f32 %v5929_v30, %v821_v49  ;;  %v79_v49 = vld [vmem:[%s7122_s0 + $0x170] sm:$0xff] }
 0x149   :  { %v1051_v53 = vmax.f32 %v822_v50, 0.0  ;;  %v80_v50 = vld [vmem:[%s7122_s0 + $0x178] sm:$0xff] }
 0x14a   :  { %v405_v54 = vpop.f32.mrf.mxu0  ;;  %1621 = vmatpush.bf16.msra.mxu2 %v5425_v12 }
 0x14b   :  { %v1147_v55 = vpack.c.bf16 %v1051_v53, %v1051_v53  ;;  %v406_v56 = vadd.f32 %v5781_v43, %v405_v54  ;;  %v5435_v53 = vld [vmem:[%s7126_s5 + $0x118] sm:$0xff] }
 0x14d   :  { %v1415_v60 = vunpack.c.l.b16 %v1147_v55  ;;  %v608_v61 = vmax.f32 %v406_v56, 0.0  ;;  %v152_v55 = vpack.c.bf16 %v80_v50, %v79_v49 }
 0x14e   :  { %v824_v62 = vpop.f32.mrf.mxu1  ;;  %1622 = vmatpush.bf16.msra.mxu2 %v5424_v19 }
 0x14f   :  { %v6009_v1 = vpack.c.b16 %v1415_v60, %v1414_v57  ;;  %v691_v2 = vpack.c.bf16 %v608_v61, %v607_v58  ;;  %v825_v4 = vadd.f32 %v5929_v30, %v824_v62  ;;  %v5434_v57 = vld [vmem:[%s7126_s5 + $0x110] sm:$0xff]  ;;  %v6060_v61 = vpop.f32.mrf.mxu2 }
 0x151   :  { %863 = vmatmul.bf16.gmra.mxu1 %v691_v2  ;;  %v1052_v8 = vmax.f32 %v825_v4, 0.0 }
 0x152   :  { %v408_v6 = vpop.f32.mrf.mxu0 }
 0x153   :  { %v1148_v13 = vpack.c.bf16 %v1052_v8, %v1052_v8  ;;  %v409_v14 = vadd.f32 %v5781_v43, %v408_v6 }
 0x155   :  { %4108 = vmatmul.msk.bf16.gmra.mxu0 %vm189_vm0, %v150_v5  ;;  %v1471_v20 = vunpack.c.l.b16 %v1148_v13  ;;  %v609_v21 = vmax.f32 %v409_v14, 0.0  ;;  %v81_v14 = vld [vmem:[%s7122_s0 + $0x180] sm:$0xff] }
 0x156   :  { %v826_v9 = vpop.f32.mrf.mxu1 }
 0x157   :  { %v827_v11 = vadd.f32 %v5929_v30, %v826_v9 }
 0x159   :  { %v1053_v15 = vmax.f32 %v827_v11, 0.0 }
 0x15a   :  { %v410_v16 = vpop.f32.mrf.mxu0 }
 0x15b   :  { %v1149_v17 = vpack.c.bf16 %v1053_v15, %v1053_v15  ;;  %v411_v18 = vadd.f32 %v5781_v43, %v410_v16  ;;  %v82_v15 = vld [vmem:[%s7122_s0 + $0x188] sm:$0xff] }
 0x15d   :  { %v1472_v22 = vunpack.c.l.b16 %v1149_v17  ;;  %v610_v23 = vmax.f32 %v411_v18, 0.0  ;;  %v6077_v18 = vpop.f32.mrf.mxu2 }
 0x15e   :  { %v829_v24 = vpop.f32.mrf.mxu1 }
 0x15f   :  { %v1473_v27 = vpack.c.b16 %v1472_v22, %v1471_v20  ;;  %v692_v28 = vpack.c.bf16 %v610_v23, %v609_v21  ;;  %v830_v31 = vadd.f32 %v5929_v30, %v829_v24  ;;  %v153_v20 = vpack.c.bf16 %v82_v15, %v81_v14 }
 0x161   :  { %868 = vmatmul.bf16.gmra.mxu1 %v692_v28  ;;  %4283 = vmatmul.msk.bf16.vlgmr.msrb.gmra.mxu2 %vm1282_vm1, %v1473_v27  ;;  %v1054_v34 = vmax.f32 %v830_v31, 0.0 }
 0x162   :  { %v413_v33 = vpop.f32.mrf.mxu0  ;;  %1733 = vmatpush.bf16.msrb.mxu2 %v5435_v53  ;;  %v5441_v53 = vld [vmem:[%s7126_s5 + $0x148] sm:$0xff] }
 0x163   :  { %v1150_v37 = vpack.c.bf16 %v1054_v34, %v1054_v34  ;;  %v414_v38 = vadd.f32 %v5781_v43, %v413_v33 }
 0x165   :  { %4109 = vmatmul.msk.bf16.gmra.mxu0 %vm189_vm0, %v151_v32  ;;  %v1528_v44 = vunpack.c.l.b16 %v1150_v37  ;;  %v611_v45 = vmax.f32 %v414_v38, 0.0  ;;  %v83_v38 = vld [vmem:[%s7122_s0 + $0x190] sm:$0xff]  ;;  %v6101_v50 = vpop.f32.mrf.mxu2 }
 0x166   :  { %v831_v35 = vpop.f32.mrf.mxu1  ;;  %1734 = vmatpush.bf16.msrb.mxu2 %v5434_v57 }
 0x167   :  { %v832_v36 = vadd.f32 %v5929_v30, %v831_v35 }
 0x169   :  { %v1055_v39 = vmax.f32 %v832_v36, 0.0 }
 0x16a   :  { %v415_v40 = vpop.f32.mrf.mxu0  ;;  %1735 = vmatpush.bf16.msrb.mxu2 %v5433_v63 }
 0x16b   :  { %v1151_v41 = vpack.c.bf16 %v1055_v39, %v1055_v39  ;;  %v416_v42 = vadd.f32 %v5781_v43, %v415_v40  ;;  %v84_v39 = vld [vmem:[%s7122_s0 + $0x198] sm:$0xff] }
 0x16d   :  { %v1529_v46 = vunpack.c.l.b16 %v1151_v41  ;;  %v612_v47 = vmax.f32 %v416_v42, 0.0  ;;  %v5443_v42 = vld [vmem:[%s7126_s5 + $0x158] sm:$0xff] }
 0x16e   :  { %v834_v48 = vpop.f32.mrf.mxu1  ;;  %1736 = vmatpush.bf16.msrb.mxu2 %v5432_v7 }
 0x16f   :  { %v6050_v51 = vpack.c.b16 %v1529_v46, %v1528_v44  ;;  %v693_v52 = vpack.c.bf16 %v612_v47, %v611_v45  ;;  %v835_v54 = vadd.f32 %v5929_v30, %v834_v48  ;;  %v154_v45 = vpack.c.bf16 %v84_v39, %v83_v38  ;;  %v5442_v47 = vld [vmem:[%s7126_s5 + $0x150] sm:$0xff] }
 0x170   :  { %v5450_v39 = vld [vmem:[%s7126_s5 + $0x190] sm:$0xff] }
 0x171   :  { %873 = vmatmul.bf16.gmra.mxu1 %v693_v52  ;;  %v1056_v58 = vmax.f32 %v835_v54, 0.0 }
 0x172   :  { %v418_v56 = vpop.f32.mrf.mxu0 }
 0x173   :  { %v1152_v0 = vpack.c.bf16 %v1056_v58, %v1056_v58  ;;  %v419_v2 = vadd.f32 %v5781_v43, %v418_v56 }
 0x175   :  { %4110 = vmatmul.msk.bf16.gmra.mxu0 %vm189_vm0, %v152_v55  ;;  %v1585_v8 = vunpack.c.l.b16 %v1152_v0  ;;  %v613_v9 = vmax.f32 %v419_v2, 0.0 }
 0x176   :  { %v836_v60 = vpop.f32.mrf.mxu1 }
 0x177   :  { %v837_v62 = vadd.f32 %v5929_v30, %v836_v60 }
 0x179   :  { %v1057_v3 = vmax.f32 %v837_v62, 0.0  ;;  %v5440_v62 = vld [vmem:[%s7126_s5 + $0x140] sm:$0xff] }
 0x17a   :  { %v420_v4 = vpop.f32.mrf.mxu0 }
 0x17b   :  { %v1153_v5 = vpack.c.bf16 %v1057_v3, %v1057_v3  ;;  %v421_v6 = vadd.f32 %v5781_v43, %v420_v4 }
 0x17d   :  { %v1586_v11 = vunpack.c.l.b16 %v1153_v5  ;;  %v614_v12 = vmax.f32 %v421_v6, 0.0  ;;  %v85_v5 = vld [vmem:[%s7122_s0 + $0x1a0] sm:$0xff]  ;;  %v86_v6 = vld [vmem:[%s7122_s0 + $0x1a8] sm:$0xff] }
 0x17e   :  { %v839_v13 = vpop.f32.mrf.mxu1 }
 0x17f   :  { %v1587_v16 = vpack.c.b16 %v1586_v11, %v1585_v8  ;;  %v694_v17 = vpack.c.bf16 %v614_v12, %v613_v9  ;;  %v840_v19 = vadd.f32 %v5929_v30, %v839_v13  ;;  %v6118_v9 = vpop.f32.mrf.mxu2  ;;  %v155_v12 = vpack.c.bf16 %v86_v6, %v85_v5 }
 0x181   :  { %878 = vmatmul.bf16.gmra.mxu1 %v694_v17  ;;  %4333 = vmatmul.msk.bf16.vlgmr.msra.gmra.mxu2 %vm1282_vm1, %v1587_v16  ;;  %v1058_v22 = vmax.f32 %v840_v19, 0.0 }
 0x182   :  { %v423_v21 = vpop.f32.mrf.mxu0  ;;  %1847 = vmatpush.bf16.msra.mxu2 %v5443_v42 }
 0x183   :  { %v1154_v25 = vpack.c.bf16 %v1058_v22, %v1058_v22  ;;  %v424_v26 = vadd.f32 %v5781_v43, %v423_v21 }
 0x185   :  { %4111 = vmatmul.msk.bf16.gmra.mxu0 %vm189_vm0, %v153_v20  ;;  %v1642_v33 = vunpack.c.l.b16 %v1154_v25  ;;  %v615_v34 = vmax.f32 %v424_v26, 0.0 }
 0x186   :  { %v841_v23 = vpop.f32.mrf.mxu1  ;;  %1848 = vmatpush.bf16.msra.mxu2 %v5442_v47 }
 0x187   :  { %v842_v24 = vadd.f32 %v5929_v30, %v841_v23 }
 0x189   :  { %v1059_v27 = vmax.f32 %v842_v24, 0.0 }
 0x18a   :  { %v425_v28 = vpop.f32.mrf.mxu0  ;;  %1849 = vmatpush.bf16.msra.mxu2 %v5441_v53 }
 0x18b   :  { %v1155_v31 = vpack.c.bf16 %v1059_v27, %v1059_v27  ;;  %v426_v32 = vadd.f32 %v5781_v43, %v425_v28 }
 0x18d   :  { %v1643_v35 = vunpack.c.l.b16 %v1155_v31  ;;  %v616_v36 = vmax.f32 %v426_v32, 0.0  ;;  %v87_v31 = vld [vmem:[%s7122_s0 + $0x1b0] sm:$0xff]  ;;  %v88_v32 = vld [vmem:[%s7122_s0 + $0x1b8] sm:$0xff] }
 0x18e   :  { %v844_v37 = vpop.f32.mrf.mxu1  ;;  %1850 = vmatpush.bf16.msra.mxu2 %v5440_v62 }
 0x18f   :  { %v6091_v40 = vpack.c.b16 %v1643_v35, %v1642_v33  ;;  %v695_v41 = vpack.c.bf16 %v616_v36, %v615_v34  ;;  %v845_v44 = vadd.f32 %v5929_v30, %v844_v37  ;;  %v5451_v35 = vld [vmem:[%s7126_s5 + $0x198] sm:$0xff]  ;;  %v156_v37 = vpack.c.bf16 %v88_v32, %v87_v31 }
 0x190   :  { %v5459_v31 = vld [vmem:[%s7126_s5 + $0x1d8] sm:$0xff] }
 0x191   :  { %883 = vmatmul.bf16.gmra.mxu1 %v695_v41  ;;  %v1060_v48 = vmax.f32 %v845_v44, 0.0  ;;  %v6142_v44 = vpop.f32.mrf.mxu2 }
 0x192   :  { %v428_v46 = vpop.f32.mrf.mxu0 }
 0x193   :  { %v1156_v54 = vpack.c.bf16 %v1060_v48, %v1060_v48  ;;  %v429_v55 = vadd.f32 %v5781_v43, %v428_v46  ;;  %v5449_v46 = vld [vmem:[%s7126_s5 + $0x188] sm:$0xff] }
 0x195   :  { %4112 = vmatmul.msk.bf16.gmra.mxu0 %vm189_vm0, %v154_v45  ;;  %v1699_v63 = vunpack.c.l.b16 %v1156_v54  ;;  %v617_v0 = vmax.f32 %v429_v55, 0.0  ;;  %v5448_v55 = vld [vmem:[%s7126_s5 + $0x180] sm:$0xff] }
 0x196   :  { %v846_v49 = vpop.f32.mrf.mxu1 }
 0x197   :  { %v847_v52 = vadd.f32 %v5929_v30, %v846_v49 }
 0x199   :  { %v1061_v56 = vmax.f32 %v847_v52, 0.0 }
 0x19a   :  { %v430_v57 = vpop.f32.mrf.mxu0 }
 0x19b   :  { %v1157_v58 = vpack.c.bf16 %v1061_v56, %v1061_v56  ;;  %v431_v60 = vadd.f32 %v5781_v43, %v430_v57 }
 0x19d   :  { %v1700_v2 = vunpack.c.l.b16 %v1157_v58  ;;  %v618_v3 = vmax.f32 %v431_v60, 0.0 }
 0x19e   :  { %v849_v4 = vpop.f32.mrf.mxu1 }
 0x19f   :  { %v1701_v7 = vpack.c.b16 %v1700_v2, %v1699_v63  ;;  %v696_v8 = vpack.c.bf16 %v618_v3, %v617_v0  ;;  %v850_v11 = vadd.f32 %v5929_v30, %v849_v4  ;;  %v89_v63 = vld [vmem:[%s7122_s0 + $0x1c0] sm:$0xff]  ;;  %v90_v0 = vld [vmem:[%s7122_s0 + $0x1c8] sm:$0xff]  ;;  %v6159_v4 = vpop.f32.mrf.mxu2 }
 0x1a0   :  { %v157_v6 = vpack.c.bf16 %v90_v0, %v89_v63 }
 0x1a1   :  { %888 = vmatmul.bf16.gmra.mxu1 %v696_v8  ;;  %4383 = vmatmul.msk.bf16.vlgmr.msrb.gmra.mxu2 %vm1282_vm1, %v1701_v7  ;;  %v1062_v14 = vmax.f32 %v850_v11, 0.0 }
 0x1a2   :  { %v433_v13 = vpop.f32.mrf.mxu0  ;;  %1961 = vmatpush.bf16.msrb.mxu2 %v5451_v35 }
 0x1a3   :  { %v1158_v17 = vpack.c.bf16 %v1062_v14, %v1062_v14  ;;  %v434_v19 = vadd.f32 %v5781_v43, %v433_v13 }
 0x1a5   :  { %4113 = vmatmul.msk.bf16.gmra.mxu0 %vm189_vm0, %v155_v12  ;;  %v1756_v24 = vunpack.c.l.b16 %v1158_v17  ;;  %v619_v25 = vmax.f32 %v434_v19, 0.0 }
 0x1a6   :  { %v851_v15 = vpop.f32.mrf.mxu1  ;;  %1962 = vmatpush.bf16.msrb.mxu2 %v5450_v39 }
 0x1a7   :  { %v852_v16 = vadd.f32 %v5929_v30, %v851_v15  ;;  %v6183_v39 = vpop.f32.mrf.mxu2 }
 0x1a9   :  { %v1063_v20 = vmax.f32 %v852_v16, 0.0 }
 0x1aa   :  { %v435_v21 = vpop.f32.mrf.mxu0  ;;  %1963 = vmatpush.bf16.msrb.mxu2 %v5449_v46 }
 0x1ab   :  { %v1159_v22 = vpack.c.bf16 %v1063_v20, %v1063_v20  ;;  %v436_v23 = vadd.f32 %v5781_v43, %v435_v21 }
 0x1ad   :  { %v1757_v26 = vunpack.c.l.b16 %v1159_v22  ;;  %v620_v27 = vmax.f32 %v436_v23, 0.0 }
 0x1ae   :  { %v854_v28 = vpop.f32.mrf.mxu1  ;;  %1964 = vmatpush.bf16.msrb.mxu2 %v5448_v55 }
 0x1af   :  { %v6132_v33 = vpack.c.b16 %v1757_v26, %v1756_v24  ;;  %v697_v34 = vpack.c.bf16 %v620_v27, %v619_v25  ;;  %v855_v36 = vadd.f32 %v5929_v30, %v854_v28  ;;  %v91_v25 = vld [vmem:[%s7122_s0 + $0x1d0] sm:$0xff]  ;;  %v92_v26 = vld [vmem:[%s7122_s0 + $0x1d8] sm:$0xff]  ;;  %v6200_v0 = vpop.f32.mrf.mxu2 }
 0x1b1   :  { %893 = vmatmul.bf16.gmra.mxu1 %v697_v34  ;;  %v1064_v41 = vmax.f32 %v855_v36, 0.0  ;;  %v158_v34 = vpack.c.bf16 %v92_v26, %v91_v25  ;;  %v5458_v36 = vld [vmem:[%s7126_s5 + $0x1d0] sm:$0xff]  ;;  %v96_v25 = vld [vmem:[%s7122_s0 + $0x1f8] sm:$0xff] }
 0x1b2   :  { %v438_v38 = vpop.f32.mrf.mxu0 }
 0x1b3   :  { %v1160_v47 = vpack.c.bf16 %v1064_v41, %v1064_v41  ;;  %v439_v48 = vadd.f32 %v5781_v43, %v438_v38 }
 0x1b5   :  { %4114 = vmatmul.msk.bf16.gmra.mxu0 %vm189_vm0, %v156_v37  ;;  %v1813_v56 = vunpack.c.l.b16 %v1160_v47  ;;  %v621_v57 = vmax.f32 %v439_v48, 0.0 }
 0x1b6   :  { %v856_v42 = vpop.f32.mrf.mxu1 }
 0x1b7   :  { %v857_v45 = vadd.f32 %v5929_v30, %v856_v42  ;;  %v5457_v42 = vld [vmem:[%s7126_s5 + $0x1c8] sm:$0xff] }
 0x1b9   :  { %v1065_v49 = vmax.f32 %v857_v45, 0.0 }
 0x1ba   :  { %v440_v52 = vpop.f32.mrf.mxu0 }
 0x1bb   :  { %v1161_v53 = vpack.c.bf16 %v1065_v49, %v1065_v49  ;;  %v441_v54 = vadd.f32 %v5781_v43, %v440_v52 }
 0x1bd   :  { %v1814_v58 = vunpack.c.l.b16 %v1161_v53  ;;  %v622_v60 = vmax.f32 %v441_v54, 0.0  ;;  %v5456_v53 = vld [vmem:[%s7126_s5 + $0x1c0] sm:$0xff] }
 0x1be   :  { %v859_v62 = vpop.f32.mrf.mxu1 }
 0x1bf   :  { %v1815_v2 = vpack.c.b16 %v1814_v58, %v1813_v56  ;;  %v698_v3 = vpack.c.bf16 %v622_v60, %v621_v57  ;;  %v860_v5 = vadd.f32 %v5929_v30, %v859_v62  ;;  %v93_v60 = vld [vmem:[%s7122_s0 + $0x1e0] sm:$0xff]  ;;  %v94_v62 = vld [vmem:[%s7122_s0 + $0x1e8] sm:$0xff] }
 0x1c1   :  { %898 = vmatmul.bf16.gmra.mxu1 %v698_v3  ;;  %4433 = vmatmul.msk.bf16.vlgmr.msra.gmra.mxu2 %vm1282_vm1, %v1815_v2  ;;  %v1066_v8 = vmax.f32 %v860_v5, 0.0  ;;  %v159_v3 = vpack.c.bf16 %v94_v62, %v93_v60  ;;  %v97_v62 = vld [vmem:[%s7122_s0 + $0x200] sm:$0xff] }
 0x1c2   :  { %v443_v7 = vpop.f32.mrf.mxu0  ;;  %2075 = vmatpush.bf16.msra.mxu2 %v5459_v31  ;;  %v5467_v31 = vld [vmem:[%s7126_s5 + $0x218] sm:$0xff] }
 0x1c3   :  { %v1162_v13 = vpack.c.bf16 %v1066_v8, %v1066_v8  ;;  %v444_v14 = vadd.f32 %v5781_v43, %v443_v7 }
 0x1c5   :  { %4115 = vmatmul.msk.bf16.gmra.mxu0 %vm189_vm0, %v157_v6  ;;  %v1870_v20 = vunpack.c.l.b16 %v1162_v13  ;;  %v623_v21 = vmax.f32 %v444_v14, 0.0 }
 0x1c6   :  { %v861_v11 = vpop.f32.mrf.mxu1  ;;  %2076 = vmatpush.bf16.msra.mxu2 %v5458_v36  ;;  %v5466_v36 = vld [vmem:[%s7126_s5 + $0x210] sm:$0xff] }
 0x1c7   :  { %v862_v12 = vadd.f32 %v5929_v30, %v861_v11 }
 0x1c9   :  { %v1067_v15 = vmax.f32 %v862_v12, 0.0  ;;  %v6209_v12 = vld [vmem:[%s7123_s2] ss:$0 sm:$0xff] }
 0x1ca   :  { %v445_v16 = vpop.f32.mrf.mxu0  ;;  %2077 = vmatpush.bf16.msra.mxu2 %v5457_v42 }
 0x1cb   :  { %v1163_v17 = vpack.c.bf16 %v1067_v15, %v1067_v15  ;;  %v446_v19 = vadd.f32 %v5781_v43, %v445_v16 }
 0x1cd   :  { %v1871_v22 = vunpack.c.l.b16 %v1163_v17  ;;  %v624_v23 = vmax.f32 %v446_v19, 0.0 }
 0x1ce   :  { %v864_v24 = vpop.f32.mrf.mxu1  ;;  %2078 = vmatpush.bf16.msra.mxu2 %v5456_v53 }
 0x1cf   :  { %v6173_v27 = vpack.c.b16 %v1871_v22, %v1870_v20  ;;  %v699_v28 = vpack.c.bf16 %v624_v23, %v623_v21  ;;  %v865_v32 = vadd.f32 %v5929_v30, %v864_v24  ;;  %v95_v24 = vld [vmem:[%s7122_s0 + $0x1f0] sm:$0xff] }
 0x1d1   :  { %903 = vmatmul.bf16.gmra.mxu1 %v699_v28  ;;  %v1068_v37 = vmax.f32 %v865_v32, 0.0 }
 0x1d2   :  { %v448_v35 = vpop.f32.mrf.mxu0 }
 0x1d3   :  { %v1164_v45 = vpack.c.bf16 %v1068_v37, %v1068_v37  ;;  %v449_v46 = vadd.f32 %v5781_v43, %v448_v35 }
 0x1d5   :  { %4116 = vmatmul.msk.bf16.gmra.mxu0 %vm189_vm0, %v158_v34  ;;  %v1927_v54 = vunpack.c.l.b16 %v1164_v45  ;;  %v625_v55 = vmax.f32 %v449_v46, 0.0  ;;  %v160_v34 = vpack.c.bf16 %v96_v25, %v95_v24  ;;  %v5465_v45 = vld [vmem:[%s7126_s5 + $0x208] sm:$0xff] }
 0x1d6   :  { %v866_v38 = vpop.f32.mrf.mxu1 }
 0x1d7   :  { %v867_v41 = vadd.f32 %v5929_v30, %v866_v38 }
 0x1d9   :  { %v1069_v47 = vmax.f32 %v867_v41, 0.0  ;;  %v6229_v41 = vpop.f32.mrf.mxu2 }
 0x1da   :  { %v450_v48 = vpop.f32.mrf.mxu0 }
 0x1db   :  { %v1165_v49 = vpack.c.bf16 %v1069_v47, %v1069_v47  ;;  %v451_v52 = vadd.f32 %v5781_v43, %v450_v48 }
 0x1dd   :  { %v1928_v56 = vunpack.c.l.b16 %v1165_v49  ;;  %v626_v57 = vmax.f32 %v451_v52, 0.0 }
 0x1de   :  { %v869_v58 = vpop.f32.mrf.mxu1 }
 0x1df   :  { %v1929_v63 = vpack.c.b16 %v1928_v56, %v1927_v54  ;;  %v700_v43 = vpack.c.bf16 %v626_v57, %v625_v55  ;;  %v870_v2 = vadd.f32 %v5929_v30, %v869_v58  ;;  %v5464_v54 = vld [vmem:[%s7126_s5 + $0x200] sm:$0xff] }
 0x1e1   :  { %908 = vmatmul.bf16.gmra.mxu1 %v700_v43  ;;  %4483 = vmatmul.msk.bf16.vlgmr.msrb.gmra.mxu2 %vm1282_vm1, %v1929_v63  ;;  %v1070_v6 = vmax.f32 %v870_v2, 0.0  ;;  %v98_v63 = vld [vmem:[%s7122_s0 + $0x208] sm:$0xff] }
 0x1e2   :  { %v453_v5 = vpop.f32.mrf.mxu0  ;;  %2189 = vmatpush.bf16.msrb.mxu2 %v5467_v31  ;;  %v100_v31 = vld [vmem:[%s7122_s0 + $0x218] sm:$0xff] }
 0x1e3   :  { %v1166_v11 = vpack.c.bf16 %v1070_v6, %v1070_v6  ;;  %v454_v13 = vadd.f32 %v6209_v12, %v453_v5  ;;  %v161_v6 = vpack.c.bf16 %v98_v63, %v97_v62 }
 0x1e5   :  { %4117 = vmatmul.msk.bf16.gmra.mxu0 %vm189_vm0, %v159_v3  ;;  %v1984_v19 = vunpack.c.l.b16 %v1166_v11  ;;  %v627_v20 = vmax.f32 %v454_v13, 0.0  ;;  %v6246_v3 = vpop.f32.mrf.mxu2 }
 0x1e6   :  { %v871_v7 = vpop.f32.mrf.mxu1  ;;  %2190 = vmatpush.bf16.msrb.mxu2 %v5466_v36 }
 0x1e7   :  { %v872_v8 = vadd.f32 %v5929_v30, %v871_v7 }
 0x1e9   :  { %v1071_v14 = vmax.f32 %v872_v8, 0.0 }
 0x1ea   :  { %v455_v15 = vpop.f32.mrf.mxu0  ;;  %2191 = vmatpush.bf16.msrb.mxu2 %v5465_v45 }
 0x1eb   :  { %v1167_v16 = vpack.c.bf16 %v1071_v14, %v1071_v14  ;;  %v456_v17 = vadd.f32 %v6209_v12, %v455_v15 }
 0x1ed   :  { %v1985_v21 = vunpack.c.l.b16 %v1167_v16  ;;  %v628_v22 = vmax.f32 %v456_v17, 0.0 }
 0x1ee   :  { %v874_v23 = vpop.f32.mrf.mxu1  ;;  %2192 = vmatpush.bf16.msrb.mxu2 %v5464_v54 }
 0x1ef   :  { %v6219_v26 = vpack.c.b16 %v1985_v21, %v1984_v19  ;;  %v701_v28 = vpack.c.bf16 %v628_v22, %v627_v20  ;;  %v875_v32 = vadd.f32 %v5929_v30, %v874_v23 }
 0x1f1   :  { %913 = vmatmul.bf16.gmra.mxu1 %v701_v28  ;;  %v1072_v37 = vmax.f32 %v875_v32, 0.0  ;;  %v99_v28 = vld [vmem:[%s7122_s0 + $0x210] sm:$0xff] }
 0x1f2   :  { %v458_v35 = vpop.f32.mrf.mxu0 }
 0x1f3   :  { %v1168_v46 = vpack.c.bf16 %v1072_v37, %v1072_v37  ;;  %v459_v47 = vadd.f32 %v6209_v12, %v458_v35  ;;  %v5475_v35 = vld [vmem:[%s7126_s5 + $0x258] sm:$0xff]  ;;  %v162_v37 = vpack.c.bf16 %v100_v31, %v99_v28 }
 0x1f5   :  { %4118 = vmatmul.msk.bf16.gmra.mxu0 %vm189_vm0, %v160_v34  ;;  %v2041_v55 = vunpack.c.l.b16 %v1168_v46  ;;  %v629_v56 = vmax.f32 %v459_v47, 0.0  ;;  %v6270_v47 = vpop.f32.mrf.mxu2 }
 0x1f6   :  { %v876_v38 = vpop.f32.mrf.mxu1 }
 0x1f7   :  { %v877_v42 = vadd.f32 %v5929_v30, %v876_v38 }
 0x1f9   :  { %v1073_v48 = vmax.f32 %v877_v42, 0.0  ;;  %v5474_v42 = vld [vmem:[%s7126_s5 + $0x250] sm:$0xff] }
 0x1fa   :  { %v460_v49 = vpop.f32.mrf.mxu0 }
 0x1fb   :  { %v1169_v52 = vpack.c.bf16 %v1073_v48, %v1073_v48  ;;  %v461_v53 = vadd.f32 %v6209_v12, %v460_v49  ;;  %v5473_v49 = vld [vmem:[%s7126_s5 + $0x248] sm:$0xff] }
 0x1fd   :  { %v2042_v57 = vunpack.c.l.b16 %v1169_v52  ;;  %v630_v58 = vmax.f32 %v461_v53, 0.0 }
 0x1fe   :  { %v879_v60 = vpop.f32.mrf.mxu1 }
 0x1ff   :  { %v2043_v43 = vpack.c.b16 %v2042_v57, %v2041_v55  ;;  %v702_v2 = vpack.c.bf16 %v630_v58, %v629_v56  ;;  %v880_v5 = vadd.f32 %v5929_v30, %v879_v60  ;;  %v5472_v58 = vld [vmem:[%s7126_s5 + $0x240] sm:$0xff] }
 0x201   :  { %918 = vmatmul.bf16.gmra.mxu1 %v702_v2  ;;  %4533 = vmatmul.msk.bf16.vlgmr.msra.gmra.mxu2 %vm1282_vm1, %v2043_v43  ;;  %v1074_v8 = vmax.f32 %v880_v5, 0.0  ;;  %v101_v5 = vld [vmem:[%s7122_s0 + $0x220] sm:$0xff] }
 0x202   :  { %v463_v7 = vpop.f32.mrf.mxu0  ;;  %2303 = vmatpush.bf16.msra.mxu2 %v5475_v35 }
 0x203   :  { %v1170_v14 = vpack.c.bf16 %v1074_v8, %v1074_v8  ;;  %v464_v15 = vadd.f32 %v6209_v12, %v463_v7 }
 0x205   :  { %4119 = vmatmul.msk.bf16.gmra.mxu0 %vm189_vm0, %v161_v6  ;;  %v2098_v21 = vunpack.c.l.b16 %v1170_v14  ;;  %v631_v22 = vmax.f32 %v464_v15, 0.0  ;;  %v102_v6 = vld [vmem:[%s7122_s0 + $0x228] sm:$0xff] }
 0x206   :  { %v881_v11 = vpop.f32.mrf.mxu1  ;;  %2304 = vmatpush.bf16.msra.mxu2 %v5474_v42  ;;  %v163_v14 = vpack.c.bf16 %v102_v6, %v101_v5  ;;  %v5480_v6 = vld [vmem:[%s7126_s5 + $0x280] sm:$0xff] }
 0x207   :  { %v882_v13 = vadd.f32 %v5929_v30, %v881_v11  ;;  %v6287_v11 = vpop.f32.mrf.mxu2 }
 0x209   :  { %v1075_v16 = vmax.f32 %v882_v13, 0.0 }
 0x20a   :  { %v465_v17 = vpop.f32.mrf.mxu0  ;;  %2305 = vmatpush.bf16.msra.mxu2 %v5473_v49 }
 0x20b   :  { %v1171_v19 = vpack.c.bf16 %v1075_v16, %v1075_v16  ;;  %v466_v20 = vadd.f32 %v6209_v12, %v465_v17 }
 0x20d   :  { %v2099_v23 = vunpack.c.l.b16 %v1171_v19  ;;  %v632_v24 = vmax.f32 %v466_v20, 0.0 }
 0x20e   :  { %v884_v25 = vpop.f32.mrf.mxu1  ;;  %2306 = vmatpush.bf16.msra.mxu2 %v5472_v58  ;;  %v5481_v58 = vld [vmem:[%s7126_s5 + $0x288] sm:$0xff] }
 0x20f   :  { %v6260_v32 = vpack.c.b16 %v2099_v23, %v2098_v21  ;;  %v703_v34 = vpack.c.bf16 %v632_v24, %v631_v22  ;;  %v885_v36 = vadd.f32 %v5929_v30, %v884_v25 }
 0x211   :  { %923 = vmatmul.bf16.gmra.mxu1 %v703_v34  ;;  %v1076_v45 = vmax.f32 %v885_v36, 0.0 }
 0x212   :  { %v468_v38 = vpop.f32.mrf.mxu0 }
 0x213   :  { %v1172_v52 = vpack.c.bf16 %v1076_v45, %v1076_v45  ;;  %v469_v53 = vadd.f32 %v6209_v12, %v468_v38  ;;  %v5483_v45 = vld [vmem:[%s7126_s5 + $0x298] sm:$0xff] }
 0x215   :  { %4120 = vmatmul.msk.bf16.gmra.mxu0 %vm189_vm0, %v162_v37  ;;  %v2155_v60 = vunpack.c.l.b16 %v1172_v52  ;;  %v633_v62 = vmax.f32 %v469_v53, 0.0  ;;  %v103_v37 = vld [vmem:[%s7122_s0 + $0x230] sm:$0xff] }
 0x216   :  { %v886_v46 = vpop.f32.mrf.mxu1  ;;  %v5482_v53 = vld [vmem:[%s7126_s5 + $0x290] sm:$0xff] }
 0x217   :  { %v887_v48 = vadd.f32 %v5929_v30, %v886_v46  ;;  %v6309_v46 = vld [vmem:[%s7125_s4] ss:$0 sm:$0xff] }
 0x219   :  { %v1077_v54 = vmax.f32 %v887_v48, 0.0 }
 0x21a   :  { %v470_v55 = vpop.f32.mrf.mxu0 }
 0x21b   :  { %v1173_v56 = vpack.c.bf16 %v1077_v54, %v1077_v54  ;;  %v471_v57 = vadd.f32 %v6209_v12, %v470_v55 }
 0x21d   :  { %v2156_v63 = vunpack.c.l.b16 %v1173_v56  ;;  %v634_v43 = vmax.f32 %v471_v57, 0.0  ;;  %v6316_v56 = vpop.f32.mrf.mxu2 }
 0x21e   :  { %v889_v2 = vpop.f32.mrf.mxu1 }
 0x21f   :  { %v2157_v7 = vpack.c.b16 %v2156_v63, %v2155_v60  ;;  %v704_v8 = vpack.c.bf16 %v634_v43, %v633_v62  ;;  %v890_v13 = vadd.f32 %v5929_v30, %v889_v2 }
 0x221   :  { %928 = vmatmul.bf16.gmra.mxu1 %v704_v8  ;;  %4583 = vmatmul.msk.bf16.vlgmr.msrb.gmra.mxu2 %vm1282_vm1, %v2157_v7  ;;  %v1078_v16 = vmax.f32 %v890_v13, 0.0 }
 0x222   :  { %v473_v15 = vpop.f32.mrf.mxu0  ;;  %2417 = vmatpush.bf16.msrb.mxu2 %v5483_v45 }
 0x223   :  { %v1174_v20 = vpack.c.bf16 %v1078_v16, %v1078_v16  ;;  %v474_v21 = vadd.f32 %v6209_v12, %v473_v15  ;;  %v105_v16 = vld [vmem:[%s7122_s0 + $0x240] sm:$0xff] }
 0x225   :  { %4121 = vmatmul.msk.bf16.gmra.mxu0 %vm189_vm0, %v163_v14  ;;  %v2212_v28 = vunpack.c.l.b16 %v1174_v20  ;;  %v635_v31 = vmax.f32 %v474_v21, 0.0  ;;  %v6333_v21 = vpop.f32.mrf.mxu2 }
 0x226   :  { %v891_v17 = vpop.f32.mrf.mxu1  ;;  %2418 = vmatpush.bf16.msrb.mxu2 %v5482_v53 }
 0x227   :  { %v892_v19 = vadd.f32 %v5929_v30, %v891_v17  ;;  %v104_v30 = vld [vmem:[%s7122_s0 + $0x238] sm:$0xff]  ;;  %v106_v17 = vld [vmem:[%s7122_s0 + $0x248] sm:$0xff] }
 0x228   :  { %v164_v49 = vpack.c.bf16 %v104_v30, %v103_v37 }
 0x229   :  { %v1079_v22 = vmax.f32 %v892_v19, 0.0 }
 0x22a   :  { %v475_v23 = vpop.f32.mrf.mxu0  ;;  %2419 = vmatpush.bf16.msrb.mxu2 %v5481_v58 }
 0x22b   :  { %v1175_v24 = vpack.c.bf16 %v1079_v22, %v1079_v22  ;;  %v476_v25 = vadd.f32 %v6209_v12, %v475_v23  ;;  %v165_v23 = vpack.c.bf16 %v106_v17, %v105_v16 }
 0x22d   :  { %v2213_v34 = vunpack.c.l.b16 %v1175_v24  ;;  %v636_v35 = vmax.f32 %v476_v25, 0.0 }
 0x22e   :  { %v894_v36 = vpop.f32.mrf.mxu1  ;;  %2420 = vmatpush.bf16.msrb.mxu2 %v5480_v6 }
 0x22f   :  { %v6301_v38 = vpack.c.b16 %v2213_v34, %v2212_v28  ;;  %v705_v42 = vpack.c.bf16 %v636_v35, %v635_v31  ;;  %v895_v48 = vadd.f32 %v6309_v46, %v894_v36 }
 0x231   :  { %933 = vmatmul.bf16.gmra.mxu1 %v705_v42  ;;  %v1080_v54 = vmax.f32 %v895_v48, 0.0 }
 0x232   :  { %v478_v52 = vpop.f32.mrf.mxu0 }
 0x233   :  { %v1176_v60 = vpack.c.bf16 %v1080_v54, %v1080_v54  ;;  %v479_v62 = vadd.f32 %v6209_v12, %v478_v52  ;;  %v107_v54 = vld [vmem:[%s7122_s0 + $0x250] sm:$0xff] }
 0x235   :  { %4122 = vmatmul.msk.bf16.gmra.mxu0 %vm189_vm0, %v164_v49  ;;  %v2269_v7 = vunpack.c.l.b16 %v1176_v60  ;;  %v637_v8 = vmax.f32 %v479_v62, 0.0  ;;  %v5491_v60 = vld [vmem:[%s7126_s5 + $0x2d8] sm:$0xff] }
 0x236   :  { %v896_v55 = vpop.f32.mrf.mxu1 }
 0x237   :  { %v897_v57 = vadd.f32 %v6309_v46, %v896_v55  ;;  %v108_v55 = vld [vmem:[%s7122_s0 + $0x258] sm:$0xff] }
 0x239   :  { %v1081_v63 = vmax.f32 %v897_v57, 0.0 }
 0x23a   :  { %v480_v43 = vpop.f32.mrf.mxu0 }
 0x23b   :  { %v1177_v2 = vpack.c.bf16 %v1081_v63, %v1081_v63  ;;  %v481_v5 = vadd.f32 %v6209_v12, %v480_v43  ;;  %v166_v63 = vpack.c.bf16 %v108_v55, %v107_v54 }
 0x23d   :  { %v2270_v13 = vunpack.c.l.b16 %v1177_v2  ;;  %v638_v14 = vmax.f32 %v481_v5, 0.0  ;;  %v5490_v2 = vld [vmem:[%s7126_s5 + $0x2d0] sm:$0xff] }
 0x23e   :  { %v899_v15 = vpop.f32.mrf.mxu1 }
 0x23f   :  { %v2271_v19 = vpack.c.b16 %v2270_v13, %v2269_v7  ;;  %v706_v20 = vpack.c.bf16 %v638_v14, %v637_v8  ;;  %v900_v22 = vadd.f32 %v6309_v46, %v899_v15  ;;  %v6357_v7 = vpop.f32.mrf.mxu2  ;;  %v5489_v13 = vld [vmem:[%s7126_s5 + $0x2c8] sm:$0xff] }
 0x241   :  { %938 = vmatmul.bf16.gmra.mxu1 %v706_v20  ;;  %4633 = vmatmul.msk.bf16.vlgmr.msra.gmra.mxu2 %vm1282_vm1, %v2271_v19  ;;  %v1082_v25 = vmax.f32 %v900_v22, 0.0  ;;  %v5488_v22 = vld [vmem:[%s7126_s5 + $0x2c0] sm:$0xff] }
 0x242   :  { %v483_v24 = vpop.f32.mrf.mxu0  ;;  %2531 = vmatpush.bf16.msra.mxu2 %v5491_v60 }
 0x243   :  { %v1178_v34 = vpack.c.bf16 %v1082_v25, %v1082_v25  ;;  %v484_v35 = vadd.f32 %v6209_v12, %v483_v24 }
 0x245   :  { %4123 = vmatmul.msk.bf16.gmra.mxu0 %vm189_vm0, %v165_v23  ;;  %v2326_v45 = vunpack.c.l.b16 %v1178_v34  ;;  %v639_v48 = vmax.f32 %v484_v35, 0.0 }
 0x246   :  { %v901_v28 = vpop.f32.mrf.mxu1  ;;  %2532 = vmatpush.bf16.msra.mxu2 %v5490_v2 }
 0x247   :  { %v902_v31 = vadd.f32 %v6309_v46, %v901_v28 }
 0x249   :  { %v1083_v36 = vmax.f32 %v902_v31, 0.0 }
 0x24a   :  { %v485_v37 = vpop.f32.mrf.mxu0  ;;  %2533 = vmatpush.bf16.msra.mxu2 %v5489_v13 }
 0x24b   :  { %v1179_v30 = vpack.c.bf16 %v1083_v36, %v1083_v36  ;;  %v486_v42 = vadd.f32 %v6209_v12, %v485_v37  ;;  %v6368_v36 = vpop.f32.mrf.mxu2 }
 0x24d   :  { %v2327_v49 = vunpack.c.l.b16 %v1179_v30  ;;  %v640_v52 = vmax.f32 %v486_v42, 0.0 }
 0x24e   :  { %v904_v53 = vpop.f32.mrf.mxu1  ;;  %2534 = vmatpush.bf16.msra.mxu2 %v5488_v22  ;;  %v5497_v22 = vld [vmem:[%s7126_s5 + $0x308] sm:$0xff] }
 0x24f   :  { %v6347_v57 = vpack.c.b16 %v2327_v49, %v2326_v45  ;;  %v707_v58 = vpack.c.bf16 %v640_v52, %v639_v48  ;;  %v905_v62 = vadd.f32 %v6309_v46, %v904_v53 }
 0x251   :  { %943 = vmatmul.bf16.gmra.mxu1 %v707_v58  ;;  %v1084_v5 = vmax.f32 %v905_v62, 0.0 }
 0x252   :  { %v488_v43 = vpop.f32.mrf.mxu0 }
 0x253   :  { %v1180_v14 = vpack.c.bf16 %v1084_v5, %v1084_v5  ;;  %v489_v15 = vadd.f32 %v6209_v12, %v488_v43 }
 0x255   :  { %4124 = vmatmul.msk.bf16.gmra.mxu0 %vm189_vm0, %v166_v63  ;;  %v2383_v23 = vunpack.c.l.b16 %v1180_v14  ;;  %v641_v24 = vmax.f32 %v489_v15, 0.0  ;;  %v5498_v15 = vld [vmem:[%s7126_s5 + $0x310] sm:$0xff] }
 0x256   :  { %v906_v6 = vpop.f32.mrf.mxu1 }
 0x257   :  { %v907_v8 = vadd.f32 %v6309_v46, %v906_v6 }
 0x259   :  { %v1085_v16 = vmax.f32 %v907_v8, 0.0  ;;  %v5499_v8 = vld [vmem:[%s7126_s5 + $0x318] sm:$0xff] }
 0x25a   :  { %v490_v17 = vpop.f32.mrf.mxu0 }
 0x25b   :  { %v1181_v19 = vpack.c.bf16 %v1085_v16, %v1085_v16  ;;  %v491_v20 = vadd.f32 %v6209_v12, %v490_v17 }
 0x25d   :  { %v2384_v25 = vunpack.c.l.b16 %v1181_v19  ;;  %v642_v28 = vmax.f32 %v491_v20, 0.0  ;;  %v6384_v19 = vpop.f32.mrf.mxu2 }
 0x25e   :  { %v909_v31 = vpop.f32.mrf.mxu1 }
 0x25f   :  { %v2385_v34 = vpack.c.b16 %v2384_v25, %v2383_v23  ;;  %v708_v35 = vpack.c.bf16 %v642_v28, %v641_v24  ;;  %v910_v37 = vadd.f32 %v6309_v46, %v909_v31 }
 0x261   :  { %948 = vmatmul.bf16.gmra.mxu1 %v708_v35  ;;  %4683 = vmatmul.msk.bf16.vlgmr.msrb.gmra.mxu2 %vm1282_vm1, %v2385_v34  ;;  %v1086_v42 = vmax.f32 %v910_v37, 0.0  ;;  %v5496_v35 = vld [vmem:[%s7126_s5 + $0x300] sm:$0xff] }
 0x262   :  { %v493_v30 = vpop.f32.mrf.mxu0  ;;  %2645 = vmatpush.bf16.msrb.mxu2 %v5499_v8 }
 0x263   :  { %v1182_v49 = vpack.c.bf16 %v1086_v42, %v1086_v42  ;;  %v494_v52 = vadd.f32 %v6209_v12, %v493_v30 }
 0x265   :  { %v2440_v60 = vunpack.c.l.b16 %v1182_v49  ;;  %v643_v62 = vmax.f32 %v494_v52, 0.0 }
 0x266   :  { %v911_v45 = vpop.f32.mrf.mxu1  ;;  %2646 = vmatpush.bf16.msrb.mxu2 %v5498_v15 }
 0x267   :  { %v912_v48 = vadd.f32 %v6309_v46, %v911_v45 }
 0x269   :  { %v1087_v53 = vmax.f32 %v912_v48, 0.0 }
 0x26a   :  { %v495_v54 = vpop.f32.mrf.mxu0  ;;  %2647 = vmatpush.bf16.msrb.mxu2 %v5497_v22 }
 0x26b   :  { %v1183_v55 = vpack.c.bf16 %v1087_v53, %v1087_v53  ;;  %v496_v58 = vadd.f32 %v6209_v12, %v495_v54  ;;  %v6395_v53 = vpop.f32.mrf.mxu2 }
 0x26d   :  { %v2441_v63 = vunpack.c.l.b16 %v1183_v55  ;;  %v644_v43 = vmax.f32 %v496_v58, 0.0 }
 0x26e   :  { %v914_v2 = vpop.f32.mrf.mxu1  ;;  %2648 = vmatpush.bf16.msrb.mxu2 %v5496_v35 }
 0x26f   :  { %v6375_v5 = vpack.c.b16 %v2441_v63, %v2440_v60  ;;  %v709_v6 = vpack.c.bf16 %v644_v43, %v643_v62  ;;  %v915_v13 = vadd.f32 %v6309_v46, %v914_v2 }
 0x271   :  { %953 = vmatmul.bf16.gmra.mxu1 %v709_v6  ;;  %v1088_v16 = vmax.f32 %v915_v13, 0.0 }
 0x272   :  { %v498_v14 = vpop.f32.mrf.mxu0 }
 0x273   :  { %v1184_v23 = vpack.c.bf16 %v1088_v16, %v1088_v16  ;;  %v499_v24 = vadd.f32 %v6209_v12, %v498_v14 }
 0x275   :  { %v2497_v37 = vunpack.c.l.b16 %v1184_v23  ;;  %v645_v30 = vmax.f32 %v499_v24, 0.0  ;;  %v5507_v24 = vld [vmem:[%s7126_s5 + $0x358] sm:$0xff] }
 0x276   :  { %v916_v17 = vpop.f32.mrf.mxu1 }
 0x277   :  { %v917_v20 = vadd.f32 %v6309_v46, %v916_v17 }
 0x279   :  { %v1089_v25 = vmax.f32 %v917_v20, 0.0 }
 0x27a   :  { %v500_v28 = vpop.f32.mrf.mxu0 }
 0x27b   :  { %v1185_v31 = vpack.c.bf16 %v1089_v25, %v1089_v25  ;;  %v501_v34 = vadd.f32 %v6209_v12, %v500_v28 }
 0x27d   :  { %v2498_v42 = vunpack.c.l.b16 %v1185_v31  ;;  %v646_v45 = vmax.f32 %v501_v34, 0.0  ;;  %v5506_v31 = vld [vmem:[%s7126_s5 + $0x350] sm:$0xff] }
 0x27e   :  { %v919_v48 = vpop.f32.mrf.mxu1 }
 0x27f   :  { %v2499_v49 = vpack.c.b16 %v2498_v42, %v2497_v37  ;;  %v710_v52 = vpack.c.bf16 %v646_v45, %v645_v30  ;;  %v920_v54 = vadd.f32 %v6309_v46, %v919_v48  ;;  %v6411_v37 = vpop.f32.mrf.mxu2  ;;  %v5505_v42 = vld [vmem:[%s7126_s5 + $0x348] sm:$0xff] }
 0x281   :  { %958 = vmatmul.bf16.gmra.mxu1 %v710_v52  ;;  %4733 = vmatmul.msk.bf16.vlgmr.msra.gmra.mxu2 %vm1282_vm1, %v2499_v49  ;;  %v1090_v58 = vmax.f32 %v920_v54, 0.0 }
 0x282   :  { %v503_v55 = vpop.f32.mrf.mxu0  ;;  %2759 = vmatpush.bf16.msra.mxu2 %v5507_v24 }
 0x283   :  { %v1186_v63 = vpack.c.bf16 %v1090_v58, %v1090_v58  ;;  %v504_v43 = vadd.f32 %v6209_v12, %v503_v55  ;;  %v5504_v58 = vld [vmem:[%s7126_s5 + $0x340] sm:$0xff] }
 0x285   :  { %v2554_v14 = vunpack.c.l.b16 %v1186_v63  ;;  %v647_v15 = vmax.f32 %v504_v43, 0.0 }
 0x286   :  { %v921_v60 = vpop.f32.mrf.mxu1  ;;  %2760 = vmatpush.bf16.msra.mxu2 %v5506_v31 }
 0x287   :  { %v922_v62 = vadd.f32 %v6309_v46, %v921_v60 }
 0x289   :  { %v1091_v2 = vmax.f32 %v922_v62, 0.0 }
 0x28a   :  { %v505_v6 = vpop.f32.mrf.mxu0  ;;  %2761 = vmatpush.bf16.msra.mxu2 %v5505_v42 }
 0x28b   :  { %v1187_v8 = vpack.c.bf16 %v1091_v2, %v1091_v2  ;;  %v506_v13 = vadd.f32 %v6209_v12, %v505_v6 }
 0x28d   :  { %v2555_v16 = vunpack.c.l.b16 %v1187_v8  ;;  %v648_v17 = vmax.f32 %v506_v13, 0.0  ;;  %v6422_v13 = vpop.f32.mrf.mxu2 }
 0x28e   :  { %v924_v20 = vpop.f32.mrf.mxu1  ;;  %2762 = vmatpush.bf16.msra.mxu2 %v5504_v58 }
 0x28f   :  { %v6402_v22 = vpack.c.b16 %v2555_v16, %v2554_v14  ;;  %v711_v23 = vpack.c.bf16 %v648_v17, %v647_v15  ;;  %v925_v25 = vadd.f32 %v6309_v46, %v924_v20 }
 0x291   :  { %963 = vmatmul.bf16.gmra.mxu1 %v711_v23  ;;  %v1092_v34 = vmax.f32 %v925_v25, 0.0 }
 0x292   :  { %v508_v28 = vpop.f32.mrf.mxu0 }
 0x293   :  { %v1188_v45 = vpack.c.bf16 %v1092_v34, %v1092_v34  ;;  %v509_v48 = vadd.f32 %v6209_v12, %v508_v28 }
 0x295   :  { %v2611_v60 = vunpack.c.l.b16 %v1188_v45  ;;  %v649_v62 = vmax.f32 %v509_v48, 0.0 }
 0x296   :  { %v926_v35 = vpop.f32.mrf.mxu1 }
 0x297   :  { %v927_v30 = vadd.f32 %v6309_v46, %v926_v35 }
 0x299   :  { %v1093_v49 = vmax.f32 %v927_v30, 0.0 }
 0x29a   :  { %v510_v52 = vpop.f32.mrf.mxu0 }
 0x29b   :  { %v1189_v54 = vpack.c.bf16 %v1093_v49, %v1093_v49  ;;  %v511_v55 = vadd.f32 %v6209_v12, %v510_v52 }
 0x29d   :  { %v2612_v63 = vunpack.c.l.b16 %v1189_v54  ;;  %v650_v43 = vmax.f32 %v511_v55, 0.0  ;;  %v5515_v54 = vld [vmem:[%s7126_s5 + $0x398] sm:$0xff] }
 0x29e   :  { %v929_v2 = vpop.f32.mrf.mxu1 }
 0x29f   :  { %v2613_v6 = vpack.c.b16 %v2612_v63, %v2611_v60  ;;  %v712_v8 = vpack.c.bf16 %v650_v43, %v649_v62  ;;  %v930_v14 = vadd.f32 %v6309_v46, %v929_v2  ;;  %v5514_v60 = vld [vmem:[%s7126_s5 + $0x390] sm:$0xff]  ;;  %v5403_v63 = vld [vmem:[%s7126_s5 + $0x18] sm:$0xff]  ;;  %v6441_v2 = vpop.f32.mrf.mxu2 }
 0x2a0   :  { %1336 = vmatpush.bf16.msrb.mxu3 %v5403_v63 }
 0x2a1   :  { %968 = vmatmul.bf16.gmra.mxu1 %v712_v8  ;;  %4783 = vmatmul.msk.bf16.vlgmr.msrb.gmra.mxu2 %vm1282_vm1, %v2613_v6  ;;  %v1094_v16 = vmax.f32 %v930_v14, 0.0  ;;  %v5513_v8 = vld [vmem:[%s7126_s5 + $0x388] sm:$0xff] }
 0x2a2   :  { %v513_v15 = vpop.f32.mrf.mxu0  ;;  %2873 = vmatpush.bf16.msrb.mxu2 %v5515_v54 }
 0x2a3   :  { %v1190_v23 = vpack.c.bf16 %v1094_v16, %v1094_v16  ;;  %v514_v24 = vadd.f32 %v6209_v12, %v513_v15 }
 0x2a5   :  { %v2668_v35 = vunpack.c.l.b16 %v1190_v23  ;;  %v651_v30 = vmax.f32 %v514_v24, 0.0  ;;  %v5512_v24 = vld [vmem:[%s7126_s5 + $0x380] sm:$0xff] }
 0x2a6   :  { %v931_v17 = vpop.f32.mrf.mxu1  ;;  %2874 = vmatpush.bf16.msrb.mxu2 %v5514_v60 }
 0x2a7   :  { %v932_v20 = vadd.f32 %v6309_v46, %v931_v17 }
 0x2a9   :  { %v1095_v25 = vmax.f32 %v932_v20, 0.0 }
 0x2aa   :  { %v515_v28 = vpop.f32.mrf.mxu0  ;;  %2875 = vmatpush.bf16.msrb.mxu2 %v5513_v8 }
 0x2ab   :  { %v1191_v31 = vpack.c.bf16 %v1095_v25, %v1095_v25  ;;  %v516_v34 = vadd.f32 %v6209_v12, %v515_v28 }
 0x2ad   :  { %v2669_v42 = vunpack.c.l.b16 %v1191_v31  ;;  %v652_v45 = vmax.f32 %v516_v34, 0.0 }
 0x2ae   :  { %v934_v48 = vpop.f32.mrf.mxu1  ;;  %2876 = vmatpush.bf16.msrb.mxu2 %v5512_v24 }
 0x2af   :  { %v6429_v49 = vpack.c.b16 %v2669_v42, %v2668_v35  ;;  %v713_v52 = vpack.c.bf16 %v652_v45, %v651_v30  ;;  %v935_v55 = vadd.f32 %v6309_v46, %v934_v48  ;;  %v6452_v45 = vpop.f32.mrf.mxu2 }
 0x2b1   :  { %973 = vmatmul.bf16.gmra.mxu1 %v713_v52  ;;  %v1096_v62 = vmax.f32 %v935_v55, 0.0 }
 0x2b2   :  { %v518_v58 = vpop.f32.mrf.mxu0 }
 0x2b3   :  { %v1192_v14 = vpack.c.bf16 %v1096_v62, %v1096_v62  ;;  %v519_v15 = vadd.f32 %v6209_v12, %v518_v58 }
 0x2b5   :  { %v2725_v25 = vunpack.c.l.b16 %v1192_v14  ;;  %v653_v28 = vmax.f32 %v519_v15, 0.0 }
 0x2b6   :  { %v936_v43 = vpop.f32.mrf.mxu1 }
 0x2b7   :  { %v937_v6 = vadd.f32 %v6309_v46, %v936_v43 }
 0x2b9   :  { %v1097_v16 = vmax.f32 %v937_v6, 0.0 }
 0x2ba   :  { %v520_v17 = vpop.f32.mrf.mxu0 }
 0x2bb   :  { %v1193_v20 = vpack.c.bf16 %v1097_v16, %v1097_v16  ;;  %v521_v23 = vadd.f32 %v6209_v12, %v520_v17 }
 0x2bd   :  { %v2726_v31 = vunpack.c.l.b16 %v1193_v20  ;;  %v654_v34 = vmax.f32 %v521_v23, 0.0 }
 0x2be   :  { %v939_v35 = vpop.f32.mrf.mxu1 }
 0x2bf   :  { %v2727_v30 = vpack.c.b16 %v2726_v31, %v2725_v25  ;;  %v714_v42 = vpack.c.bf16 %v654_v34, %v653_v28  ;;  %v940_v48 = vadd.f32 %v6309_v46, %v939_v35  ;;  %v5523_v25 = vld [vmem:[%s7126_s5 + $0x3d8] sm:$0xff]  ;;  %v5522_v34 = vld [vmem:[%s7126_s5 + $0x3d0] sm:$0xff] }
 0x2c1   :  { %978 = vmatmul.bf16.gmra.mxu1 %v714_v42  ;;  %4833 = vmatmul.msk.bf16.vlgmr.msra.gmra.mxu2 %vm1282_vm1, %v2727_v30  ;;  %v1098_v54 = vmax.f32 %v940_v48, 0.0  ;;  %v6468_v42 = vpop.f32.mrf.mxu2 }
 0x2c2   :  { %v523_v52 = vpop.f32.mrf.mxu0  ;;  %2987 = vmatpush.bf16.msra.mxu2 %v5523_v25 }
 0x2c3   :  { %v1194_v60 = vpack.c.bf16 %v1098_v54, %v1098_v54  ;;  %v524_v62 = vadd.f32 %v6209_v12, %v523_v52  ;;  %v5521_v52 = vld [vmem:[%s7126_s5 + $0x3c8] sm:$0xff] }
 0x2c5   :  { %v2782_v14 = vunpack.c.l.b16 %v1194_v60  ;;  %v655_v15 = vmax.f32 %v524_v62, 0.0 }
 0x2c6   :  { %v941_v55 = vpop.f32.mrf.mxu1  ;;  %2988 = vmatpush.bf16.msra.mxu2 %v5522_v34 }
 0x2c7   :  { %v942_v58 = vadd.f32 %v6309_v46, %v941_v55 }
 0x2c9   :  { %v1099_v63 = vmax.f32 %v942_v58, 0.0 }
 0x2ca   :  { %v525_v43 = vpop.f32.mrf.mxu0  ;;  %2989 = vmatpush.bf16.msra.mxu2 %v5521_v52 }
 0x2cb   :  { %v1195_v6 = vpack.c.bf16 %v1099_v63, %v1099_v63  ;;  %v526_v8 = vadd.f32 %v6209_v12, %v525_v43  ;;  %v5520_v43 = vld [vmem:[%s7126_s5 + $0x3c0] sm:$0xff] }
 0x2cd   :  { %v2783_v16 = vunpack.c.l.b16 %v1195_v6  ;;  %v656_v17 = vmax.f32 %v526_v8, 0.0 }
 0x2ce   :  { %v944_v20 = vpop.f32.mrf.mxu1  ;;  %2990 = vmatpush.bf16.msra.mxu2 %v5520_v43 }
 0x2cf   :  { %v6459_v23 = vpack.c.b16 %v2783_v16, %v2782_v14  ;;  %v715_v24 = vpack.c.bf16 %v656_v17, %v655_v15  ;;  %v945_v28 = vadd.f32 %v6309_v46, %v944_v20 }
 0x2d1   :  { %983 = vmatmul.bf16.vlgmr.msra.gmra.mxu3 %v715_v24  ;;  %v1100_v35 = vmax.f32 %v945_v28, 0.0  ;;  %v6479_v24 = vpop.f32.mrf.mxu2 }
 0x2d2   :  { %v528_v31 = vpop.f32.mrf.mxu0 }
 0x2d3   :  { %v1196_v54 = vpack.c.bf16 %v1100_v35, %v1100_v35  ;;  %v529_v55 = vadd.f32 %v6209_v12, %v528_v31  ;;  %v5402_v31 = vld [vmem:[%s7126_s5 + $0x10] sm:$0xff]  ;;  %v534_v35 = vadd.f32 %v6209_v12, %v6019_v10  ;;  %v5531_v10 = vld [vmem:[%s7126_s5 + $0x418] sm:$0xff] }
 0x2d4   :  { %1337 = vmatpush.bf16.msrb.mxu3 %v5402_v31  ;;  %v5529_v31 = vld [vmem:[%s7126_s5 + $0x408] sm:$0xff] }
 0x2d5   :  { %v2839_v6 = vunpack.c.l.b16 %v1196_v54  ;;  %v657_v8 = vmax.f32 %v529_v55, 0.0  ;;  %v659_v55 = vmax.f32 %v534_v35, 0.0 }
 0x2d6   :  { %v946_v30 = vpop.f32.mrf.mxu1 }
 0x2d7   :  { %v947_v48 = vadd.f32 %v6309_v46, %v946_v30  ;;  %v536_v30 = vadd.f32 %v6209_v12, %v6036_v29 }
 0x2d9   :  { %v1101_v58 = vmax.f32 %v947_v48, 0.0 }
 0x2da   :  { %v530_v60 = vpop.f32.mrf.mxu0 }
 0x2db   :  { %v1197_v62 = vpack.c.bf16 %v1101_v58, %v1101_v58  ;;  %v531_v63 = vadd.f32 %v6209_v12, %v530_v60  ;;  %v660_v58 = vmax.f32 %v536_v30, 0.0 }
 0x2dd   :  { %v2840_v14 = vunpack.c.l.b16 %v1197_v62  ;;  %v658_v15 = vmax.f32 %v531_v63, 0.0 }
 0x2de   :  { %v949_v16 = vpop.f32.mrf.mxu1 }
 0x2df   :  { %v2841_v17 = vpack.c.b16 %v2840_v14, %v2839_v6  ;;  %v716_v20 = vpack.c.bf16 %v658_v15, %v657_v8  ;;  %v950_v25 = vadd.f32 %v6309_v46, %v949_v16  ;;  %v717_v8 = vpack.c.bf16 %v660_v58, %v659_v55  ;;  %v5530_v14 = vld [vmem:[%s7126_s5 + $0x410] sm:$0xff] }
 0x2e1   :  { %988 = vmatmul.bf16.gmra.mxu3 %v716_v20  ;;  %4883 = vmatmul.msk.bf16.vlgmr.msrb.gmra.mxu2 %vm1282_vm1, %v2841_v17  ;;  %v1102_v28 = vmax.f32 %v950_v25, 0.0  ;;  %v539_v17 = vadd.f32 %v6209_v12, %v6060_v61  ;;  %v541_v20 = vadd.f32 %v6209_v12, %v6077_v18  ;;  %v6504_v25 = vpop.f32.mrf.mxu2  ;;  %v5528_v61 = vld [vmem:[%s7126_s5 + $0x400] sm:$0xff] }
 0x2e2   :  { %3101 = vmatpush.bf16.msrb.mxu2 %v5531_v10  ;;  %v544_v10 = vadd.f32 %v6209_v12, %v6101_v50  ;;  %v5539_v50 = vld [vmem:[%s7126_s5 + $0x458] sm:$0xff] }
 0x2e3   :  { %v1198_v52 = vpack.c.bf16 %v1102_v28, %v1102_v28  ;;  %v661_v30 = vmax.f32 %v539_v17, 0.0 }
 0x2e4   :  { %v663_v17 = vmax.f32 %v544_v10, 0.0 }
 0x2e5   :  { %v2896_v62 = vunpack.c.l.b16 %v1198_v52 }
 0x2e6   :  { %v951_v34 = vpop.f32.mrf.mxu1  ;;  %3102 = vmatpush.bf16.msrb.mxu2 %v5530_v14 }
 0x2e7   :  { %v952_v48 = vadd.f32 %v6309_v46, %v951_v34 }
 0x2e9   :  { %v1103_v54 = vmax.f32 %v952_v48, 0.0  ;;  %v662_v48 = vmax.f32 %v541_v20, 0.0 }
 0x2ea   :  { %3103 = vmatpush.bf16.msrb.mxu2 %v5529_v31 }
 0x2eb   :  { %v1199_v60 = vpack.c.bf16 %v1103_v54, %v1103_v54 }
 0x2ed   :  { %v2897_v63 = vunpack.c.l.b16 %v1199_v60  ;;  %v718_v60 = vpack.c.bf16 %v662_v48, %v661_v30 }
 0x2ee   :  { %v954_v43 = vpop.f32.mrf.mxu1  ;;  %3104 = vmatpush.bf16.msrb.mxu2 %v5528_v61 }
 0x2ef   :  { %v6491_v6 = vpack.c.b16 %v2897_v63, %v2896_v62  ;;  %v955_v29 = vadd.f32 %v6309_v46, %v954_v43  ;;  %v6513_v62 = vpop.f32.mrf.mxu2 }
 0x2f1   :  { %993 = vmatmul.bf16.gmra.mxu3 %v717_v8  ;;  %v1104_v15 = vmax.f32 %v955_v29, 0.0  ;;  %v546_v29 = vadd.f32 %v6209_v12, %v6118_v9  ;;  %v5538_v9 = vld [vmem:[%s7126_s5 + $0x450] sm:$0xff] }
 0x2f3   :  { %v1200_v34 = vpack.c.bf16 %v1104_v15, %v1104_v15  ;;  %v664_v20 = vmax.f32 %v546_v29, 0.0 }
 0x2f5   :  { %v2953_v54 = vunpack.c.l.b16 %v1200_v34  ;;  %v719_v48 = vpack.c.bf16 %v664_v20, %v663_v17 }
 0x2f6   :  { %v956_v16 = vpop.f32.mrf.mxu1 }
 0x2f7   :  { %v957_v28 = vadd.f32 %v6309_v46, %v956_v16 }
 0x2f9   :  { %v1105_v35 = vmax.f32 %v957_v28, 0.0 }
 0x2fb   :  { %v1201_v52 = vpack.c.bf16 %v1105_v35, %v1105_v35 }
 0x2fd   :  { %v2954_v18 = vunpack.c.l.b16 %v1201_v52 }
 0x2fe   :  { %v959_v55 = vpop.f32.mrf.mxu1 }
 0x2ff   :  { %v2955_v58 = vpack.c.b16 %v2954_v18, %v2953_v54  ;;  %v960_v63 = vadd.f32 %v6309_v46, %v959_v55  ;;  %v5401_v54 = vld [vmem:[%s7126_s5 + $0x8] sm:$0xff]  ;;  %v549_v55 = vadd.f32 %v6209_v12, %v6142_v44  ;;  %v5536_v44 = vld [vmem:[%s7126_s5 + $0x440] sm:$0xff] }
 0x300   :  { %1338 = vmatpush.bf16.msrb.mxu3 %v5401_v54 }
 0x301   :  { %998 = vmatmul.bf16.gmra.mxu3 %v718_v60  ;;  %4933 = vmatmul.msk.bf16.vlgmr.msra.gmra.mxu2 %vm1282_vm1, %v2955_v58  ;;  %v1106_v43 = vmax.f32 %v960_v63, 0.0  ;;  %v551_v58 = vadd.f32 %v6209_v12, %v6159_v4  ;;  %v6538_v60 = vpop.f32.mrf.mxu2  ;;  %v665_v29 = vmax.f32 %v549_v55, 0.0 }
 0x302   :  { %3215 = vmatpush.bf16.msra.mxu2 %v5539_v50 }
 0x303   :  { %v1202_v15 = vpack.c.bf16 %v1106_v43, %v1106_v43  ;;  %v5537_v43 = vld [vmem:[%s7126_s5 + $0x448] sm:$0xff] }
 0x305   :  { %v3010_v31 = vunpack.c.l.b16 %v1202_v15 }
 0x306   :  { %v961_v8 = vpop.f32.mrf.mxu1  ;;  %3216 = vmatpush.bf16.msra.mxu2 %v5538_v9 }
 0x307   :  { %v962_v14 = vadd.f32 %v6309_v46, %v961_v8 }
 0x309   :  { %v1107_v16 = vmax.f32 %v962_v14, 0.0  ;;  %v666_v14 = vmax.f32 %v551_v58, 0.0 }
 0x30a   :  { %3217 = vmatpush.bf16.msra.mxu2 %v5537_v43 }
 0x30b   :  { %v1203_v28 = vpack.c.bf16 %v1107_v16, %v1107_v16  ;;  %v720_v20 = vpack.c.bf16 %v666_v14, %v665_v29 }
 0x30d   :  { %v3011_v34 = vunpack.c.l.b16 %v1203_v28  ;;  %v6547_v28 = vpop.f32.mrf.mxu2 }
 0x30e   :  { %v964_v35 = vpop.f32.mrf.mxu1  ;;  %3218 = vmatpush.bf16.msra.mxu2 %v5536_v44 }
 0x30f   :  { %v6522_v30 = vpack.c.b16 %v3011_v34, %v3010_v31  ;;  %v965_v52 = vadd.f32 %v6309_v46, %v964_v35 }
 0x311   :  { %1003 = vmatmul.bf16.gmra.mxu3 %v719_v48  ;;  %v1108_v61 = vmax.f32 %v965_v52, 0.0  ;;  %v6554_v48 = vld [vmem:[%s7123_s2] ss:$0 sm:$0xff] }
 0x312   :  { %v554_v50 = vadd.f32 %v6554_v48, %v6183_v39  ;;  %v556_v52 = vadd.f32 %v6554_v48, %v6200_v0  ;;  %v5547_v0 = vld [vmem:[%s7126_s5 + $0x498] sm:$0xff]  ;;  %v559_v44 = vadd.f32 %v6554_v48, %v6229_v41 }
 0x313   :  { %v1204_v8 = vpack.c.bf16 %v1108_v61, %v1108_v61 }
 0x314   :  { %v668_v55 = vmax.f32 %v556_v52, 0.0 }
 0x315   :  { %v3067_v4 = vunpack.c.l.b16 %v1204_v8 }
 0x316   :  { %v966_v18 = vpop.f32.mrf.mxu1 }
 0x317   :  { %v967_v63 = vadd.f32 %v6309_v46, %v966_v18  ;;  %v667_v18 = vmax.f32 %v554_v50, 0.0 }
 0x319   :  { %v1109_v10 = vmax.f32 %v967_v63, 0.0  ;;  %v721_v29 = vpack.c.bf16 %v668_v55, %v667_v18  ;;  %v5544_v18 = vld [vmem:[%s7126_s5 + $0x480] sm:$0xff] }
 0x31a   :  { %v5400_v55 = vld [vmem:[%s7126_s5] sm:$0xff] }
 0x31b   :  { %v1205_v15 = vpack.c.bf16 %v1109_v10, %v1109_v10  ;;  %1339 = vmatpush.bf16.msrb.mxu3 %v5400_v55  ;;  %v576_v55 = vadd.f32 %v6554_v48, %v6368_v36 }
 0x31d   :  { %v3068_v12 = vunpack.c.l.b16 %v1205_v15 }
 0x31e   :  { %v969_v16 = vpop.f32.mrf.mxu1 }
 0x31f   :  { %v3069_v17 = vpack.c.b16 %v3068_v12, %v3067_v4  ;;  %v970_v31 = vadd.f32 %v6309_v46, %v969_v16  ;;  %v561_v4 = vadd.f32 %v6554_v48, %v6246_v3  ;;  %v6571_v12 = vpop.f32.mrf.mxu2  ;;  %v5545_v3 = vld [vmem:[%s7126_s5 + $0x488] sm:$0xff] }
 0x321   :  { %1008 = vmatmul.bf16.gmra.mxu3 %v720_v20  ;;  %4983 = vmatmul.msk.bf16.vlgmr.msrb.gmra.mxu2 %vm1282_vm1, %v3069_v17  ;;  %v1110_v34 = vmax.f32 %v970_v31, 0.0  ;;  %v5546_v31 = vld [vmem:[%s7126_s5 + $0x490] sm:$0xff] }
 0x322   :  { %3329 = vmatpush.bf16.msrb.mxu2 %v5547_v0  ;;  %v571_v0 = vadd.f32 %v6554_v48, %v6333_v21 }
 0x323   :  { %v1206_v61 = vpack.c.bf16 %v1110_v34, %v1110_v34  ;;  %v669_v34 = vmax.f32 %v559_v44, 0.0 }
 0x325   :  { %v3124_v63 = vunpack.c.l.b16 %v1206_v61 }
 0x326   :  { %v971_v35 = vpop.f32.mrf.mxu1  ;;  %3330 = vmatpush.bf16.msrb.mxu2 %v5546_v31 }
 0x327   :  { %v972_v9 = vadd.f32 %v6309_v46, %v971_v35  ;;  %v670_v35 = vmax.f32 %v561_v4, 0.0  ;;  %v674_v4 = vmax.f32 %v571_v0, 0.0 }
 0x329   :  { %v1111_v54 = vmax.f32 %v972_v9, 0.0  ;;  %v722_v61 = vpack.c.bf16 %v670_v35, %v669_v34 }
 0x32a   :  { %3331 = vmatpush.bf16.msrb.mxu2 %v5545_v3 }
 0x32b   :  { %v1207_v58 = vpack.c.bf16 %v1111_v54, %v1111_v54  ;;  %v6580_v54 = vpop.f32.mrf.mxu2 }
 0x32d   :  { %v3125_v43 = vunpack.c.l.b16 %v1207_v58  ;;  %v564_v58 = vadd.f32 %v6554_v48, %v6270_v47 }
 0x32e   :  { %v974_v8 = vpop.f32.mrf.mxu1  ;;  %3332 = vmatpush.bf16.msrb.mxu2 %v5544_v18  ;;  %v574_v18 = vadd.f32 %v6554_v48, %v6357_v7  ;;  %v5415_v7 = vld [vmem:[%s7126_s5 + $0x78] sm:$0xff] }
 0x32f   :  { %v6561_v10 = vpack.c.b16 %v3125_v43, %v3124_v63  ;;  %v975_v14 = vadd.f32 %v6309_v46, %v974_v8  ;;  %v566_v63 = vadd.f32 %v6554_v48, %v6287_v11  ;;  %v671_v43 = vmax.f32 %v564_v58, 0.0  ;;  %v5554_v11 = vld [vmem:[%s7126_s5 + $0x4d0] sm:$0xff]  ;;  %1448 = vmatpush.bf16.msra.mxu3 %v5415_v7 }
 0x331   :  { %1013 = vmatmul.bf16.gmra.mxu3 %v721_v29  ;;  %v1112_v39 = vmax.f32 %v975_v14, 0.0  ;;  %v672_v8 = vmax.f32 %v566_v63, 0.0 }
 0x333   :  { %v1208_v17 = vpack.c.bf16 %v1112_v39, %v1112_v39  ;;  %v723_v29 = vpack.c.bf16 %v672_v8, %v671_v43  ;;  %v5555_v39 = vld [vmem:[%s7126_s5 + $0x4d8] sm:$0xff]  ;;  %v675_v43 = vmax.f32 %v574_v18, 0.0  ;;  %v676_v8 = vmax.f32 %v576_v55, 0.0 }
 0x335   :  { %v3181_v52 = vunpack.c.l.b16 %v1208_v17 }
 0x336   :  { %v976_v15 = vpop.f32.mrf.mxu1 }
 0x337   :  { %v977_v16 = vadd.f32 %v6309_v46, %v976_v15  ;;  %v569_v15 = vadd.f32 %v6554_v48, %v6316_v56  ;;  %v5553_v56 = vld [vmem:[%s7126_s5 + $0x4c8] sm:$0xff] }
 0x339   :  { %v1113_v20 = vmax.f32 %v977_v16, 0.0  ;;  %v673_v44 = vmax.f32 %v569_v15, 0.0 }
 0x33b   :  { %v1209_v50 = vpack.c.bf16 %v1113_v20, %v1113_v20  ;;  %v6604_v20 = vpop.f32.mrf.mxu2  ;;  %v724_v35 = vpack.c.bf16 %v674_v4, %v673_v44 }
 0x33d   :  { %v3182_v41 = vunpack.c.l.b16 %v1209_v50 }
 0x33f   :  { %v3183_v9 = vpack.c.b16 %v3182_v41, %v3181_v52  ;;  %v5552_v52 = vld [vmem:[%s7126_s5 + $0x4c0] sm:$0xff] }
 0x341   :  { %1018 = vmatmul.bf16.gmra.mxu3 %v722_v61  ;;  %5033 = vmatmul.msk.bf16.vlgmr.msra.gmra.mxu2 %vm1282_vm1, %v3183_v9 }
 0x342   :  { %3443 = vmatpush.bf16.msra.mxu2 %v5555_v39 }
 0x343   :  { %v6617_v58 = vpop.f32.mrf.mxu2 }
 0x346   :  { %3444 = vmatpush.bf16.msra.mxu2 %v5554_v11 }
 0x34a   :  { %3445 = vmatpush.bf16.msra.mxu2 %v5553_v56  ;;  %v579_v56 = vadd.f32 %v6554_v48, %v6384_v19  ;;  %v5412_v19 = vld [vmem:[%s7126_s5 + $0x60] sm:$0xff] }
 0x34e   :  { %3446 = vmatpush.bf16.msra.mxu2 %v5552_v52  ;;  %v677_v52 = vmax.f32 %v579_v56, 0.0  ;;  %v5422_v56 = vld [vmem:[%s7126_s5 + $0xb0] sm:$0xff] }
 0x351   :  { %1023 = vmatmul.bf16.gmra.mxu3 %v723_v29 }
 0x354   :  { %v984_v14 = vpop.f32.mrf.mxu3 }
 0x355   :  { %v985_v47 = vadd.f32 %v6309_v46, %v984_v14 }
 0x357   :  { %v1116_v16 = vmax.f32 %v985_v47, 0.0  ;;  %v725_v47 = vpack.c.bf16 %v676_v8, %v675_v43  ;;  %v5560_v8 = vld [vmem:[%s7126_s5 + $0x500] sm:$0xff] }
 0x359   :  { %v1212_v21 = vpack.c.bf16 %v1116_v16, %v1116_v16  ;;  %v5414_v16 = vld [vmem:[%s7126_s5 + $0x70] sm:$0xff] }
 0x35a   :  { %1449 = vmatpush.bf16.msra.mxu3 %v5414_v16 }
 0x35b   :  { %v3295_v41 = vunpack.c.l.b16 %v1212_v21  ;;  %v581_v21 = vadd.f32 %v6554_v48, %v6395_v53  ;;  %v6647_v53 = vpop.f32.mrf.mxu2 }
 0x35c   :  { %v986_v17 = vpop.f32.mrf.mxu3 }
 0x35d   :  { %v987_v31 = vadd.f32 %v6309_v46, %v986_v17 }
 0x35f   :  { %v1117_v34 = vmax.f32 %v987_v31, 0.0  ;;  %v5563_v31 = vld [vmem:[%s7126_s5 + $0x518] sm:$0xff] }
 0x361   :  { %v1213_v50 = vpack.c.bf16 %v1117_v34, %v1117_v34  ;;  %1028 = vmatmul.bf16.gmra.mxu3 %v724_v35  ;;  %v5413_v35 = vld [vmem:[%s7126_s5 + $0x68] sm:$0xff] }
 0x362   :  { %1450 = vmatpush.bf16.msra.mxu3 %v5413_v35 }
 0x363   :  { %v3296_v3 = vunpack.c.l.b16 %v1213_v50  ;;  %v5562_v50 = vld [vmem:[%s7126_s5 + $0x510] sm:$0xff] }
 0x364   :  { %v989_v9 = vpop.f32.mrf.mxu3 }
 0x365   :  { %v3297_v61 = vpack.c.b16 %v3296_v3, %v3295_v41  ;;  %v990_v63 = vadd.f32 %v6309_v46, %v989_v9  ;;  %v678_v41 = vmax.f32 %v581_v21, 0.0 }
 0x366   :  { %1451 = vmatpush.bf16.msra.mxu3 %v5412_v19 }
 0x367   :  { %5083 = vmatmul.msk.bf16.vlgmr.msrb.gmra.mxu2 %vm1282_vm1, %v3297_v61  ;;  %v1118_v29 = vmax.f32 %v990_v63, 0.0  ;;  %v5561_v61 = vld [vmem:[%s7126_s5 + $0x508] sm:$0xff]  ;;  %v726_v63 = vpack.c.bf16 %v678_v41, %v677_v52  ;;  %v5571_v41 = vld [vmem:[%s7126_s5 + $0x558] sm:$0xff] }
 0x368   :  { %3557 = vmatpush.bf16.msrb.mxu2 %v5563_v31  ;;  %v5421_v52 = vld [vmem:[%s7126_s5 + $0xa8] sm:$0xff] }
 0x369   :  { %v1214_v15 = vpack.c.bf16 %v1118_v29, %v1118_v29 }
 0x36b   :  { %v3352_v11 = vunpack.c.l.b16 %v1214_v15  ;;  %v6656_v15 = vpop.f32.mrf.mxu2 }
 0x36c   :  { %v991_v14 = vpop.f32.mrf.mxu3  ;;  %3558 = vmatpush.bf16.msrb.mxu2 %v5562_v50 }
 0x36d   :  { %v992_v39 = vadd.f32 %v6309_v46, %v991_v14 }
 0x36f   :  { %v1119_v0 = vmax.f32 %v992_v39, 0.0 }
 0x370   :  { %3559 = vmatpush.bf16.msrb.mxu2 %v5561_v61 }
 0x371   :  { %v1215_v36 = vpack.c.bf16 %v1119_v0, %v1119_v0  ;;  %1033 = vmatmul.bf16.gmra.mxu3 %v725_v47  ;;  %v6661_v0 = vld [vmem:[%s7125_s4] ss:$0 sm:$0xff] }
 0x373   :  { %v3353_v44 = vunpack.c.l.b16 %v1215_v36  ;;  %v6689_v61 = vpop.f32.mrf.mxu2 }
 0x374   :  { %v994_v4 = vpop.f32.mrf.mxu3  ;;  %3560 = vmatpush.bf16.msrb.mxu2 %v5560_v8 }
 0x375   :  { %v6628_v17 = vpack.c.b16 %v3353_v44, %v3352_v11  ;;  %v995_v34 = vadd.f32 %v6309_v46, %v994_v4  ;;  %v5423_v44 = vld [vmem:[%s7126_s5 + $0xb8] sm:$0xff] }
 0x377   :  { %v1120_v3 = vmax.f32 %v995_v34, 0.0 }
 0x379   :  { %v1216_v18 = vpack.c.bf16 %v1120_v3, %v1120_v3  ;;  %v5420_v3 = vld [vmem:[%s7126_s5 + $0xa0] sm:$0xff] }
 0x37b   :  { %v3409_v29 = vunpack.c.l.b16 %v1216_v18 }
 0x37c   :  { %v996_v9 = vpop.f32.mrf.mxu3 }
 0x37d   :  { %v997_v48 = vadd.f32 %v6309_v46, %v996_v9  ;;  %v5570_v9 = vld [vmem:[%s7126_s5 + $0x550] sm:$0xff] }
 0x37f   :  { %v1121_v55 = vmax.f32 %v997_v48, 0.0 }
 0x381   :  { %v1217_v43 = vpack.c.bf16 %v1121_v55, %v1121_v55  ;;  %1038 = vmatmul.bf16.gmra.mxu3 %v726_v63  ;;  %v5431_v55 = vld [vmem:[%s7126_s5 + $0xf8] sm:$0xff]  ;;  %v5569_v63 = vld [vmem:[%s7126_s5 + $0x548] sm:$0xff] }
 0x383   :  { %v3410_v14 = vunpack.c.l.b16 %v1217_v43 }
 0x384   :  { %v999_v39 = vpop.f32.mrf.mxu3 }
 0x385   :  { %v3411_v46 = vpack.c.b16 %v3410_v14, %v3409_v29  ;;  %v1000_v47 = vadd.f32 %v6661_v0, %v999_v39  ;;  %v5430_v14 = vld [vmem:[%s7126_s5 + $0xf0] sm:$0xff]  ;;  %v5568_v39 = vld [vmem:[%s7126_s5 + $0x540] sm:$0xff] }
 0x387   :  { %5133 = vmatmul.msk.bf16.vlgmr.msra.gmra.mxu2 %vm1282_vm1, %v3411_v46  ;;  %v1122_v7 = vmax.f32 %v1000_v47, 0.0 }
 0x388   :  { %3671 = vmatpush.bf16.msra.mxu2 %v5571_v41  ;;  %v5438_v41 = vld [vmem:[%s7126_s5 + $0x130] sm:$0xff] }
 0x389   :  { %v1218_v4 = vpack.c.bf16 %v1122_v7, %v1122_v7 }
 0x38b   :  { %v3466_v21 = vunpack.c.l.b16 %v1218_v4  ;;  %v5428_v4 = vld [vmem:[%s7126_s5 + $0xe0] sm:$0xff] }
 0x38c   :  { %v1001_v36 = vpop.f32.mrf.mxu3  ;;  %3672 = vmatpush.bf16.msra.mxu2 %v5570_v9 }
 0x38d   :  { %v1002_v11 = vadd.f32 %v6661_v0, %v1001_v36 }
 0x38f   :  { %v1123_v16 = vmax.f32 %v1002_v11, 0.0  ;;  %v5429_v11 = vld [vmem:[%s7126_s5 + $0xe8] sm:$0xff] }
 0x390   :  { %3673 = vmatpush.bf16.msra.mxu2 %v5569_v63  ;;  %v5578_v63 = vld [vmem:[%s7126_s5 + $0x590] sm:$0xff] }
 0x391   :  { %v1219_v31 = vpack.c.bf16 %v1123_v16, %v1123_v16  ;;  %4208 = vmatmul.msk.bf16.vlgmr.msrb.gmra.mxu3 %vm1282_vm1, %v5960_v59 }
 0x392   :  { %1562 = vmatpush.bf16.msrb.mxu3 %v5423_v44 }
 0x393   :  { %v3467_v34 = vunpack.c.l.b16 %v1219_v31 }
 0x394   :  { %v1004_v35 = vpop.f32.mrf.mxu3  ;;  %3674 = vmatpush.bf16.msra.mxu2 %v5568_v39  ;;  %v5447_v39 = vld [vmem:[%s7126_s5 + $0x178] sm:$0xff] }
 0x395   :  { %v6674_v50 = vpack.c.b16 %v3467_v34, %v3466_v21  ;;  %v1005_v59 = vadd.f32 %v6661_v0, %v1004_v35  ;;  %v5439_v21 = vld [vmem:[%s7126_s5 + $0x138] sm:$0xff] }
 0x396   :  { %1563 = vmatpush.bf16.msrb.mxu3 %v5422_v56 }
 0x397   :  { %v1124_v19 = vmax.f32 %v1005_v59, 0.0 }
 0x399   :  { %v1220_v43 = vpack.c.bf16 %v1124_v19, %v1124_v19 }
 0x39a   :  { %1564 = vmatpush.bf16.msrb.mxu3 %v5421_v52 }
 0x39b   :  { %v3523_v46 = vunpack.c.l.b16 %v1220_v43 }
 0x39c   :  { %v1006_v48 = vpop.f32.mrf.mxu3 }
 0x39d   :  { %v1007_v18 = vadd.f32 %v6661_v0, %v1006_v48  ;;  %v5437_v48 = vld [vmem:[%s7126_s5 + $0x128] sm:$0xff] }
 0x39e   :  { %1565 = vmatpush.bf16.msrb.mxu3 %v5420_v3 }
 0x39f   :  { %v1125_v8 = vmax.f32 %v1007_v18, 0.0  ;;  %v5579_v18 = vld [vmem:[%s7126_s5 + $0x598] sm:$0xff] }
 0x3a1   :  { %v1221_v29 = vpack.c.bf16 %v1125_v8, %v1125_v8  ;;  %4258 = vmatmul.msk.bf16.vlgmr.msra.gmra.mxu3 %vm1282_vm1, %v6009_v1  ;;  %v6709_v1 = vpop.f32.mrf.mxu2 }
 0x3a2   :  { %1676 = vmatpush.bf16.msra.mxu3 %v5431_v55  ;;  %v5436_v55 = vld [vmem:[%s7126_s5 + $0x120] sm:$0xff] }
 0x3a3   :  { %v3524_v47 = vunpack.c.l.b16 %v1221_v29 }
 0x3a4   :  { %v1009_v7 = vpop.f32.mrf.mxu3 }
 0x3a5   :  { %v3525_v36 = vpack.c.b16 %v3524_v47, %v3523_v46  ;;  %v1010_v44 = vadd.f32 %v6661_v0, %v1009_v7  ;;  %v5577_v46 = vld [vmem:[%s7126_s5 + $0x588] sm:$0xff] }
 0x3a6   :  { %1677 = vmatpush.bf16.msra.mxu3 %v5430_v14 }
 0x3a7   :  { %5183 = vmatmul.msk.bf16.vlgmr.msrb.gmra.mxu2 %vm1282_vm1, %v3525_v36  ;;  %v1126_v16 = vmax.f32 %v1010_v44, 0.0  ;;  %v5576_v44 = vld [vmem:[%s7126_s5 + $0x580] sm:$0xff] }
 0x3a8   :  { %3785 = vmatpush.bf16.msrb.mxu2 %v5579_v18 }
 0x3a9   :  { %v1222_v34 = vpack.c.bf16 %v1126_v16, %v1126_v16  ;;  %v6740_v29 = vpop.f32.mrf.mxu2 }
 0x3aa   :  { %1678 = vmatpush.bf16.msra.mxu3 %v5429_v11  ;;  %v5446_v11 = vld [vmem:[%s7126_s5 + $0x170] sm:$0xff] }
 0x3ab   :  { %v3580_v59 = vunpack.c.l.b16 %v1222_v34 }
 0x3ac   :  { %v1011_v31 = vpop.f32.mrf.mxu3  ;;  %3786 = vmatpush.bf16.msrb.mxu2 %v5578_v63 }
 0x3ad   :  { %v1012_v56 = vadd.f32 %v6661_v0, %v1011_v31 }
 0x3ae   :  { %1679 = vmatpush.bf16.msra.mxu3 %v5428_v4 }
 0x3af   :  { %v1127_v35 = vmax.f32 %v1012_v56, 0.0 }
 0x3b0   :  { %3787 = vmatpush.bf16.msrb.mxu2 %v5577_v46  ;;  %v5452_v46 = vld [vmem:[%s7126_s5 + $0x1a0] sm:$0xff] }
 0x3b1   :  { %v1223_v52 = vpack.c.bf16 %v1127_v35, %v1127_v35  ;;  %4308 = vmatmul.msk.bf16.vlgmr.msrb.gmra.mxu3 %vm1282_vm1, %v6050_v51  ;;  %v5444_v35 = vld [vmem:[%s7126_s5 + $0x160] sm:$0xff] }
 0x3b2   :  { %1790 = vmatpush.bf16.msrb.mxu3 %v5439_v21  ;;  %v5445_v21 = vld [vmem:[%s7126_s5 + $0x168] sm:$0xff] }
 0x3b3   :  { %v3581_v3 = vunpack.c.l.b16 %v1223_v52 }
 0x3b4   :  { %v1014_v9 = vpop.f32.mrf.mxu3  ;;  %3788 = vmatpush.bf16.msrb.mxu2 %v5576_v44 }
 0x3b5   :  { %v6725_v19 = vpack.c.b16 %v3581_v3, %v3580_v59  ;;  %v1015_v51 = vadd.f32 %v6661_v0, %v1014_v9  ;;  %v5455_v3 = vld [vmem:[%s7126_s5 + $0x1b8] sm:$0xff] }
 0x3b6   :  { %1791 = vmatpush.bf16.msrb.mxu3 %v5438_v41 }
 0x3b7   :  { %v1128_v43 = vmax.f32 %v1015_v51, 0.0  ;;  %v5454_v51 = vld [vmem:[%s7126_s5 + $0x1b0] sm:$0xff] }
 0x3b9   :  { %v1224_v47 = vpack.c.bf16 %v1128_v43, %v1128_v43 }
 0x3ba   :  { %1792 = vmatpush.bf16.msrb.mxu3 %v5437_v48 }
 0x3bb   :  { %v3637_v4 = vunpack.c.l.b16 %v1224_v47  ;;  %v5586_v47 = vld [vmem:[%s7126_s5 + $0x5d0] sm:$0xff] }
 0x3bc   :  { %v1016_v8 = vpop.f32.mrf.mxu3 }
 0x3bd   :  { %v1017_v14 = vadd.f32 %v6661_v0, %v1016_v8 }
 0x3be   :  { %1793 = vmatpush.bf16.msrb.mxu3 %v5436_v55 }
 0x3bf   :  { %v1129_v7 = vmax.f32 %v1017_v14, 0.0  ;;  %v5453_v14 = vld [vmem:[%s7126_s5 + $0x1a8] sm:$0xff] }
 0x3c1   :  { %v1225_v36 = vpack.c.bf16 %v1129_v7, %v1129_v7  ;;  %4358 = vmatmul.msk.bf16.vlgmr.msra.gmra.mxu3 %vm1282_vm1, %v6091_v40  ;;  %v6760_v40 = vpop.f32.mrf.mxu2 }
 0x3c2   :  { %1904 = vmatpush.bf16.msra.mxu3 %v5447_v39  ;;  %v5587_v39 = vld [vmem:[%s7126_s5 + $0x5d8] sm:$0xff] }
 0x3c3   :  { %v3638_v16 = vunpack.c.l.b16 %v1225_v36 }
 0x3c4   :  { %v1019_v31 = vpop.f32.mrf.mxu3 }
 0x3c5   :  { %v3639_v56 = vpack.c.b16 %v3638_v16, %v3637_v4  ;;  %v1020_v34 = vadd.f32 %v6661_v0, %v1019_v31  ;;  %v5463_v4 = vld [vmem:[%s7126_s5 + $0x1f8] sm:$0xff]  ;;  %v5585_v16 = vld [vmem:[%s7126_s5 + $0x5c8] sm:$0xff] }
 0x3c6   :  { %1905 = vmatpush.bf16.msra.mxu3 %v5446_v11 }
 0x3c7   :  { %5233 = vmatmul.msk.bf16.vlgmr.msra.gmra.mxu2 %vm1282_vm1, %v3639_v56  ;;  %v1130_v52 = vmax.f32 %v1020_v34, 0.0  ;;  %v5462_v34 = vld [vmem:[%s7126_s5 + $0x1f0] sm:$0xff] }
 0x3c8   :  { %3899 = vmatpush.bf16.msra.mxu2 %v5587_v39 }
 0x3c9   :  { %v1226_v9 = vpack.c.bf16 %v1130_v52, %v1130_v52  ;;  %v6791_v11 = vpop.f32.mrf.mxu2 }
 0x3ca   :  { %1906 = vmatpush.bf16.msra.mxu3 %v5445_v21 }
 0x3cb   :  { %v3694_v55 = vunpack.c.l.b16 %v1226_v9  ;;  %v5461_v9 = vld [vmem:[%s7126_s5 + $0x1e8] sm:$0xff] }
 0x3cc   :  { %v1021_v41 = vpop.f32.mrf.mxu3  ;;  %3900 = vmatpush.bf16.msra.mxu2 %v5586_v47 }
 0x3cd   :  { %v1022_v59 = vadd.f32 %v6661_v0, %v1021_v41 }
 0x3ce   :  { %1907 = vmatpush.bf16.msra.mxu3 %v5444_v35  ;;  %v5584_v35 = vld [vmem:[%s7126_s5 + $0x5c0] sm:$0xff] }
 0x3cf   :  { %v1131_v48 = vmax.f32 %v1022_v59, 0.0 }
 0x3d0   :  { %3901 = vmatpush.bf16.msra.mxu2 %v5585_v16 }
 0x3d1   :  { %v1227_v18 = vpack.c.bf16 %v1131_v48, %v1131_v48  ;;  %4408 = vmatmul.msk.bf16.vlgmr.msrb.gmra.mxu3 %vm1282_vm1, %v6132_v33 }
 0x3d2   :  { %2018 = vmatpush.bf16.msrb.mxu3 %v5455_v3 }
 0x3d3   :  { %v3695_v63 = vunpack.c.l.b16 %v1227_v18  ;;  %v5460_v18 = vld [vmem:[%s7126_s5 + $0x1e0] sm:$0xff] }
 0x3d4   :  { %v1024_v43 = vpop.f32.mrf.mxu3  ;;  %3902 = vmatpush.bf16.msra.mxu2 %v5584_v35  ;;  %v5479_v35 = vld [vmem:[%s7126_s5 + $0x278] sm:$0xff] }
 0x3d5   :  { %v6776_v8 = vpack.c.b16 %v3695_v63, %v3694_v55  ;;  %v1025_v33 = vadd.f32 %v6661_v0, %v1024_v43  ;;  %v5471_v43 = vld [vmem:[%s7126_s5 + $0x238] sm:$0xff] }
 0x3d6   :  { %2019 = vmatpush.bf16.msrb.mxu3 %v5454_v51 }
 0x3d7   :  { %v1132_v7 = vmax.f32 %v1025_v33, 0.0 }
 0x3d9   :  { %v1228_v31 = vpack.c.bf16 %v1132_v7, %v1132_v7 }
 0x3da   :  { %2020 = vmatpush.bf16.msrb.mxu3 %v5453_v14 }
 0x3db   :  { %v3751_v52 = vunpack.c.l.b16 %v1228_v31 }
 0x3dc   :  { %v1026_v36 = vpop.f32.mrf.mxu3 }
 0x3dd   :  { %v1027_v44 = vadd.f32 %v6661_v0, %v1026_v36 }
 0x3de   :  { %2021 = vmatpush.bf16.msrb.mxu3 %v5452_v46  ;;  %v5470_v46 = vld [vmem:[%s7126_s5 + $0x230] sm:$0xff] }
 0x3df   :  { %v1133_v56 = vmax.f32 %v1027_v44, 0.0 }
 0x3e1   :  { %v1229_v21 = vpack.c.bf16 %v1133_v56, %v1133_v56  ;;  %4458 = vmatmul.msk.bf16.vlgmr.msra.gmra.mxu3 %vm1282_vm1, %v6173_v27  ;;  %v6811_v27 = vpop.f32.mrf.mxu2 }
 0x3e2   :  { %2132 = vmatpush.bf16.msra.mxu3 %v5463_v4  ;;  %v5469_v4 = vld [vmem:[%s7126_s5 + $0x228] sm:$0xff] }
 0x3e3   :  { %v3752_v41 = vunpack.c.l.b16 %v1229_v21 }
 0x3e4   :  { %v1029_v59 = vpop.f32.mrf.mxu3 }
 0x3e5   :  { %v3753_v3 = vpack.c.b16 %v3752_v41, %v3751_v52  ;;  %v1030_v48 = vadd.f32 %v6661_v0, %v1029_v59 }
 0x3e6   :  { %2133 = vmatpush.bf16.msra.mxu3 %v5462_v34 }
 0x3e7   :  { %5283 = vmatmul.msk.bf16.vlgmr.msrb.gmra.mxu2 %vm1282_vm1, %v3753_v3  ;;  %v1134_v51 = vmax.f32 %v1030_v48, 0.0  ;;  %v5478_v3 = vld [vmem:[%s7126_s5 + $0x270] sm:$0xff] }
 0x3e9   :  { %v1230_v14 = vpack.c.bf16 %v1134_v51, %v1134_v51  ;;  %v6836_v21 = vpop.f32.mrf.mxu2 }
 0x3ea   :  { %2134 = vmatpush.bf16.msra.mxu3 %v5461_v9 }
 0x3eb   :  { %v3808_v47 = vunpack.c.l.b16 %v1230_v14 }
 0x3ec   :  { %v1031_v55 = vpop.f32.mrf.mxu3 }
 0x3ed   :  { %v1032_v63 = vadd.f32 %v6661_v0, %v1031_v55  ;;  %v5477_v55 = vld [vmem:[%s7126_s5 + $0x268] sm:$0xff] }
 0x3ee   :  { %2135 = vmatpush.bf16.msra.mxu3 %v5460_v18 }
 0x3ef   :  { %v1135_v39 = vmax.f32 %v1032_v63, 0.0 }
 0x3f1   :  { %v1231_v33 = vpack.c.bf16 %v1135_v39, %v1135_v39  ;;  %4508 = vmatmul.msk.bf16.vlgmr.msrb.gmra.mxu3 %vm1282_vm1, %v6219_v26  ;;  %v5468_v26 = vld [vmem:[%s7126_s5 + $0x220] sm:$0xff]  ;;  %v6850_v63 = vpop.f32.mrf.mxu2 }
 0x3f2   :  { %2246 = vmatpush.bf16.msrb.mxu3 %v5471_v43 }
 0x3f3   :  { %v3809_v7 = vunpack.c.l.b16 %v1231_v33 }
 0x3f4   :  { %v1034_v36 = vpop.f32.mrf.mxu3 }
 0x3f5   :  { %v6827_v44 = vpack.c.b16 %v3809_v7, %v3808_v47  ;;  %v1035_v16 = vadd.f32 %v6661_v0, %v1034_v36 }
 0x3f6   :  { %2247 = vmatpush.bf16.msrb.mxu3 %v5470_v46  ;;  %v5487_v46 = vld [vmem:[%s7126_s5 + $0x2b8] sm:$0xff] }
 0x3f7   :  { %v1136_v31 = vmax.f32 %v1035_v16, 0.0 }
 0x3f9   :  { %v1232_v52 = vpack.c.bf16 %v1136_v31, %v1136_v31 }
 0x3fa   :  { %2248 = vmatpush.bf16.msrb.mxu3 %v5469_v4  ;;  %v5486_v4 = vld [vmem:[%s7126_s5 + $0x2b0] sm:$0xff] }
 0x3fb   :  { %v3865_v9 = vunpack.c.l.b16 %v1232_v52  ;;  %v5495_v52 = vld [vmem:[%s7126_s5 + $0x2f8] sm:$0xff] }
 0x3fc   :  { %v1036_v56 = vpop.f32.mrf.mxu3 }
 0x3fd   :  { %v1037_v34 = vadd.f32 %v6661_v0, %v1036_v56 }
 0x3fe   :  { %2249 = vmatpush.bf16.msrb.mxu3 %v5468_v26 }
 0x3ff   :  { %v1137_v41 = vmax.f32 %v1037_v34, 0.0  ;;  %v5485_v34 = vld [vmem:[%s7126_s5 + $0x2a8] sm:$0xff] }
 0x401   :  { %v1233_v59 = vpack.c.bf16 %v1137_v41, %v1137_v41  ;;  %4558 = vmatmul.msk.bf16.vlgmr.msra.gmra.mxu3 %vm1282_vm1, %v6260_v32  ;;  %v5476_v32 = vld [vmem:[%s7126_s5 + $0x260] sm:$0xff] }
 0x402   :  { %2360 = vmatpush.bf16.msra.mxu3 %v5479_v35 }
 0x403   :  { %v3866_v48 = vunpack.c.l.b16 %v1233_v59  ;;  %v5494_v59 = vld [vmem:[%s7126_s5 + $0x2f0] sm:$0xff] }
 0x404   :  { %v1039_v18 = vpop.f32.mrf.mxu3 }
 0x405   :  { %v3867_v51 = vpack.c.b16 %v3866_v48, %v3865_v9  ;;  %v1040_v43 = vadd.f32 %v6661_v0, %v1039_v18  ;;  %v5493_v18 = vld [vmem:[%s7126_s5 + $0x2e8] sm:$0xff] }
 0x406   :  { %2361 = vmatpush.bf16.msra.mxu3 %v5478_v3 }
 0x407   :  { %5333 = vmatmul.msk.bf16.vlgmr.msra.gmra.mxu2 %vm1282_vm1, %v3867_v51  ;;  %v1138_v14 = vmax.f32 %v1040_v43, 0.0 }
 0x409   :  { %v1234_v47 = vpack.c.bf16 %v1138_v14, %v1138_v14 }
 0x40a   :  { %2362 = vmatpush.bf16.msra.mxu3 %v5477_v55 }
 0x40b   :  { %v3922_v16 = vunpack.c.l.b16 %v1234_v47 }
 0x40c   :  { %v1041_v39 = vpop.f32.mrf.mxu3 }
 0x40d   :  { %v1042_v33 = vadd.f32 %v6661_v0, %v1041_v39 }
 0x40e   :  { %2363 = vmatpush.bf16.msra.mxu3 %v5476_v32 }
 0x40f   :  { %v1139_v7 = vmax.f32 %v1042_v33, 0.0  ;;  %v5500_v33 = vld [vmem:[%s7126_s5 + $0x320] sm:$0xff] }
 0x411   :  { %v1235_v36 = vpack.c.bf16 %v1139_v7, %v1139_v7  ;;  %4608 = vmatmul.msk.bf16.vlgmr.msrb.gmra.mxu3 %vm1282_vm1, %v6301_v38  ;;  %v5484_v38 = vld [vmem:[%s7126_s5 + $0x2a0] sm:$0xff]  ;;  %v5510_v7 = vld [vmem:[%s7126_s5 + $0x370] sm:$0xff] }
 0x412   :  { %2474 = vmatpush.bf16.msrb.mxu3 %v5487_v46 }
 0x413   :  { %v3923_v26 = vunpack.c.l.b16 %v1235_v36 }
 0x414   :  { %v1341_v31 = vpop.f32.mrf.mxu3 }
 0x415   :  { %v6866_v56 = vpack.c.b16 %v3923_v26, %v3922_v16  ;;  %v1342_v41 = vadd.f32 %v1341_v31, %v6411_v37  ;;  %v5508_v26 = vld [vmem:[%s7126_s5 + $0x360] sm:$0xff] }
 0x416   :  { %2475 = vmatpush.bf16.msrb.mxu3 %v5486_v4 }
 0x417   :  { %v1401_v3 = vadd.f32 %v6441_v2, %v1342_v41  ;;  %v5503_v2 = vld [vmem:[%s7126_s5 + $0x338] sm:$0xff] }
 0x41a   :  { %2476 = vmatpush.bf16.msrb.mxu3 %v5485_v34 }
 0x41c   :  { %v1343_v35 = vpop.f32.mrf.mxu3 }
 0x41d   :  { %v1344_v51 = vadd.f32 %v1343_v35, %v6422_v13  ;;  %v5502_v13 = vld [vmem:[%s7126_s5 + $0x330] sm:$0xff] }
 0x41e   :  { %2477 = vmatpush.bf16.msrb.mxu3 %v5484_v38  ;;  %v5518_v38 = vld [vmem:[%s7126_s5 + $0x3b0] sm:$0xff] }
 0x41f   :  { %v1402_v37 = vadd.f32 %v6452_v45, %v1344_v51  ;;  %v5501_v45 = vld [vmem:[%s7126_s5 + $0x328] sm:$0xff] }
 0x421   :  { %4658 = vmatmul.msk.bf16.vlgmr.msra.gmra.mxu3 %vm1282_vm1, %v6347_v57  ;;  %v5492_v57 = vld [vmem:[%s7126_s5 + $0x2e0] sm:$0xff] }
 0x422   :  { %2588 = vmatpush.bf16.msra.mxu3 %v5495_v52 }
 0x424   :  { %v1453_v9 = vpop.f32.mrf.mxu3 }
 0x425   :  { %v1458_v48 = vadd.f32 %v1453_v9, %v1401_v3 }
 0x426   :  { %2589 = vmatpush.bf16.msra.mxu3 %v5494_v59  ;;  %v5516_v59 = vld [vmem:[%s7126_s5 + $0x3a0] sm:$0xff] }
 0x427   :  { %v1515_v32 = vadd.f32 %v6468_v42, %v1458_v48  ;;  %v5511_v42 = vld [vmem:[%s7126_s5 + $0x378] sm:$0xff]  ;;  %v5526_v48 = vld [vmem:[%s7126_s5 + $0x3f0] sm:$0xff] }
 0x42a   :  { %2590 = vmatpush.bf16.msra.mxu3 %v5493_v18 }
 0x42c   :  { %v1455_v55 = vpop.f32.mrf.mxu3 }
 0x42d   :  { %v1459_v43 = vadd.f32 %v1455_v55, %v1402_v37  ;;  %v5524_v37 = vld [vmem:[%s7126_s5 + $0x3e0] sm:$0xff] }
 0x42e   :  { %2591 = vmatpush.bf16.msra.mxu3 %v5492_v57 }
 0x431   :  { %4708 = vmatmul.msk.bf16.vlgmr.msrb.gmra.mxu3 %vm1282_vm1, %v6375_v5  ;;  %v1516_v5 = vadd.f32 %v6479_v24, %v1459_v43  ;;  %v5509_v24 = vld [vmem:[%s7126_s5 + $0x368] sm:$0xff] }
 0x432   :  { %2702 = vmatpush.bf16.msrb.mxu3 %v5503_v2  ;;  %v5534_v2 = vld [vmem:[%s7126_s5 + $0x430] sm:$0xff] }
 0x434   :  { %v1567_v14 = vpop.f32.mrf.mxu3 }
 0x435   :  { %v1572_v39 = vadd.f32 %v1567_v14, %v1515_v32 }
 0x436   :  { %2703 = vmatpush.bf16.msrb.mxu3 %v5502_v13 }
 0x437   :  { %v1629_v36 = vadd.f32 %v6504_v25, %v1572_v39  ;;  %v5519_v25 = vld [vmem:[%s7126_s5 + $0x3b8] sm:$0xff]  ;;  %v5532_v39 = vld [vmem:[%s7126_s5 + $0x420] sm:$0xff] }
 0x43a   :  { %2704 = vmatpush.bf16.msrb.mxu3 %v5501_v45 }
 0x43c   :  { %v1569_v46 = vpop.f32.mrf.mxu3 }
 0x43d   :  { %v1573_v47 = vadd.f32 %v1569_v46, %v1516_v5  ;;  %v979_v5 = vpop.f32.mrf.mxu1  ;;  %v5542_v46 = vld [vmem:[%s7126_s5 + $0x470] sm:$0xff] }
 0x43e   :  { %2705 = vmatpush.bf16.msrb.mxu3 %v5500_v33 }
 0x441   :  { %4758 = vmatmul.msk.bf16.vlgmr.msra.gmra.mxu3 %vm1282_vm1, %v6402_v22  ;;  %v1630_v22 = vadd.f32 %v6513_v62, %v1573_v47  ;;  %v5517_v62 = vld [vmem:[%s7126_s5 + $0x3a8] sm:$0xff] }
 0x442   :  { %2816 = vmatpush.bf16.msra.mxu3 %v5511_v42 }
 0x444   :  { %v1681_v4 = vpop.f32.mrf.mxu3 }
 0x445   :  { %v1686_v16 = vadd.f32 %v1681_v4, %v1629_v36  ;;  %v981_v4 = vpop.f32.mrf.mxu1 }
 0x446   :  { %2817 = vmatpush.bf16.msra.mxu3 %v5510_v7  ;;  %v5541_v7 = vld [vmem:[%s7126_s5 + $0x468] sm:$0xff] }
 0x447   :  { %v1743_v35 = vadd.f32 %v6538_v60, %v1686_v16  ;;  %v5527_v60 = vld [vmem:[%s7126_s5 + $0x3f8] sm:$0xff] }
 0x44a   :  { %2818 = vmatpush.bf16.msra.mxu3 %v5509_v24 }
 0x44c   :  { %v1683_v31 = vpop.f32.mrf.mxu3 }
 0x44d   :  { %v1687_v34 = vadd.f32 %v1683_v31, %v1630_v22  ;;  %v980_v22 = vadd.f32 %v6661_v0, %v979_v5  ;;  %v5573_v5 = vld [vmem:[%s7126_s5 + $0x568] sm:$0xff] }
 0x44e   :  { %2819 = vmatpush.bf16.msra.mxu3 %v5508_v26  ;;  %v982_v26 = vadd.f32 %v6661_v0, %v981_v4 }
 0x450   :  { %v1115_v31 = vmax.f32 %v982_v26, 0.0 }
 0x451   :  { %4808 = vmatmul.msk.bf16.vlgmr.msrb.gmra.mxu3 %vm1282_vm1, %v6429_v49  ;;  %v1744_v49 = vadd.f32 %v6547_v28, %v1687_v34  ;;  %v5525_v28 = vld [vmem:[%s7126_s5 + $0x3e8] sm:$0xff] }
 0x452   :  { %2930 = vmatpush.bf16.msrb.mxu3 %v5519_v25  ;;  %v1211_v0 = vpack.c.bf16 %v1115_v31, %v1115_v31  ;;  %v5590_v31 = vld [vmem:[%s7126_s5 + $0x5f0] sm:$0xff] }
 0x454   :  { %v1795_v52 = vpop.f32.mrf.mxu3 }
 0x455   :  { %v1800_v41 = vadd.f32 %v1795_v52, %v1743_v35  ;;  %v5549_v52 = vld [vmem:[%s7126_s5 + $0x4a8] sm:$0xff] }
 0x456   :  { %2931 = vmatpush.bf16.msrb.mxu3 %v5518_v38  ;;  %v1114_v38 = vmax.f32 %v980_v22, 0.0 }
 0x457   :  { %v1857_v18 = vadd.f32 %v6571_v12, %v1800_v41  ;;  %v5535_v12 = vld [vmem:[%s7126_s5 + $0x438] sm:$0xff] }
 0x458   :  { %v1210_v41 = vpack.c.bf16 %v1114_v38, %v1114_v38 }
 0x45a   :  { %2932 = vmatpush.bf16.msrb.mxu3 %v5517_v62  ;;  %v3239_v62 = vunpack.c.l.b16 %v1211_v0  ;;  %v5588_v0 = vld [vmem:[%s7126_s5 + $0x5e0] sm:$0xff] }
 0x45c   :  { %v1797_v3 = vpop.f32.mrf.mxu3 }
 0x45d   :  { %v1801_v9 = vadd.f32 %v1797_v3, %v1744_v49 }
 0x45e   :  { %2933 = vmatpush.bf16.msrb.mxu3 %v5516_v59 }
 0x461   :  { %4858 = vmatmul.msk.bf16.vlgmr.msra.gmra.mxu3 %vm1282_vm1, %v6459_v23  ;;  %v1858_v23 = vadd.f32 %v6580_v54, %v1801_v9  ;;  %v5533_v54 = vld [vmem:[%s7126_s5 + $0x428] sm:$0xff]  ;;  %v5559_v9 = vld [vmem:[%s7126_s5 + $0x4f8] sm:$0xff] }
 0x462   :  { %3044 = vmatpush.bf16.msra.mxu3 %v5527_v60 }
 0x464   :  { %v1909_v51 = vpop.f32.mrf.mxu3 }
 0x465   :  { %v1914_v57 = vadd.f32 %v1909_v51, %v1857_v18 }
 0x466   :  { %3045 = vmatpush.bf16.msra.mxu3 %v5526_v48  ;;  %v5558_v48 = vld [vmem:[%s7126_s5 + $0x4f0] sm:$0xff] }
 0x467   :  { %v1971_v13 = vadd.f32 %v6604_v20, %v1914_v57  ;;  %v5543_v20 = vld [vmem:[%s7126_s5 + $0x478] sm:$0xff]  ;;  %v5557_v57 = vld [vmem:[%s7126_s5 + $0x4e8] sm:$0xff] }
 0x46a   :  { %3046 = vmatpush.bf16.msra.mxu3 %v5525_v28  ;;  %v5556_v28 = vld [vmem:[%s7126_s5 + $0x4e0] sm:$0xff] }
 0x46c   :  { %v1911_v55 = vpop.f32.mrf.mxu3 }
 0x46d   :  { %v1915_v43 = vadd.f32 %v1911_v55, %v1858_v23 }
 0x46e   :  { %3047 = vmatpush.bf16.msra.mxu3 %v5524_v37 }
 0x471   :  { %4908 = vmatmul.msk.bf16.vlgmr.msrb.gmra.mxu3 %vm1282_vm1, %v6491_v6  ;;  %v1972_v6 = vadd.f32 %v6617_v58, %v1915_v43  ;;  %v5566_v43 = vld [vmem:[%s7126_s5 + $0x530] sm:$0xff] }
 0x472   :  { %3158 = vmatpush.bf16.msrb.mxu3 %v5535_v12 }
 0x474   :  { %v2023_v32 = vpop.f32.mrf.mxu3 }
 0x475   :  { %v2028_v14 = vadd.f32 %v2023_v32, %v1971_v13  ;;  %v2650_v32 = vpop.f32.mrf.mxu2 }
 0x476   :  { %3159 = vmatpush.bf16.msrb.mxu3 %v5534_v2 }
 0x477   :  { %v2085_v47 = vadd.f32 %v6647_v53, %v2028_v14  ;;  %v5551_v53 = vld [vmem:[%s7126_s5 + $0x4b8] sm:$0xff] }
 0x47a   :  { %3160 = vmatpush.bf16.msrb.mxu3 %v5533_v54 }
 0x47c   :  { %v2025_v45 = vpop.f32.mrf.mxu3 }
 0x47d   :  { %v2029_v33 = vadd.f32 %v2025_v45, %v1972_v6  ;;  %v5574_v6 = vld [vmem:[%s7126_s5 + $0x570] sm:$0xff] }
 0x47e   :  { %3161 = vmatpush.bf16.msrb.mxu3 %v5532_v39 }
 0x47f   :  { %v2086_v36 = vadd.f32 %v6656_v15, %v2029_v33  ;;  %v5550_v15 = vld [vmem:[%s7126_s5 + $0x4b0] sm:$0xff]  ;;  %v2652_v33 = vpop.f32.mrf.mxu2 }
 0x481   :  { %4958 = vmatmul.msk.bf16.vlgmr.msra.gmra.mxu3 %vm1282_vm1, %v6522_v30  ;;  %v5540_v30 = vld [vmem:[%s7126_s5 + $0x460] sm:$0xff] }
 0x482   :  { %3272 = vmatpush.bf16.msra.mxu3 %v5543_v20 }
 0x484   :  { %v2137_v42 = vpop.f32.mrf.mxu3 }
 0x485   :  { %v2142_v58 = vadd.f32 %v2137_v42, %v2085_v47 }
 0x486   :  { %3273 = vmatpush.bf16.msra.mxu3 %v5542_v46 }
 0x487   :  { %v2199_v34 = vadd.f32 %v6689_v61, %v2142_v58  ;;  %v3238_v61 = vunpack.c.l.b16 %v1210_v41  ;;  %v2764_v47 = vpop.f32.mrf.mxu2 }
 0x489   :  { %v3240_v60 = vpack.c.b16 %v3239_v62, %v3238_v61 }
 0x48a   :  { %3274 = vmatpush.bf16.msra.mxu3 %v5541_v7  ;;  %v5582_v7 = vld [vmem:[%s7126_s5 + $0x5b0] sm:$0xff] }
 0x48c   :  { %v2139_v16 = vpop.f32.mrf.mxu3 }
 0x48d   :  { %v2143_v24 = vadd.f32 %v2139_v16, %v2086_v36  ;;  %v5581_v16 = vld [vmem:[%s7126_s5 + $0x5a8] sm:$0xff] }
 0x48e   :  { %3275 = vmatpush.bf16.msra.mxu3 %v5540_v30 }
 0x48f   :  { %v2200_v59 = vadd.f32 %v6709_v1, %v2143_v24  ;;  %v5580_v24 = vld [vmem:[%s7126_s5 + $0x5a0] sm:$0xff] }
 0x491   :  { %5008 = vmatmul.msk.bf16.vlgmr.msrb.gmra.mxu3 %vm1282_vm1, %v6561_v10  ;;  %v5548_v10 = vld [vmem:[%s7126_s5 + $0x4a0] sm:$0xff] }
 0x492   :  { %3386 = vmatpush.bf16.msrb.mxu3 %v5551_v53 }
 0x494   :  { %v2251_v25 = vpop.f32.mrf.mxu3 }
 0x495   :  { %v2256_v35 = vadd.f32 %v2251_v25, %v2199_v34 }
 0x496   :  { %3387 = vmatpush.bf16.msrb.mxu3 %v5550_v15  ;;  %v5591_v15 = vld [vmem:[%s7126_s5 + $0x5f8] sm:$0xff] }
 0x497   :  { %v2313_v18 = vadd.f32 %v6740_v29, %v2256_v35  ;;  %v5567_v29 = vld [vmem:[%s7126_s5 + $0x538] sm:$0xff]  ;;  %v5589_v35 = vld [vmem:[%s7126_s5 + $0x5e8] sm:$0xff] }
 0x49a   :  { %3388 = vmatpush.bf16.msrb.mxu3 %v5549_v52 }
 0x49c   :  { %v2253_v49 = vpop.f32.mrf.mxu3 }
 0x49d   :  { %v2257_v3 = vadd.f32 %v2253_v49, %v2200_v59 }
 0x49e   :  { %3389 = vmatpush.bf16.msrb.mxu3 %v5548_v10 }
 0x49f   :  { %v2314_v37 = vadd.f32 %v6760_v40, %v2257_v3  ;;  %v5565_v40 = vld [vmem:[%s7126_s5 + $0x528] sm:$0xff] }
 0x4a1   :  { %5058 = vmatmul.msk.bf16.vlgmr.msra.gmra.mxu3 %vm1282_vm1, %v3240_v60 }
 0x4a2   :  { %3500 = vmatpush.bf16.msra.mxu3 %v5559_v9 }
 0x4a4   :  { %v2365_v51 = vpop.f32.mrf.mxu3 }
 0x4a5   :  { %v2370_v1 = vadd.f32 %v2365_v51, %v2313_v18 }
 0x4a6   :  { %3501 = vmatpush.bf16.msra.mxu3 %v5558_v48 }
 0x4a7   :  { %v2427_v12 = vadd.f32 %v6791_v11, %v2370_v1  ;;  %v5575_v11 = vld [vmem:[%s7126_s5 + $0x578] sm:$0xff] }
 0x4aa   :  { %3502 = vmatpush.bf16.msra.mxu3 %v5557_v57 }
 0x4ac   :  { %v2367_v23 = vpop.f32.mrf.mxu3 }
 0x4ad   :  { %v2371_v55 = vadd.f32 %v2367_v23, %v2314_v37 }
 0x4ae   :  { %3503 = vmatpush.bf16.msra.mxu3 %v5556_v28 }
 0x4af   :  { %v2428_v14 = vadd.f32 %v6811_v27, %v2371_v55 }
 0x4b1   :  { %5108 = vmatmul.msk.bf16.vlgmr.msrb.gmra.mxu3 %vm1282_vm1, %v6628_v17  ;;  %v5564_v17 = vld [vmem:[%s7126_s5 + $0x520] sm:$0xff] }
 0x4b2   :  { %3614 = vmatpush.bf16.msrb.mxu3 %v5567_v29 }
 0x4b4   :  { %v2479_v2 = vpop.f32.mrf.mxu3 }
 0x4b5   :  { %v2484_v13 = vadd.f32 %v2479_v2, %v2427_v12 }
 0x4b6   :  { %3615 = vmatpush.bf16.msrb.mxu3 %v5566_v43 }
 0x4b7   :  { %v2541_v45 = vadd.f32 %v6836_v21, %v2484_v13  ;;  %v5583_v21 = vld [vmem:[%s7126_s5 + $0x5b8] sm:$0xff] }
 0x4ba   :  { %3616 = vmatpush.bf16.msrb.mxu3 %v5565_v40 }
 0x4bc   :  { %v2481_v54 = vpop.f32.mrf.mxu3 }
 0x4bd   :  { %v2485_v39 = vadd.f32 %v2481_v54, %v2428_v14 }
 0x4be   :  { %3617 = vmatpush.bf16.msrb.mxu3 %v5564_v17 }
 0x4bf   :  { %v2542_v46 = vadd.f32 %v6850_v63, %v2485_v39  ;;  %v2766_v63 = vpop.f32.mrf.mxu2 }
 0x4c1   :  { %5158 = vmatmul.msk.bf16.vlgmr.msra.gmra.mxu3 %vm1282_vm1, %v6674_v50  ;;  %v5572_v50 = vld [vmem:[%s7126_s5 + $0x560] sm:$0xff] }
 0x4c2   :  { %3728 = vmatpush.bf16.msra.mxu3 %v5575_v11 }
 0x4c4   :  { %v2593_v20 = vpop.f32.mrf.mxu3 }
 0x4c5   :  { %v2598_v27 = vadd.f32 %v2593_v20, %v2541_v45 }
 0x4c6   :  { %3729 = vmatpush.bf16.msra.mxu3 %v5574_v6 }
 0x4c7   :  { %v2655_v30 = vadd.f32 %v2650_v32, %v2598_v27  ;;  %v2878_v22 = vpop.f32.mrf.mxu2 }
 0x4ca   :  { %3730 = vmatpush.bf16.msra.mxu3 %v5573_v5 }
 0x4cc   :  { %v2595_v42 = vpop.f32.mrf.mxu3 }
 0x4cd   :  { %v2599_v58 = vadd.f32 %v2595_v42, %v2542_v46 }
 0x4ce   :  { %3731 = vmatpush.bf16.msra.mxu3 %v5572_v50 }
 0x4cf   :  { %v2880_v52 = vpop.f32.mrf.mxu2 }
 0x4d1   :  { %5208 = vmatmul.msk.bf16.vlgmr.msrb.gmra.mxu3 %vm1282_vm1, %v6725_v19  ;;  %v2656_v19 = vadd.f32 %v2652_v33, %v2599_v58 }
 0x4d2   :  { %3842 = vmatpush.bf16.msrb.mxu3 %v5583_v21 }
 0x4d4   :  { %v2707_v36 = vpop.f32.mrf.mxu3 }
 0x4d5   :  { %v2712_v4 = vadd.f32 %v2707_v36, %v2655_v30  ;;  %v5599_v30 = vld [vmem:[%s7129_s7 + $0x38] sm:$0xff]  ;;  %v5598_v36 = vld [vmem:[%s7129_s7 + $0x30] sm:$0xff] }
 0x4d6   :  { %3843 = vmatpush.bf16.msrb.mxu3 %v5582_v7  ;;  %4045 = vmatpush.bf16.msrb.mxu2 %v5599_v30 }
 0x4d7   :  { %v2769_v34 = vadd.f32 %v2764_v47, %v2712_v4  ;;  %v2992_v62 = vpop.f32.mrf.mxu2 }
 0x4da   :  { %3844 = vmatpush.bf16.msrb.mxu3 %v5581_v16  ;;  %4046 = vmatpush.bf16.msrb.mxu2 %v5598_v36  ;;  %v5597_v16 = vld [vmem:[%s7129_s7 + $0x28] sm:$0xff] }
 0x4dc   :  { %v2709_v53 = vpop.f32.mrf.mxu3 }
 0x4dd   :  { %v2713_v26 = vadd.f32 %v2709_v53, %v2656_v19  ;;  %v5595_v53 = vld [vmem:[%s7129_s7 + $0x18] sm:$0xff] }
 0x4de   :  { %3845 = vmatpush.bf16.msrb.mxu3 %v5580_v24  ;;  %4047 = vmatpush.bf16.msrb.mxu2 %v5597_v16  ;;  %v5596_v24 = vld [vmem:[%s7129_s7 + $0x20] sm:$0xff] }
 0x4df   :  { %v2994_v3 = vpop.f32.mrf.mxu2 }
 0x4e1   :  { %5258 = vmatmul.msk.bf16.vlgmr.msra.gmra.mxu3 %vm1282_vm1, %v6776_v8  ;;  %v2770_v8 = vadd.f32 %v2766_v63, %v2713_v26 }
 0x4e2   :  { %3956 = vmatpush.bf16.msra.mxu3 %v5591_v15  ;;  %4048 = vmatpush.bf16.msrb.mxu2 %v5596_v24 }
 0x4e4   :  { %v2821_v25 = vpop.f32.mrf.mxu3 }
 0x4e5   :  { %v2826_v38 = vadd.f32 %v2821_v25, %v2769_v34 }
 0x4e6   :  { %3957 = vmatpush.bf16.msra.mxu3 %v5590_v31  ;;  %4049 = vmatpush.bf16.msrb.mxu2 %v5595_v53  ;;  %v5593_v31 = vld [vmem:[%s7129_s7 + $0x8] sm:$0xff] }
 0x4e7   :  { %v2883_v59 = vadd.f32 %v2878_v22, %v2826_v38  ;;  %v3106_v18 = vpop.f32.mrf.mxu2  ;;  %v5594_v22 = vld [vmem:[%s7129_s7 + $0x10] sm:$0xff] }
 0x4ea   :  { %3958 = vmatpush.bf16.msra.mxu3 %v5589_v35  ;;  %4050 = vmatpush.bf16.msrb.mxu2 %v5594_v22 }
 0x4ec   :  { %v2823_v41 = vpop.f32.mrf.mxu3 }
 0x4ed   :  { %v2827_v10 = vadd.f32 %v2823_v41, %v2770_v8 }
 0x4ee   :  { %3959 = vmatpush.bf16.msra.mxu3 %v5588_v0  ;;  %4051 = vmatpush.bf16.msrb.mxu2 %v5593_v31 }
 0x4ef   :  { %v2884_v9 = vadd.f32 %v2880_v52, %v2827_v10  ;;  %v3108_v37 = vpop.f32.mrf.mxu2  ;;  %v5592_v52 = vld [vmem:[%s7129_s7] sm:$0xff] }
 0x4f1   :  { %5308 = vmatmul.msk.bf16.vlgmr.msrb.gmra.mxu3 %vm1282_vm1, %v6827_v44 }
 0x4f2   :  { %4052 = vmatpush.bf16.msrb.mxu2 %v5592_v52 }
 0x4f4   :  { %v2935_v49 = vpop.f32.mrf.mxu3 }
 0x4f5   :  { %v2940_v61 = vadd.f32 %v2935_v49, %v2883_v59 }
 0x4f7   :  { %v2997_v51 = vadd.f32 %v2992_v62, %v2940_v61  ;;  %v3220_v44 = vpop.f32.mrf.mxu2 }
 0x4fc   :  { %v2937_v60 = vpop.f32.mrf.mxu3 }
 0x4fd   :  { %v2941_v48 = vadd.f32 %v2937_v60, %v2884_v9 }
 0x4ff   :  { %v2998_v28 = vadd.f32 %v2994_v3, %v2941_v48  ;;  %v3222_v32 = vpop.f32.mrf.mxu2 }
 0x501   :  { %5358 = vmatmul.msk.bf16.vlgmr.msra.gmra.mxu3 %vm1282_vm1, %v6866_v56 }
 0x504   :  { %v3049_v1 = vpop.f32.mrf.mxu3 }
 0x505   :  { %v3054_v57 = vadd.f32 %v3049_v1, %v2997_v51 }
 0x507   :  { %v3111_v29 = vadd.f32 %v3106_v18, %v3054_v57  ;;  %v3334_v56 = vpop.f32.mrf.mxu2 }
 0x50c   :  { %v3051_v23 = vpop.f32.mrf.mxu3 }
 0x50d   :  { %v3055_v55 = vadd.f32 %v3051_v23, %v2998_v28 }
 0x50f   :  { %v3112_v2 = vadd.f32 %v3108_v37, %v3055_v55  ;;  %v3336_v33 = vpop.f32.mrf.mxu2 }
 0x514   :  { %v3163_v43 = vpop.f32.mrf.mxu3 }
 0x515   :  { %v3168_v12 = vadd.f32 %v3163_v43, %v3111_v29  ;;  %v5611_v43 = vld [vmem:[%s7127_s6] ss:$0 sm:$0xff] }
 0x517   :  { %v3225_v17 = vadd.f32 %v3220_v44, %v3168_v12  ;;  %v3448_v5 = vpop.f32.mrf.mxu2 }
 0x51c   :  { %v3165_v13 = vpop.f32.mrf.mxu3 }
 0x51d   :  { %v3169_v40 = vadd.f32 %v3165_v13, %v3112_v2 }
 0x51f   :  { %v3226_v11 = vadd.f32 %v3222_v32, %v3169_v40  ;;  %v3450_v46 = vpop.f32.mrf.mxu2 }
 0x524   :  { %v3277_v14 = vpop.f32.mrf.mxu3 }
 0x525   :  { %v3282_v54 = vadd.f32 %v3277_v14, %v3225_v17 }
 0x527   :  { %v3339_v39 = vadd.f32 %v3334_v56, %v3282_v54  ;;  %v3562_v42 = vpop.f32.mrf.mxu2 }
 0x52c   :  { %v3279_v6 = vpop.f32.mrf.mxu3 }
 0x52d   :  { %v3283_v45 = vadd.f32 %v3279_v6, %v3226_v11 }
 0x52f   :  { %v3564_v21 = vpop.f32.mrf.mxu2  ;;  %v3340_v34 = vadd.f32 %v3336_v33, %v3283_v45 }
 0x534   :  { %v3391_v20 = vpop.f32.mrf.mxu3 }
 0x535   :  { %v3396_v27 = vadd.f32 %v3391_v20, %v3339_v39  ;;  %v5612_v39 = vld [vmem:[%s7128_s8] ss:$0 sm:$0xff] }
 0x537   :  { %v3676_v4 = vpop.f32.mrf.mxu2  ;;  %v3453_v35 = vadd.f32 %v3448_v5, %v3396_v27 }
 0x53c   :  { %v3393_v50 = vpop.f32.mrf.mxu3 }
 0x53d   :  { %v3397_v38 = vadd.f32 %v3393_v50, %v3340_v34 }
 0x53f   :  { %v3678_v26 = vpop.f32.mrf.mxu2  ;;  %v3454_v8 = vadd.f32 %v3450_v46, %v3397_v38 }
 0x544   :  { %v3505_v47 = vpop.f32.mrf.mxu3 }
 0x545   :  { %v3510_v0 = vadd.f32 %v3505_v47, %v3453_v35 }
 0x547   :  { %v3790_v25 = vpop.f32.mrf.mxu2  ;;  %v3567_v62 = vadd.f32 %v3562_v42, %v3510_v0 }
 0x54c   :  { %v3507_v58 = vpop.f32.mrf.mxu3 }
 0x54d   :  { %v3511_v10 = vadd.f32 %v3507_v58, %v3454_v8 }
 0x54f   :  { %v3792_v49 = vpop.f32.mrf.mxu2  ;;  %v3568_v61 = vadd.f32 %v3564_v21, %v3511_v10 }
 0x554   :  { %v3619_v7 = vpop.f32.mrf.mxu3 }
 0x555   :  { %v3624_v59 = vadd.f32 %v3619_v7, %v3567_v62 }
 0x557   :  { %v3681_v9 = vadd.f32 %v3676_v4, %v3624_v59  ;;  %v3904_v51 = vpop.f32.mrf.mxu2 }
 0x55c   :  { %v3621_v63 = vpop.f32.mrf.mxu3 }
 0x55d   :  { %v3625_v3 = vadd.f32 %v3621_v63, %v3568_v61 }
 0x55f   :  { %v3682_v18 = vadd.f32 %v3678_v26, %v3625_v3  ;;  %v3906_v12 = vpop.f32.mrf.mxu2 }
 0x564   :  { %v3733_v19 = vpop.f32.mrf.mxu3 }
 0x565   :  { %v3738_v48 = vadd.f32 %v3733_v19, %v3681_v9 }
 0x567   :  { %v3795_v57 = vadd.f32 %v3790_v25, %v3738_v48 }
 0x56c   :  { %v3735_v15 = vpop.f32.mrf.mxu3 }
 0x56d   :  { %v3739_v1 = vadd.f32 %v3735_v15, %v3682_v18 }
 0x56f   :  { %v3796_v23 = vadd.f32 %v3792_v49, %v3739_v1 }
 0x574   :  { %v3847_v41 = vpop.f32.mrf.mxu3 }
 0x575   :  { %v3852_v28 = vadd.f32 %v3847_v41, %v3795_v57 }
 0x577   :  { %v3909_v29 = vadd.f32 %v3904_v51, %v3852_v28 }
 0x57c   :  { %v3849_v60 = vpop.f32.mrf.mxu3 }
 0x57d   :  { %v3853_v55 = vadd.f32 %v3849_v60, %v3796_v23 }
 0x57f   :  { %v3910_v2 = vadd.f32 %v3906_v12, %v3853_v55 }
 0x584   :  { %v3961_v37 = vpop.f32.mrf.mxu3 }
 0x585   :  { %v3966_v44 = vadd.f32 %v3961_v37, %v3909_v29 }
 0x587   :  { %v3972_v40 = vadd.f32 %v5611_v43, %v3966_v44 }
 0x589   :  { %v3974_v14 = vmax.f32 %v3972_v40, 0.0 }
 0x58c   :  { %v3963_v13 = vpop.f32.mrf.mxu3 }
 0x58d   :  { %v3967_v32 = vadd.f32 %v3963_v13, %v3910_v2 }
 0x58f   :  { %v3973_v17 = vadd.f32 %v5611_v43, %v3967_v32 }
 0x591   :  { %v3975_v54 = vmax.f32 %v3973_v17, 0.0 }
 0x593   :  { %v3976_v56 = vpack.c.bf16 %v3975_v54, %v3974_v14 }
 0x595   :  { %4053 = vmatmul.bf16.vlgmr.msrb.gmra.mxu2 %v3976_v56 }
 0x618   :  { %v4054_v11 = vpop.f32.mrf.mxu2 }
 0x619   :  { %v4055_v6 = vadd.f32 %v5612_v39, %v4054_v11 }
 0x61b   :  { %4059 = vmax.xlane.f32.xlu0 %v4055_v6 }
 0x620   :  { %v4056_v45 = vpop.f32.mrf.mxu2 }
 0x621   :  { %v4057_v33 = vadd.f32 %v5612_v39, %v4056_v45 }
 0x623   :  { %4061 = vmax.xlane.f32.xlu0 %v4057_v33 }
 0x68e   :  { %v4060_v20 = vpop.xlane.xlu0 %4059 }
 0x68f   :  { %v4063_v27 = vsub.f32 %v4055_v6, %v4060_v20 }
 0x691   :  { %v4065_v5 = vmul.f32 1.442695, %v4063_v27 }
 0x693   :  { %5613 = vpow2.f32 %v4065_v5 }
 0x696   :  { %v4062_v50 = vpop.xlane.xlu0 %4061 }
 0x697   :  { %v4064_v46 = vsub.f32 %v4057_v33, %v4062_v50 }
 0x699   :  { %v5614_v47 = vpop.eup %5613  ;;  %v4067_v42 = vmul.f32 1.442695, %v4064_v46 }
 0x69a   :  { %4069 = vadd.xlane.f32.xlu1 %v5614_v47 }
 0x69b   :  { %5615 = vpow2.f32 %v4067_v42 }
 0x6a1   :  { %v5616_v58 = vpop.eup %5615 }
 0x6a2   :  { %4071 = vadd.xlane.f32.xlu1 %v5616_v58 }
 0x70d   :  { %v4070_v21 = vpop.xlane.xlu1 %4069 }
 0x70e   :  { %5617 = vrcp.f32 %v4070_v21 }
 0x714   :  { %v5618_v7 = vpop.eup %5617 }
 0x715   :  { %v4075_v30 = vmul.f32 %v5618_v7, %v5614_v47  ;;  %v4072_v36 = vpop.xlane.xlu1 %4071 }
 0x716   :  { %5619 = vrcp.f32 %v4072_v36 }
 0x717   :  { %4077 = vst [vmem:[%s7130_s9] sm:$0xff] %v4075_v30 }
 0x71c   :  { %v5620_v4 = vpop.eup %5619 }
 0x71d   :  { %v4076_v63 = vmul.f32 %v5620_v4, %v5616_v58 }
 0x71f   :  { %4078 = vst [vmem:[%s7130_s9 + $0x8] sm:$0xff] %v4076_v63 }

</bundles_post_ra>
